<compile_context>
chip_gen: v7x
topology: tpu7x:2x2x1
jax: 0.10.0
libtpu: 0.0.40
codegen_flags: <defaults>
</compile_context>

<pallas_src>
import numpy as np
import jax
import jax.numpy as jnp
from jax.experimental import pallas as pl
from jax.experimental.pallas import tpu as pltpu


def _pad128(n):
    return max(128, ((int(n) + 127) // 128) * 128)


def _make_kernel(H, L, n_start, n_pad, e_start, e_pad):
    """Kernel closure over the static (host-computed) level layout."""
    H3 = 3 * H

    def kernel(x_ref, c_ref, p_ref, pt_ref,
               w1_ref, b1_ref, w2_ref, b2_ref,
               wiouf_ref, biouf_ref, uiou_ref, uf_ref,
               hc_ref):
        f32, bf16 = jnp.float32, jnp.bfloat16

        def gates(iou):
            return (jax.nn.sigmoid(iou[:, :H]),
                    jax.nn.sigmoid(iou[:, H:2 * H]),
                    jnp.tanh(iou[:, 2 * H:H3]))

        # compression MLP: Linear -> ReLU -> Dropout(eval = identity) -> Linear -> ReLU
        xc = jnp.maximum(
            jnp.dot(x_ref[...], w1_ref[...], preferred_element_type=f32)
            + b1_ref[...], 0.0)
        xc = jnp.maximum(
            jnp.dot(xc.astype(bf16), w2_ref[...], preferred_element_type=f32)
            + b2_ref[...], 0.0)
        # fused input pre-activations: [:, :3H] = W_iou x + b_iou, [:, 3H:] = W_f x + b_f
        preact = jnp.dot(xc.astype(bf16), wiouf_ref[...],
                         preferred_element_type=f32) + biouf_ref[...]

        # zero-init state (also covers padded rows so no garbage is ever read)
        hc_ref[...] = jnp.zeros_like(hc_ref)

        # level 0 = leaves: h_sum = c_sum = 0
        leaf = n_pad[0]
        i0, o0, u0 = gates(preact[:leaf, :H3])
        c0 = i0 * u0
        hc_ref[0:leaf, 0:H] = o0 * jnp.tanh(c0)
        hc_ref[0:leaf, H:2 * H] = c0

        # levels 1..L-1, statically unrolled; all offsets/sizes are python ints
        # that are multiples of 128 (host-side level sort + padding).
        for lvl in range(1, L):
            ns, nc = n_start[lvl], n_pad[lvl]
            es, ec = e_start[lvl], e_pad[lvl]
            # gather child states onto this level's edges; all children live in
            # rows [0, ns) (levels strictly below lvl, already finalized).
            hc_prev = hc_ref[0:ns, :].astype(bf16)                       # (ns, 2H)
            hece = jnp.dot(c_ref[es:es + ec, 0:ns], hc_prev,
                           preferred_element_type=f32)                   # (ec, 2H)
            he, ce = hece[:, :H], hece[:, H:]
            # per-edge forget gate: sigmoid(W_f x_parent + b_f + U_f h_child)
            wfxe = jnp.dot(p_ref[es:es + ec, ns:ns + nc],
                           preact[ns:ns + nc, H3:].astype(bf16),
                           preferred_element_type=f32)                   # (ec, H)
            f_e = jax.nn.sigmoid(
                wfxe + jnp.dot(he.astype(bf16), uf_ref[...],
                               preferred_element_type=f32))
            # scatter [h_child | f*c_child] back onto this level's parent nodes
            sums = jnp.dot(pt_ref[ns:ns + nc, es:es + ec],
                           jnp.concatenate([he, f_e * ce], axis=1).astype(bf16),
                           preferred_element_type=f32)                   # (nc, 2H)
            h_sum, c_sum = sums[:, :H], sums[:, H:]
            iou = preact[ns:ns + nc, :H3] + jnp.dot(
                h_sum.astype(bf16), uiou_ref[...], preferred_element_type=f32)
            i, o, u = gates(iou)
            c_new = i * u + c_sum
            hc_ref[ns:ns + nc, 0:H] = o * jnp.tanh(c_new)
            hc_ref[ns:ns + nc, H:2 * H] = c_new

    return kernel


def tree_lstm_with_pre_compression(features, node_order, adjacency_list,
                                   edge_order, tree_sizes, params):
    """Forward pass of _TreeLstmWithPreCompression (eval mode)."""
    features = np.asarray(features, np.float32)
    node_order = np.asarray(node_order, np.int64)
    adjacency_list = np.asarray(adjacency_list, np.int64).reshape(-1, 2)
    edge_order = np.asarray(edge_order, np.int64)

    N, F = features.shape
    H = int(params['w2'].shape[1])
    E = adjacency_list.shape[0]
    L = int(node_order.max()) + 1

    # ---- host prep: level sort + 128-padding of each level's node/edge group.
    n_cnt = np.bincount(node_order, minlength=L)
    n_pad = [_pad128(c) for c in n_cnt]
    n_start = [0] + [int(v) for v in np.cumsum(n_pad)]      # length L+1
    Np = n_start[L]

    e_cnt = np.bincount(edge_order, minlength=L) if E else np.zeros(L, np.int64)
    e_pad = [0] + [_pad128(e_cnt[l]) for l in range(1, L)]
    e_start = [0] + [int(v) for v in np.cumsum(e_pad)]       # length L+1
    Ep = max(e_start[L], 128)

    new_node = np.zeros(N, np.int64)
    fill = list(n_start[:L])
    for old in np.argsort(node_order, kind='stable'):
        lvl = int(node_order[old])
        new_node[old] = fill[lvl]
        fill[lvl] += 1

    new_edge = np.zeros(E, np.int64)
    efill = list(e_start[:L])
    for e in np.argsort(edge_order, kind='stable'):
        lvl = int(edge_order[e])
        new_edge[e] = efill[lvl]
        efill[lvl] += 1

    x = np.zeros((Np, F), np.float32)
    x[new_node] = features
    C = np.zeros((Ep, Np), np.float32)     # edge -> child one-hot (gather h/c)
    P = np.zeros((Ep, Np), np.float32)     # edge -> parent one-hot (gather W_f x)
    Pt = np.zeros((Np, Ep), np.float32)    # parent <- edge one-hot (scatter-sum)
    if E:
        C[new_edge, new_node[adjacency_list[:, 1]]] = 1.0
        P[new_edge, new_node[adjacency_list[:, 0]]] = 1.0
        Pt[new_node[adjacency_list[:, 0]], new_edge] = 1.0

    bf = jnp.bfloat16
    wiouf = jnp.concatenate([jnp.asarray(params['w_iou']),
                             jnp.asarray(params['w_f'])], axis=1).astype(bf)
    biouf = jnp.concatenate([jnp.asarray(params['b_iou']),
                             jnp.asarray(params['b_f'])], axis=1).astype(jnp.float32)

    inputs = (jnp.asarray(x, bf), jnp.asarray(C, bf), jnp.asarray(P, bf),
              jnp.asarray(Pt, bf),
              jnp.asarray(params['w1'], bf), jnp.asarray(params['b1'], jnp.float32),
              jnp.asarray(params['w2'], bf), jnp.asarray(params['b2'], jnp.float32),
              wiouf, biouf,
              jnp.asarray(params['u_iou'], bf), jnp.asarray(params['u_f'], bf))

    kernel = _make_kernel(H, L, n_start, [int(v) for v in n_pad],
                          e_start, [int(v) for v in e_pad])

    # VMEM budget: resident inputs + output + in-kernel temporaries, per-chip cap.
    in_bytes = sum(int(np.prod(a.shape)) * a.dtype.itemsize for a in inputs)
    out_bytes = Np * 2 * H * 4
    tmp_bytes = Np * (F + 10 * H) * 4
    needed = in_bytes + out_bytes + tmp_bytes
    cap = 64 << 20
    try:
        cap = int(pltpu.get_tpu_info().vmem_capacity_bytes)
    except Exception:
        pass
    vmem_limit = int(max(min(needed + (8 << 20), (cap * 3) // 4), 16 << 20))

    hc = pl.pallas_call(
        kernel,
        out_shape=jax.ShapeDtypeStruct((Np, 2 * H), jnp.float32),
        compiler_params=pltpu.CompilerParams(vmem_limit_bytes=vmem_limit),
    )(*inputs)

    # glue: torch.stack([t[0, :] for t in torch.split(lstm_output, tree_sizes)])
    roots = new_node[np.cumsum([0] + list(tree_sizes[:-1]))]
    return jnp.take(hc[:, :H], jnp.asarray(roots, jnp.int32), axis=0)


# ----------------------------- numpy reference ------------------------------
def _sigmoid(x):
    return 1.0 / (1.0 + np.exp(-x))


def reference_forward(features, node_order, adjacency_list, edge_order, tree_sizes, p):
    """Mirror of the PyTorch module (child-sum TreeLSTM, eval-mode dropout)."""
    xc = np.maximum(features @ p['w1'] + p['b1'], 0.0)
    xc = np.maximum(xc @ p['w2'] + p['b2'], 0.0)
    N = features.shape[0]
    H = p['w2'].shape[1]
    h = np.zeros((N, H), np.float32)
    c = np.zeros((N, H), np.float32)
    for it in range(int(node_order.max()) + 1):
        node_mask = node_order == it
        edge_mask = edge_order == it
        x = xc[node_mask]
        if it == 0:
            iou = x @ p['w_iou'] + p['b_iou']
        else:
            adj = adjacency_list[edge_mask]
            parent_idx, child_idx = adj[:, 0], adj[:, 1]
            child_h = h[child_idx]
            child_c = c[child_idx]
            _, counts = np.unique(parent_idx, return_counts=True)
            sections = np.cumsum(counts)[:-1]
            h_sum = np.stack([s.sum(axis=0) for s in np.split(child_h, sections)])
            iou = x @ p['w_iou'] + p['b_iou'] + h_sum @ p['u_iou']
        i = _sigmoid(iou[:, :H])
        o = _sigmoid(iou[:, H:2 * H])
        u = np.tanh(iou[:, 2 * H:])
        if it == 0:
            c[node_mask] = i * u
        else:
            f = _sigmoid(xc[parent_idx] @ p['w_f'] + p['b_f'] + child_h @ p['u_f'])
            fc = f * child_c
            c_sum = np.stack([s.sum(axis=0) for s in np.split(fc, sections)])
            c[node_mask] = i * u + c_sum
        h[node_mask] = o * np.tanh(c[node_mask])
    offsets = np.cumsum([0] + list(tree_sizes[:-1]))
    return h[offsets]


if __name__ == "__main__":
    FP_SIZE, LSTM_SIZE = 256, 128

    # synthetic collated batch of 2 trees (route_distances collate_trees format)
    # tree 0: 5 nodes -> root 0, children {1, 2}; node 1 has children {3, 4}
    # tree 1: 3 nodes -> root 5, children {6, 7}
    node_order = np.array([2, 1, 0, 0, 0, 1, 0, 0], np.int32)
    adjacency_list = np.array([[0, 1], [0, 2], [1, 3], [1, 4], [5, 6], [5, 7]], np.int32)
    edge_order = np.array([2, 2, 1, 1, 1, 1], np.int32)
    tree_sizes = [5, 3]
    N = node_order.shape[0]

    key = jax.random.PRNGKey(0)
    kf, *ks = jax.random.split(key, 12)
    features = jax.random.normal(kf, (N, FP_SIZE), jnp.float32)

    def lin(k, fan_in, shape):
        return jax.random.normal(k, shape, jnp.float32) / np.sqrt(fan_in)

    params = {
        'w1': lin(ks[0], FP_SIZE, (FP_SIZE, LSTM_SIZE)),
        'b1': lin(ks[1], FP_SIZE, (1, LSTM_SIZE)),
        'w2': lin(ks[2], LSTM_SIZE, (LSTM_SIZE, LSTM_SIZE)),
        'b2': lin(ks[3], LSTM_SIZE, (1, LSTM_SIZE)),
        'w_iou': lin(ks[4], LSTM_SIZE, (LSTM_SIZE, 3 * LSTM_SIZE)),
        'b_iou': lin(ks[5], LSTM_SIZE, (1, 3 * LSTM_SIZE)),
        'u_iou': lin(ks[6], LSTM_SIZE, (LSTM_SIZE, 3 * LSTM_SIZE)),
        'w_f': lin(ks[7], LSTM_SIZE, (LSTM_SIZE, LSTM_SIZE)),
        'b_f': lin(ks[8], LSTM_SIZE, (1, LSTM_SIZE)),
        'u_f': lin(ks[9], LSTM_SIZE, (LSTM_SIZE, LSTM_SIZE)),
    }

    out = tree_lstm_with_pre_compression(
        features, node_order, adjacency_list, edge_order, tree_sizes, params)
    out = jax.block_until_ready(out)

    ref = reference_forward(np.asarray(features), node_order, adjacency_list,
                            edge_order, tree_sizes,
                            {k: np.asarray(v) for k, v in params.items()})

    assert out.shape == (len(tree_sizes), LSTM_SIZE)
    np.testing.assert_allclose(np.asarray(out), ref, atol=2e-2, rtol=2e-2)
    print("KERNEL_OK")
</pallas_src>

<mosaic_0001>
module attributes {stable_mosaic.version = 11 : i64} {
  func.func @kernel(%arg0: memref<384x256xbf16, #tpu.memory_space<vmem>>, %arg1: memref<256x384xbf16, #tpu.memory_space<vmem>>, %arg2: memref<256x384xbf16, #tpu.memory_space<vmem>>, %arg3: memref<384x256xbf16, #tpu.memory_space<vmem>>, %arg4: memref<256x128xbf16, #tpu.memory_space<vmem>>, %arg5: memref<1x128xf32, #tpu.memory_space<vmem>>, %arg6: memref<128x128xbf16, #tpu.memory_space<vmem>>, %arg7: memref<1x128xf32, #tpu.memory_space<vmem>>, %arg8: memref<128x512xbf16, #tpu.memory_space<vmem>>, %arg9: memref<1x512xf32, #tpu.memory_space<vmem>>, %arg10: memref<128x384xbf16, #tpu.memory_space<vmem>>, %arg11: memref<128x128xbf16, #tpu.memory_space<vmem>>, %arg12: memref<384x256xf32, #tpu.memory_space<vmem>>) attributes {dimension_semantics = [], scalar_prefetch = 0 : i64, scratch_operands = 0 : i64, tpu.core_type = #tpu.core_type<tc>} {
    %c0 = arith.constant 0 : index
    %c0_0 = arith.constant 0 : index
    %0 = vector.load %arg0[%c0, %c0_0] : memref<384x256xbf16, #tpu.memory_space<vmem>>, vector<384x256xbf16>
    %c0_1 = arith.constant 0 : index
    %c0_2 = arith.constant 0 : index
    %1 = vector.load %arg4[%c0_1, %c0_2] : memref<256x128xbf16, #tpu.memory_space<vmem>>, vector<256x128xbf16>
    %cst = arith.constant dense<0.000000e+00> : vector<384x128xf32>
    %2 = tpu.matmul %0, %1, %cst {dimension_numbers = #tpu.dot_dimension_numbers<[1], [0], [0], [1], [0, 0, 1, 1], [], []>} : vector<384x256xbf16>, vector<256x128xbf16>, vector<384x128xf32> -> vector<384x128xf32>
    %c0_3 = arith.constant 0 : index
    %c0_4 = arith.constant 0 : index
    %3 = vector.load %arg5[%c0_3, %c0_4] : memref<1x128xf32, #tpu.memory_space<vmem>>, vector<1x128xf32>
    %4 = vector.broadcast %3 : vector<1x128xf32> to vector<384x128xf32>
    %5 = arith.addf %2, %4 : vector<384x128xf32>
    %cst_5 = arith.constant 0.000000e+00 : f32
    %6 = vector.broadcast %cst_5 : f32 to vector<384x128xf32>
    %7 = arith.maximumf %5, %6 : vector<384x128xf32>
    %8 = arith.truncf %7 : vector<384x128xf32> to vector<384x128xbf16>
    %c0_6 = arith.constant 0 : index
    %c0_7 = arith.constant 0 : index
    %9 = vector.load %arg6[%c0_6, %c0_7] : memref<128x128xbf16, #tpu.memory_space<vmem>>, vector<128x128xbf16>
    %cst_8 = arith.constant dense<0.000000e+00> : vector<384x128xf32>
    %10 = tpu.matmul %8, %9, %cst_8 {dimension_numbers = #tpu.dot_dimension_numbers<[1], [0], [0], [1], [0, 0, 1, 1], [], []>} : vector<384x128xbf16>, vector<128x128xbf16>, vector<384x128xf32> -> vector<384x128xf32>
    %c0_9 = arith.constant 0 : index
    %c0_10 = arith.constant 0 : index
    %11 = vector.load %arg7[%c0_9, %c0_10] : memref<1x128xf32, #tpu.memory_space<vmem>>, vector<1x128xf32>
    %12 = vector.broadcast %11 : vector<1x128xf32> to vector<384x128xf32>
    %13 = arith.addf %10, %12 : vector<384x128xf32>
    %cst_11 = arith.constant 0.000000e+00 : f32
    %14 = vector.broadcast %cst_11 : f32 to vector<384x128xf32>
    %15 = arith.maximumf %13, %14 : vector<384x128xf32>
    %16 = arith.truncf %15 : vector<384x128xf32> to vector<384x128xbf16>
    %c0_12 = arith.constant 0 : index
    %c0_13 = arith.constant 0 : index
    %17 = vector.load %arg8[%c0_12, %c0_13] : memref<128x512xbf16, #tpu.memory_space<vmem>>, vector<128x512xbf16>
    %cst_14 = arith.constant dense<0.000000e+00> : vector<384x512xf32>
    %18 = tpu.matmul %16, %17, %cst_14 {dimension_numbers = #tpu.dot_dimension_numbers<[1], [0], [0], [1], [0, 0, 1, 1], [], []>} : vector<384x128xbf16>, vector<128x512xbf16>, vector<384x512xf32> -> vector<384x512xf32>
    %c0_15 = arith.constant 0 : index
    %c0_16 = arith.constant 0 : index
    %19 = vector.load %arg9[%c0_15, %c0_16] : memref<1x512xf32, #tpu.memory_space<vmem>>, vector<1x512xf32>
    %20 = vector.broadcast %19 : vector<1x512xf32> to vector<384x512xf32>
    %21 = arith.addf %18, %20 : vector<384x512xf32>
    %cst_17 = arith.constant 0.000000e+00 : f32
    %22 = vector.broadcast %cst_17 : f32 to vector<384x256xf32>
    %c0_18 = arith.constant 0 : index
    %c0_19 = arith.constant 0 : index
    %23 = vector.load %arg12[%c0_18, %c0_19] : memref<384x256xf32, #tpu.memory_space<vmem>>, vector<384x256xf32>
    tpu.vector_store %arg12[%c0_18, %c0_19], %22 {strides = array<i32>} : memref<384x256xf32, #tpu.memory_space<vmem>>, vector<384x256xf32>,
    %24 = vector.extract_strided_slice %21 {offsets = [0, 0], sizes = [128, 384], strides = [1, 1]} : vector<384x512xf32> to vector<128x384xf32>
    %25 = vector.extract_strided_slice %24 {offsets = [0, 0], sizes = [128, 128], strides = [1, 1]} : vector<128x384xf32> to vector<128x128xf32>
    %26 = arith.negf %25 : vector<128x128xf32>
    %27 = math.exp %26 : vector<128x128xf32>
    %cst_20 = arith.constant 1.000000e+00 : f32
    %28 = vector.broadcast %cst_20 : f32 to vector<128x128xf32>
    %29 = arith.addf %28, %27 : vector<128x128xf32>
    %30 = arith.divf %28, %29 : vector<128x128xf32>
    %31 = vector.extract_strided_slice %24 {offsets = [0, 128], sizes = [128, 128], strides = [1, 1]} : vector<128x384xf32> to vector<128x128xf32>
    %32 = arith.negf %31 : vector<128x128xf32>
    %33 = math.exp %32 : vector<128x128xf32>
    %cst_21 = arith.constant 1.000000e+00 : f32
    %34 = vector.broadcast %cst_21 : f32 to vector<128x128xf32>
    %35 = arith.addf %34, %33 : vector<128x128xf32>
    %36 = arith.divf %34, %35 : vector<128x128xf32>
    %37 = vector.extract_strided_slice %24 {offsets = [0, 256], sizes = [128, 128], strides = [1, 1]} : vector<128x384xf32> to vector<128x128xf32>
    %38 = math.tanh %37 : vector<128x128xf32>
    %39 = arith.mulf %30, %38 : vector<128x128xf32>
    %40 = math.tanh %39 : vector<128x128xf32>
    %41 = arith.mulf %36, %40 : vector<128x128xf32>
    %c0_22 = arith.constant 0 : index
    %c0_23 = arith.constant 0 : index
    %42 = vector.load %arg12[%c0_22, %c0_23] : memref<384x256xf32, #tpu.memory_space<vmem>>, vector<128x128xf32>
    tpu.vector_store %arg12[%c0_22, %c0_23], %41 {strides = array<i32>} : memref<384x256xf32, #tpu.memory_space<vmem>>, vector<128x128xf32>,
    %c0_24 = arith.constant 0 : index
    %c128 = arith.constant 128 : index
    %43 = vector.load %arg12[%c0_24, %c128] : memref<384x256xf32, #tpu.memory_space<vmem>>, vector<128x128xf32>
    tpu.vector_store %arg12[%c0_24, %c128], %39 {strides = array<i32>} : memref<384x256xf32, #tpu.memory_space<vmem>>, vector<128x128xf32>,
    %c0_25 = arith.constant 0 : index
    %c0_26 = arith.constant 0 : index
    %44 = vector.load %arg12[%c0_25, %c0_26] : memref<384x256xf32, #tpu.memory_space<vmem>>, vector<128x256xf32>
    %45 = arith.truncf %44 : vector<128x256xf32> to vector<128x256xbf16>
    %c0_27 = arith.constant 0 : index
    %c0_28 = arith.constant 0 : index
    %46 = vector.load %arg1[%c0_27, %c0_28] : memref<256x384xbf16, #tpu.memory_space<vmem>>, vector<128x128xbf16>
    %cst_29 = arith.constant dense<0.000000e+00> : vector<128x256xf32>
    %47 = tpu.matmul %46, %45, %cst_29 {dimension_numbers = #tpu.dot_dimension_numbers<[1], [0], [0], [1], [0, 0, 1, 1], [], []>} : vector<128x128xbf16>, vector<128x256xbf16>, vector<128x256xf32> -> vector<128x256xf32>
    %48 = vector.extract_strided_slice %47 {offsets = [0, 0], sizes = [128, 128], strides = [1, 1]} : vector<128x256xf32> to vector<128x128xf32>
    %49 = vector.extract_strided_slice %47 {offsets = [0, 128], sizes = [128, 128], strides = [1, 1]} : vector<128x256xf32> to vector<128x128xf32>
    %c0_30 = arith.constant 0 : index
    %c128_31 = arith.constant 128 : index
    %50 = vector.load %arg2[%c0_30, %c128_31] : memref<256x384xbf16, #tpu.memory_space<vmem>>, vector<128x128xbf16>
    %51 = vector.extract_strided_slice %21 {offsets = [128, 384], sizes = [128, 128], strides = [1, 1]} : vector<384x512xf32> to vector<128x128xf32>
    %52 = arith.truncf %51 : vector<128x128xf32> to vector<128x128xbf16>
    %cst_32 = arith.constant dense<0.000000e+00> : vector<128x128xf32>
    %53 = tpu.matmul %50, %52, %cst_32 {dimension_numbers = #tpu.dot_dimension_numbers<[1], [0], [0], [1], [0, 0, 1, 1], [], []>} : vector<128x128xbf16>, vector<128x128xbf16>, vector<128x128xf32> -> vector<128x128xf32>
    %54 = arith.truncf %48 : vector<128x128xf32> to vector<128x128xbf16>
    %c0_33 = arith.constant 0 : index
    %c0_34 = arith.constant 0 : index
    %55 = vector.load %arg11[%c0_33, %c0_34] : memref<128x128xbf16, #tpu.memory_space<vmem>>, vector<128x128xbf16>
    %cst_35 = arith.constant dense<0.000000e+00> : vector<128x128xf32>
    %56 = tpu.matmul %54, %55, %cst_35 {dimension_numbers = #tpu.dot_dimension_numbers<[1], [0], [0], [1], [0, 0, 1, 1], [], []>} : vector<128x128xbf16>, vector<128x128xbf16>, vector<128x128xf32> -> vector<128x128xf32>
    %57 = arith.addf %53, %56 : vector<128x128xf32>
    %58 = arith.negf %57 : vector<128x128xf32>
    %59 = math.exp %58 : vector<128x128xf32>
    %cst_36 = arith.constant 1.000000e+00 : f32
    %60 = vector.broadcast %cst_36 : f32 to vector<128x128xf32>
    %61 = arith.addf %60, %59 : vector<128x128xf32>
    %62 = arith.divf %60, %61 : vector<128x128xf32>
    %c128_37 = arith.constant 128 : index
    %c0_38 = arith.constant 0 : index
    %63 = vector.load %arg3[%c128_37, %c0_38] : memref<384x256xbf16, #tpu.memory_space<vmem>>, vector<128x128xbf16>
    %64 = arith.mulf %62, %49 : vector<128x128xf32>
    %65 = tpu.concatenate %48, %64 in 1 : vector<128x128xf32>, vector<128x128xf32> -> vector<128x256xf32>
    %66 = arith.truncf %65 : vector<128x256xf32> to vector<128x256xbf16>
    %cst_39 = arith.constant dense<0.000000e+00> : vector<128x256xf32>
    %67 = tpu.matmul %63, %66, %cst_39 {dimension_numbers = #tpu.dot_dimension_numbers<[1], [0], [0], [1], [0, 0, 1, 1], [], []>} : vector<128x128xbf16>, vector<128x256xbf16>, vector<128x256xf32> -> vector<128x256xf32>
    %68 = vector.extract_strided_slice %67 {offsets = [0, 0], sizes = [128, 128], strides = [1, 1]} : vector<128x256xf32> to vector<128x128xf32>
    %69 = vector.extract_strided_slice %67 {offsets = [0, 128], sizes = [128, 128], strides = [1, 1]} : vector<128x256xf32> to vector<128x128xf32>
    %70 = vector.extract_strided_slice %21 {offsets = [128, 0], sizes = [128, 384], strides = [1, 1]} : vector<384x512xf32> to vector<128x384xf32>
    %71 = arith.truncf %68 : vector<128x128xf32> to vector<128x128xbf16>
    %c0_40 = arith.constant 0 : index
    %c0_41 = arith.constant 0 : index
    %72 = vector.load %arg10[%c0_40, %c0_41] : memref<128x384xbf16, #tpu.memory_space<vmem>>, vector<128x384xbf16>
    %cst_42 = arith.constant dense<0.000000e+00> : vector<128x384xf32>
    %73 = tpu.matmul %71, %72, %cst_42 {dimension_numbers = #tpu.dot_dimension_numbers<[1], [0], [0], [1], [0, 0, 1, 1], [], []>} : vector<128x128xbf16>, vector<128x384xbf16>, vector<128x384xf32> -> vector<128x384xf32>
    %74 = arith.addf %70, %73 : vector<128x384xf32>
    %75 = vector.extract_strided_slice %74 {offsets = [0, 0], sizes = [128, 128], strides = [1, 1]} : vector<128x384xf32> to vector<128x128xf32>
    %76 = arith.negf %75 : vector<128x128xf32>
    %77 = math.exp %76 : vector<128x128xf32>
    %cst_43 = arith.constant 1.000000e+00 : f32
    %78 = vector.broadcast %cst_43 : f32 to vector<128x128xf32>
    %79 = arith.addf %78, %77 : vector<128x128xf32>
    %80 = arith.divf %78, %79 : vector<128x128xf32>
    %81 = vector.extract_strided_slice %74 {offsets = [0, 128], sizes = [128, 128], strides = [1, 1]} : vector<128x384xf32> to vector<128x128xf32>
    %82 = arith.negf %81 : vector<128x128xf32>
    %83 = math.exp %82 : vector<128x128xf32>
    %cst_44 = arith.constant 1.000000e+00 : f32
    %84 = vector.broadcast %cst_44 : f32 to vector<128x128xf32>
    %85 = arith.addf %84, %83 : vector<128x128xf32>
    %86 = arith.divf %84, %85 : vector<128x128xf32>
    %87 = vector.extract_strided_slice %74 {offsets = [0, 256], sizes = [128, 128], strides = [1, 1]} : vector<128x384xf32> to vector<128x128xf32>
    %88 = math.tanh %87 : vector<128x128xf32>
    %89 = arith.mulf %80, %88 : vector<128x128xf32>
    %90 = arith.addf %89, %69 : vector<128x128xf32>
    %91 = math.tanh %90 : vector<128x128xf32>
    %92 = arith.mulf %86, %91 : vector<128x128xf32>
    %c128_45 = arith.constant 128 : index
    %c0_46 = arith.constant 0 : index
    %93 = vector.load %arg12[%c128_45, %c0_46] : memref<384x256xf32, #tpu.memory_space<vmem>>, vector<128x128xf32>
    tpu.vector_store %arg12[%c128_45, %c0_46], %92 {strides = array<i32>} : memref<384x256xf32, #tpu.memory_space<vmem>>, vector<128x128xf32>,
    %c128_47 = arith.constant 128 : index
    %c128_48 = arith.constant 128 : index
    %94 = vector.load %arg12[%c128_47, %c128_48] : memref<384x256xf32, #tpu.memory_space<vmem>>, vector<128x128xf32>
    tpu.vector_store %arg12[%c128_47, %c128_48], %90 {strides = array<i32>} : memref<384x256xf32, #tpu.memory_space<vmem>>, vector<128x128xf32>,
    %c0_49 = arith.constant 0 : index
    %c0_50 = arith.constant 0 : index
    %95 = vector.load %arg12[%c0_49, %c0_50] : memref<384x256xf32, #tpu.memory_space<vmem>>, vector<256x256xf32>
    %96 = arith.truncf %95 : vector<256x256xf32> to vector<256x256xbf16>
    %c128_51 = arith.constant 128 : index
    %c0_52 = arith.constant 0 : index
    %97 = vector.load %arg1[%c128_51, %c0_52] : memref<256x384xbf16, #tpu.memory_space<vmem>>, vector<128x256xbf16>
    %cst_53 = arith.constant dense<0.000000e+00> : vector<128x256xf32>
    %98 = tpu.matmul %97, %96, %cst_53 {dimension_numbers = #tpu.dot_dimension_numbers<[1], [0], [0], [1], [0, 0, 1, 1], [], []>} : vector<128x256xbf16>, vector<256x256xbf16>, vector<128x256xf32> -> vector<128x256xf32>
    %99 = vector.extract_strided_slice %98 {offsets = [0, 0], sizes = [128, 128], strides = [1, 1]} : vector<128x256xf32> to vector<128x128xf32>
    %100 = vector.extract_strided_slice %98 {offsets = [0, 128], sizes = [128, 128], strides = [1, 1]} : vector<128x256xf32> to vector<128x128xf32>
    %c128_54 = arith.constant 128 : index
    %c256 = arith.constant 256 : index
    %101 = vector.load %arg2[%c128_54, %c256] : memref<256x384xbf16, #tpu.memory_space<vmem>>, vector<128x128xbf16>
    %102 = vector.extract_strided_slice %21 {offsets = [256, 384], sizes = [128, 128], strides = [1, 1]} : vector<384x512xf32> to vector<128x128xf32>
    %103 = arith.truncf %102 : vector<128x128xf32> to vector<128x128xbf16>
    %cst_55 = arith.constant dense<0.000000e+00> : vector<128x128xf32>
    %104 = tpu.matmul %101, %103, %cst_55 {dimension_numbers = #tpu.dot_dimension_numbers<[1], [0], [0], [1], [0, 0, 1, 1], [], []>} : vector<128x128xbf16>, vector<128x128xbf16>, vector<128x128xf32> -> vector<128x128xf32>
    %105 = arith.truncf %99 : vector<128x128xf32> to vector<128x128xbf16>
    %c0_56 = arith.constant 0 : index
    %c0_57 = arith.constant 0 : index
    %106 = vector.load %arg11[%c0_56, %c0_57] : memref<128x128xbf16, #tpu.memory_space<vmem>>, vector<128x128xbf16>
    %cst_58 = arith.constant dense<0.000000e+00> : vector<128x128xf32>
    %107 = tpu.matmul %105, %106, %cst_58 {dimension_numbers = #tpu.dot_dimension_numbers<[1], [0], [0], [1], [0, 0, 1, 1], [], []>} : vector<128x128xbf16>, vector<128x128xbf16>, vector<128x128xf32> -> vector<128x128xf32>
    %108 = arith.addf %104, %107 : vector<128x128xf32>
    %109 = arith.negf %108 : vector<128x128xf32>
    %110 = math.exp %109 : vector<128x128xf32>
    %cst_59 = arith.constant 1.000000e+00 : f32
    %111 = vector.broadcast %cst_59 : f32 to vector<128x128xf32>
    %112 = arith.addf %111, %110 : vector<128x128xf32>
    %113 = arith.divf %111, %112 : vector<128x128xf32>
    %c256_60 = arith.constant 256 : index
    %c128_61 = arith.constant 128 : index
    %114 = vector.load %arg3[%c256_60, %c128_61] : memref<384x256xbf16, #tpu.memory_space<vmem>>, vector<128x128xbf16>
    %115 = arith.mulf %113, %100 : vector<128x128xf32>
    %116 = tpu.concatenate %99, %115 in 1 : vector<128x128xf32>, vector<128x128xf32> -> vector<128x256xf32>
    %117 = arith.truncf %116 : vector<128x256xf32> to vector<128x256xbf16>
    %cst_62 = arith.constant dense<0.000000e+00> : vector<128x256xf32>
    %118 = tpu.matmul %114, %117, %cst_62 {dimension_numbers = #tpu.dot_dimension_numbers<[1], [0], [0], [1], [0, 0, 1, 1], [], []>} : vector<128x128xbf16>, vector<128x256xbf16>, vector<128x256xf32> -> vector<128x256xf32>
    %119 = vector.extract_strided_slice %118 {offsets = [0, 0], sizes = [128, 128], strides = [1, 1]} : vector<128x256xf32> to vector<128x128xf32>
    %120 = vector.extract_strided_slice %118 {offsets = [0, 128], sizes = [128, 128], strides = [1, 1]} : vector<128x256xf32> to vector<128x128xf32>
    %121 = vector.extract_strided_slice %21 {offsets = [256, 0], sizes = [128, 384], strides = [1, 1]} : vector<384x512xf32> to vector<128x384xf32>
    %122 = arith.truncf %119 : vector<128x128xf32> to vector<128x128xbf16>
    %c0_63 = arith.constant 0 : index
    %c0_64 = arith.constant 0 : index
    %123 = vector.load %arg10[%c0_63, %c0_64] : memref<128x384xbf16, #tpu.memory_space<vmem>>, vector<128x384xbf16>
    %cst_65 = arith.constant dense<0.000000e+00> : vector<128x384xf32>
    %124 = tpu.matmul %122, %123, %cst_65 {dimension_numbers = #tpu.dot_dimension_numbers<[1], [0], [0], [1], [0, 0, 1, 1], [], []>} : vector<128x128xbf16>, vector<128x384xbf16>, vector<128x384xf32> -> vector<128x384xf32>
    %125 = arith.addf %121, %124 : vector<128x384xf32>
    %126 = vector.extract_strided_slice %125 {offsets = [0, 0], sizes = [128, 128], strides = [1, 1]} : vector<128x384xf32> to vector<128x128xf32>
    %127 = arith.negf %126 : vector<128x128xf32>
    %128 = math.exp %127 : vector<128x128xf32>
    %cst_66 = arith.constant 1.000000e+00 : f32
    %129 = vector.broadcast %cst_66 : f32 to vector<128x128xf32>
    %130 = arith.addf %129, %128 : vector<128x128xf32>
    %131 = arith.divf %129, %130 : vector<128x128xf32>
    %132 = vector.extract_strided_slice %125 {offsets = [0, 128], sizes = [128, 128], strides = [1, 1]} : vector<128x384xf32> to vector<128x128xf32>
    %133 = arith.negf %132 : vector<128x128xf32>
    %134 = math.exp %133 : vector<128x128xf32>
    %cst_67 = arith.constant 1.000000e+00 : f32
    %135 = vector.broadcast %cst_67 : f32 to vector<128x128xf32>
    %136 = arith.addf %135, %134 : vector<128x128xf32>
    %137 = arith.divf %135, %136 : vector<128x128xf32>
    %138 = vector.extract_strided_slice %125 {offsets = [0, 256], sizes = [128, 128], strides = [1, 1]} : vector<128x384xf32> to vector<128x128xf32>
    %139 = math.tanh %138 : vector<128x128xf32>
    %140 = arith.mulf %131, %139 : vector<128x128xf32>
    %141 = arith.addf %140, %120 : vector<128x128xf32>
    %142 = math.tanh %141 : vector<128x128xf32>
    %143 = arith.mulf %137, %142 : vector<128x128xf32>
    %c256_68 = arith.constant 256 : index
    %c0_69 = arith.constant 0 : index
    %144 = vector.load %arg12[%c256_68, %c0_69] : memref<384x256xf32, #tpu.memory_space<vmem>>, vector<128x128xf32>
    tpu.vector_store %arg12[%c256_68, %c0_69], %143 {strides = array<i32>} : memref<384x256xf32, #tpu.memory_space<vmem>>, vector<128x128xf32>,
    %c256_70 = arith.constant 256 : index
    %c128_71 = arith.constant 128 : index
    %145 = vector.load %arg12[%c256_70, %c128_71] : memref<384x256xf32, #tpu.memory_space<vmem>>, vector<128x128xf32>
    tpu.vector_store %arg12[%c256_70, %c128_71], %141 {strides = array<i32>} : memref<384x256xf32, #tpu.memory_space<vmem>>, vector<128x128xf32>,
    return
  }
}

</mosaic_0001>

<bundles_post_ra>
// kernel: tpu_custom_call.1
= control target key start
LH: loop header
LB: loop body
LE: loop exit
PB: predicated region body
PF: predicated region fallthrough
CT: control target
= control target key end

     0   :  { %17 = vsyncpa [#allocation3], 0  ;;  %s9145_s0 = inlined_call_operand.hbm [shape: bf16[384,256], index: 0, kind: input, shape index: {}]   ;;  %s9146_s1 = inlined_call_operand.hbm [shape: bf16[256,384], index: 1, kind: input, shape index: {}]   ;;  %s9147_s2 = inlined_call_operand.hbm [shape: bf16[256,384], index: 2, kind: input, shape index: {}]   ;;  %s9148_s3 = inlined_call_operand.hbm [shape: bf16[384,256], index: 3, kind: input, shape index: {}]   ;;  %s9149_s4 = inlined_call_operand.hbm [shape: bf16[256,128], index: 4, kind: input, shape index: {}]   ;;  %s9150_s5 = inlined_call_operand.vmem [shape: f32[1,128], index: 5, kind: input, shape index: {}]   ;;  %s9151_s6 = inlined_call_operand.hbm [shape: bf16[128,128], index: 6, kind: input, shape index: {}]   ;;  %s9152_s7 = inlined_call_operand.vmem [shape: f32[1,128], index: 7, kind: input, shape index: {}]   ;;  %s9153_s8 = inlined_call_operand.hbm [shape: bf16[128,512], index: 8, kind: input, shape index: {}]   ;;  %s9154_s9 = inlined_call_operand.vmem [shape: f32[1,512], index: 9, kind: input, shape index: {}]   ;;  %s9155_s10 = inlined_call_operand.hbm [shape: bf16[128,384], index: 10, kind: input, shape index: {}]   ;;  %s9156_s11 = inlined_call_operand.hbm [shape: bf16[128,128], index: 11, kind: input, shape index: {}]   ;;  %s9157_s12 = inlined_call_operand.hbm [shape: f32[384,256], index: 12, kind: output, shape index: {}]  }
   0x1   :  { %18 = vsyncpa [#allocation6], 0 }
   0x2   :  { %19 = vsyncpa [#allocation9], 0 }
   0x3   :  { %20 = vsyncpa [#allocation12], 0 }
   0x4   :  { %21 = vsyncpa [#allocation15], 0 }
   0x5   :  { %22 = vsyncpa [#allocation4], 0  ;;  %s7820_s21 = smov [#allocation5]   ;;  %s7588_s25 = scalar_lea.hbm %s9146_s1, 6144 }
   0x6   :  { %s40_s22 = sshll.u32 %s7820_s21, 4  ;;  %p7589_p0 = scmp.ne.s32.totalorder %s9146_s1, %s7588_s25  ;;  %s41_s22 = int_to_ptr.vmem [resolvable:$true] %s40_s22 }
   0x7   :  { %p7592_p1 = scmp.lt.u32.totalorder %s7588_s25, %s9146_s1 }
   0x9   :  { %p7594_p2 = pnand %p7592_p1, %p7589_p0 }
   0xb   :  { %7597 = shalt.err (!%p7594_p2)
}
   0xc   :  { %s7598_s30 = scalar_lea.vmem %s41_s22, 6144  ;;  %p7603_p4 = scmp.lt.s32.totalorder %s41_s22, %s41_s22 }
   0xd   :  { %p7599_p3 = scmp.ne.s32.totalorder %s41_s22, %s7598_s30  ;;  %p7604_p5 = scmp.lt.s32.totalorder %s7598_s30, %s7598_s30 }
   0xf   :  { %p7605_p6 = por %p7604_p5, %p7603_p4 }
  0x11   :  { %p7606_p7 = pnand %p7605_p6, %p7599_p3 }
  0x13   :  { %7609 = shalt.err (!%p7606_p7)
}
  0x14   :  { %s7821_s13 = smov 192   ;;  %s7822_s14 = smov 12  }
  0x15   :  { %46 = dma.hbm_to_vmem [thread:$0]  %s9146_s1, 6144, %s41_s22, [#allocation6], %s7821_s13, %s7821_s13, %s7822_s14  }
  0x16   :  { %s7823_s17 = smov [#allocation8]   ;;  %s7610_s21 = scalar_lea.hbm %s9148_s3, 6144 }
  0x17   :  { %s64_s18 = sshll.u32 %s7823_s17, 4  ;;  %p7611_p8 = scmp.ne.s32.totalorder %s9148_s3, %s7610_s21  ;;  %s65_s18 = int_to_ptr.vmem [resolvable:$true] %s64_s18 }
  0x18   :  { %p7614_p9 = scmp.lt.u32.totalorder %s7610_s21, %s9148_s3 }
  0x1a   :  { %p7616_p10 = pnand %p7614_p9, %p7611_p8 }
  0x1c   :  { %7619 = shalt.err (!%p7616_p10)
}
  0x1d   :  { %s7620_s27 = scalar_lea.vmem %s65_s18, 6144  ;;  %p7625_p12 = scmp.lt.s32.totalorder %s65_s18, %s65_s18 }
  0x1e   :  { %p7621_p11 = scmp.ne.s32.totalorder %s65_s18, %s7620_s27  ;;  %p7626_p13 = scmp.lt.s32.totalorder %s7620_s27, %s7620_s27 }
  0x20   :  { %p7627_p0 = por %p7626_p13, %p7625_p12 }
  0x22   :  { %p7628_p1 = pnand %p7627_p0, %p7621_p11 }
  0x24   :  { %7631 = shalt.err (!%p7628_p1)
}
  0x25   :  { %s7824_s1 = smov 128   ;;  %s7825_s22 = smov 8  }
  0x26   :  { %70 = dma.hbm_to_vmem [thread:$0]  %s9148_s3, 6144, %s65_s18, [#allocation9], %s7824_s1, %s7824_s1, %s7825_s22  }
  0x27   :  { %s7826_s30 = smov [#allocation11]   ;;  %s7827_s16 = smov [#allocation14]  }
  0x28   :  { %s90_s15 = sshll.u32 %s7826_s30, 4  ;;  %s118_s17 = sshll.u32 %s7827_s16, 4  ;;  %s91_s15 = int_to_ptr.vmem [resolvable:$true] %s90_s15  ;;  %s7934_s17 = int_to_ptr.vmem [resolvable:$true] %s118_s17 }
  0x29   :  { %s7632_s21 = scalar_lea.hbm %s9151_s6, 1024 }
  0x2a   :  { %p7633_p2 = scmp.ne.s32.totalorder %s9151_s6, %s7632_s21  ;;  %p7636_p3 = scmp.lt.u32.totalorder %s7632_s21, %s9151_s6 }
  0x2c   :  { %p7638_p4 = pnand %p7636_p3, %p7633_p2 }
  0x2e   :  { %7641 = shalt.err (!%p7638_p4)
}
  0x2f   :  { %s7642_s3 = scalar_lea.vmem %s91_s15, 1024  ;;  %p7647_p6 = scmp.lt.s32.totalorder %s91_s15, %s91_s15 }
  0x30   :  { %p7643_p5 = scmp.ne.s32.totalorder %s91_s15, %s7642_s3  ;;  %p7648_p7 = scmp.lt.s32.totalorder %s7642_s3, %s7642_s3 }
  0x32   :  { %p7649_p8 = por %p7648_p7, %p7647_p6 }
  0x34   :  { %p7650_p9 = pnand %p7649_p8, %p7643_p5 }
  0x36   :  { %7653 = shalt.err (!%p7650_p9)
}
  0x37   :  { %s7828_s18 = smov 64   ;;  %s7829_s27 = smov 4  }
  0x38   :  { %96 = dma.hbm_to_vmem [thread:$0]  %s9151_s6, 1024, %s91_s15, [#allocation12], %s7828_s18, %s7828_s18, %s7829_s27  }
  0x39   :  { %s7654_s19 = scalar_lea.hbm %s9155_s10, 3072 }
  0x3a   :  { %p7655_p10 = scmp.ne.s32.totalorder %s9155_s10, %s7654_s19  ;;  %p7658_p11 = scmp.lt.u32.totalorder %s7654_s19, %s9155_s10 }
  0x3c   :  { %p7660_p12 = pnand %p7658_p11, %p7655_p10 }
  0x3e   :  { %7663 = shalt.err (!%p7660_p12)
}
  0x3f   :  { %s7664_s25 = scalar_lea.vmem %s7934_s17, 3072  ;;  %p7669_p0 = scmp.lt.s32.totalorder %s7934_s17, %s7934_s17 }
  0x40   :  { %p7665_p13 = scmp.ne.s32.totalorder %s7934_s17, %s7664_s25  ;;  %p7670_p1 = scmp.lt.s32.totalorder %s7664_s25, %s7664_s25 }
  0x42   :  { %p7671_p2 = por %p7670_p1, %p7669_p0 }
  0x44   :  { %p7672_p3 = pnand %p7671_p2, %p7665_p13 }
  0x46   :  { %7675 = shalt.err (!%p7672_p3)
}
  0x47   :  { %124 = dma.hbm_to_vmem [thread:$0]  %s9155_s10, 3072, %s7934_s17, [#allocation15], %s7821_s13, %s7821_s13, %s7822_s14  }
  0x48   :  { %s7830_s26 = smov [#allocation2]   ;;  %s7831_s28 = smov [#allocation7]  }
  0x49   :  { %s28_s3 = sshll.u32 %s7830_s26, 4  ;;  %s52_s29 = sshll.u32 %s7831_s28, 4  ;;  %s29_s3 = int_to_ptr.vmem [resolvable:$true] %s28_s3  ;;  %s7971_s29 = int_to_ptr.vmem [resolvable:$true] %s52_s29 }
  0x4a   :  { %s7676_s19 = scalar_lea.hbm %s9145_s0, 6144 }
  0x4b   :  { %p7677_p4 = scmp.ne.s32.totalorder %s9145_s0, %s7676_s19  ;;  %p7680_p5 = scmp.lt.u32.totalorder %s7676_s19, %s9145_s0 }
  0x4d   :  { %p7682_p6 = pnand %p7680_p5, %p7677_p4 }
  0x4f   :  { %7685 = shalt.err (!%p7682_p6)
}
  0x50   :  { %s7686_s10 = scalar_lea.vmem %s29_s3, 6144  ;;  %p7691_p8 = scmp.lt.s32.totalorder %s29_s3, %s29_s3 }
  0x51   :  { %p7687_p7 = scmp.ne.s32.totalorder %s29_s3, %s7686_s10  ;;  %p7692_p9 = scmp.lt.s32.totalorder %s7686_s10, %s7686_s10 }
  0x53   :  { %p7693_p10 = por %p7692_p9, %p7691_p8 }
  0x55   :  { %p7694_p11 = pnand %p7693_p10, %p7687_p7 }
  0x57   :  { %7697 = shalt.err (!%p7694_p11)
}
  0x58   :  { %34 = dma.hbm_to_vmem [thread:$0]  %s9145_s0, 6144, %s29_s3, [#allocation3], %s7824_s1, %s7824_s1, %s7825_s22  }
  0x59   :  { %s7698_s26 = scalar_lea.hbm %s9147_s2, 6144 }
  0x5a   :  { %p7699_p12 = scmp.ne.s32.totalorder %s9147_s2, %s7698_s26  ;;  %p7702_p13 = scmp.lt.u32.totalorder %s7698_s26, %s9147_s2 }
  0x5c   :  { %p7704_p0 = pnand %p7702_p13, %p7699_p12 }
  0x5e   :  { %7707 = shalt.err (!%p7704_p0)
}
  0x5f   :  { %s7708_s20 = scalar_lea.vmem %s7971_s29, 6144  ;;  %p7713_p2 = scmp.lt.s32.totalorder %s7971_s29, %s7971_s29 }
  0x60   :  { %p7709_p1 = scmp.ne.s32.totalorder %s7971_s29, %s7708_s20  ;;  %p7714_p3 = scmp.lt.s32.totalorder %s7708_s20, %s7708_s20 }
  0x62   :  { %p7715_p4 = por %p7714_p3, %p7713_p2 }
  0x64   :  { %p7716_p5 = pnand %p7715_p4, %p7709_p1 }
  0x66   :  { %7719 = shalt.err (!%p7716_p5)
}
  0x67   :  { %58 = dma.hbm_to_vmem [thread:$0]  %s9147_s2, 6144, %s7971_s29, [#allocation6], %s7821_s13, %s7821_s13, %s7822_s14  }
  0x68   :  { %s7832_s22 = smov [#allocation10]   ;;  %s7833_s21 = smov [#allocation13]  }
  0x69   :  { %s76_s3 = sshll.u32 %s7832_s22, 4  ;;  %s104_s23 = sshll.u32 %s7833_s21, 4  ;;  %s77_s3 = int_to_ptr.vmem [resolvable:$true] %s76_s3  ;;  %s8008_s23 = int_to_ptr.vmem [resolvable:$true] %s104_s23 }
  0x6a   :  { %s7720_s17 = scalar_lea.hbm %s9149_s4, 2048 }
  0x6b   :  { %p7721_p6 = scmp.ne.s32.totalorder %s9149_s4, %s7720_s17  ;;  %p7724_p7 = scmp.lt.u32.totalorder %s7720_s17, %s9149_s4 }
  0x6d   :  { %p7726_p8 = pnand %p7724_p7, %p7721_p6 }
  0x6f   :  { %7729 = shalt.err (!%p7726_p8)
}
  0x70   :  { %s7730_s2 = scalar_lea.vmem %s77_s3, 2048  ;;  %p7735_p10 = scmp.lt.s32.totalorder %s77_s3, %s77_s3 }
  0x71   :  { %p7731_p9 = scmp.ne.s32.totalorder %s77_s3, %s7730_s2  ;;  %p7736_p11 = scmp.lt.s32.totalorder %s7730_s2, %s7730_s2 }
  0x73   :  { %p7737_p12 = por %p7736_p11, %p7735_p10 }
  0x75   :  { %p7738_p13 = pnand %p7737_p12, %p7731_p9 }
  0x77   :  { %7741 = shalt.err (!%p7738_p13)
}
  0x78   :  { %82 = dma.hbm_to_vmem [thread:$0]  %s9149_s4, 2048, %s77_s3, [#allocation9], %s7828_s18, %s7828_s18, %s7829_s27  }
  0x79   :  { %s7742_s30 = scalar_lea.hbm %s9153_s8, 4096 }
  0x7a   :  { %p7743_p0 = scmp.ne.s32.totalorder %s9153_s8, %s7742_s30  ;;  %p7746_p1 = scmp.lt.u32.totalorder %s7742_s30, %s9153_s8 }
  0x7c   :  { %p7748_p2 = pnand %p7746_p1, %p7743_p0 }
  0x7e   :  { %7751 = shalt.err (!%p7748_p2)
}
  0x7f   :  { %s7752_s1 = scalar_lea.vmem %s8008_s23, 4096  ;;  %p7757_p4 = scmp.lt.s32.totalorder %s8008_s23, %s8008_s23 }
  0x80   :  { %p7753_p3 = scmp.ne.s32.totalorder %s8008_s23, %s7752_s1  ;;  %p7758_p5 = scmp.lt.s32.totalorder %s7752_s1, %s7752_s1 }
  0x82   :  { %p7759_p6 = por %p7758_p5, %p7757_p4 }
  0x84   :  { %p7760_p7 = pnand %p7759_p6, %p7753_p3 }
  0x86   :  { %7763 = shalt.err (!%p7760_p7)
}
  0x87   :  { %s7834_s4 = smov 256   ;;  %s7835_s22 = smov 16  }
  0x88   :  { %110 = dma.hbm_to_vmem [thread:$0]  %s9153_s8, 4096, %s8008_s23, [#allocation12], %s7834_s4, %s7834_s4, %s7835_s22  }
  0x89   :  { %s7836_s24 = smov [#allocation16]   ;;  %s7764_s6 = scalar_lea.hbm %s9156_s11, 1024 }
  0x8a   :  { %s130_s10 = sshll.u32 %s7836_s24, 4  ;;  %p7765_p8 = scmp.ne.s32.totalorder %s9156_s11, %s7764_s6  ;;  %s131_s10 = int_to_ptr.vmem [resolvable:$true] %s130_s10 }
  0x8b   :  { %p7768_p9 = scmp.lt.u32.totalorder %s7764_s6, %s9156_s11 }
  0x8d   :  { %p7770_p10 = pnand %p7768_p9, %p7765_p8 }
  0x8f   :  { %7773 = shalt.err (!%p7770_p10)
}
  0x90   :  { %s7774_s14 = scalar_lea.vmem %s131_s10, 1024  ;;  %p7779_p12 = scmp.lt.s32.totalorder %s131_s10, %s131_s10 }
  0x91   :  { %p7775_p11 = scmp.ne.s32.totalorder %s131_s10, %s7774_s14  ;;  %p7780_p13 = scmp.lt.s32.totalorder %s7774_s14, %s7774_s14 }
  0x93   :  { %p7781_p0 = por %p7780_p13, %p7779_p12 }
  0x95   :  { %p7782_p1 = pnand %p7781_p0, %p7775_p11 }
  0x97   :  { %7785 = shalt.err (!%p7782_p1)
}
  0x98   :  { %136 = dma.hbm_to_vmem [thread:$0]  %s9156_s11, 1024, %s131_s10, [#allocation15], %s7828_s18, %s7828_s18, %s7829_s27  }
  0x99   :  { %7808 = dma.done.wait [#allocation3], 6144  }
  0x9a   :  { %7809 = vsyncadd [#allocation3], 4294961152 }
  0x9b   :  { %7810 = dma.done.wait [#allocation6], 12288  }
  0x9c   :  { %7811 = vsyncadd [#allocation6], 4294955008 }
  0x9d   :  { %7812 = dma.done.wait [#allocation9], 8192  }
  0x9e   :  { %7813 = vsyncadd [#allocation9], 4294959104 }
  0x9f   :  { %7814 = dma.done.wait [#allocation12], 5120  }
  0xa0   :  { %7815 = vsyncadd [#allocation12], 4294962176 }
  0xa1   :  { %7816 = dma.done.wait [#allocation15], 4096  }
  0xa2   :  { %7817 = vsyncadd [#allocation15], 4294963200  ;;  %v9158_v0 = vmov 0   ;;  %v6596_v1 = vld [vmem:[#allocation10] sm:$0xff]   ;;  %v6597_v2 = vld [vmem:[#allocation10 + $0x8] sm:$0xff]  }
  0xa3   :  { %588 = vmatprep.subr.bf16.mxu0 %v9158_v0  ;;  %v6598_v3 = vld [vmem:[#allocation10 + $0x10] sm:$0xff]   ;;  %v6599_v4 = vld [vmem:[#allocation10 + $0x18] sm:$0xff]   ;;  %v6600_v5 = vld [vmem:[#allocation10 + $0x20] sm:$0xff]  }
  0xa4   :  { %589 = vmatpush1.bf16.msra.mxu0 %v6596_v1  ;;  %v6614_v6 = vld [vmem:[#allocation2 + $0x4] ss:$8 sps:$4 sm:$0xff]   ;;  %v6602_v8 = vld [vmem:[#allocation10 + $0x30] sm:$0xff]   ;;  %v6603_v9 = vld [vmem:[#allocation10 + $0x38] sm:$0xff]  }
  0xa5   :  { %590 = vmatprep.subr.bf16.mxu0 %v9158_v0  ;;  %v6601_v7 = vld [vmem:[#allocation10 + $0x28] sm:$0xff]   ;;  %620 = vmatprep.mubr.bf16.mxu0 %v6614_v6  ;;  %v6604_v10 = vld [vmem:[#allocation10 + $0x40] sm:$0xff]   ;;  %v6606_v12 = vld [vmem:[#allocation10 + $0x50] sm:$0xff]  }
  0xa6   :  { %v6605_v11 = vld [vmem:[#allocation10 + $0x48] sm:$0xff]   ;;  %v6607_v13 = vld [vmem:[#allocation10 + $0x58] sm:$0xff]   ;;  %v6608_v14 = vld [vmem:[#allocation10 + $0x60] sm:$0xff]  }
  0xa7   :  { %v6609_v15 = vld [vmem:[#allocation10 + $0x68] sm:$0xff]   ;;  %v6610_v16 = vld [vmem:[#allocation10 + $0x70] sm:$0xff]   ;;  %v6611_v17 = vld [vmem:[#allocation10 + $0x78] sm:$0xff]  }
  0xa8   :  { %591 = vmatpush1.bf16.msra.mxu0 %v6597_v2  ;;  %v6612_v18 = vld [vmem:[#allocation2] ss:$8 sps:$4 sm:$0xff]   ;;  %v6615_v19 = vld [vmem:[#allocation2 + $0x14] ss:$8 sps:$4 sm:$0xff]   ;;  %v6617_v20 = vld [vmem:[#allocation2 + $0x10] ss:$8 sps:$4 sm:$0xff]  }
  0xa9   :  { %592 = vmatprep.subr.bf16.mxu0 %v9158_v0  ;;  %v6618_v21 = vld [vmem:[#allocation2 + $0x24] ss:$8 sps:$4 sm:$0xff]   ;;  %v6620_v22 = vld [vmem:[#allocation2 + $0x20] ss:$8 sps:$4 sm:$0xff]   ;;  %v6621_v23 = vld [vmem:[#allocation2 + $0x34] ss:$8 sps:$4 sm:$0xff]  }
  0xaa   :  { %v6623_v24 = vld [vmem:[#allocation2 + $0x30] ss:$8 sps:$4 sm:$0xff]   ;;  %v6624_v25 = vld [vmem:[#allocation2 + $0x44] ss:$8 sps:$4 sm:$0xff]   ;;  %v6626_v26 = vld [vmem:[#allocation2 + $0x40] ss:$8 sps:$4 sm:$0xff]  }
  0xab   :  { %v6627_v27 = vld [vmem:[#allocation2 + $0x54] ss:$8 sps:$4 sm:$0xff]   ;;  %v6629_v28 = vld [vmem:[#allocation2 + $0x50] ss:$8 sps:$4 sm:$0xff]   ;;  %v6630_v29 = vld [vmem:[#allocation2 + $0x64] ss:$8 sps:$4 sm:$0xff]  }
  0xac   :  { %593 = vmatpush1.bf16.msra.mxu0 %v6598_v3  ;;  %v6632_v30 = vld [vmem:[#allocation2 + $0x60] ss:$8 sps:$4 sm:$0xff]   ;;  %v6633_v31 = vld [vmem:[#allocation2 + $0x74] ss:$8 sps:$4 sm:$0xff]   ;;  %v6635_v34 = vld [vmem:[#allocation2 + $0x70] ss:$8 sps:$4 sm:$0xff]  }
  0xad   :  { %594 = vmatprep.subr.bf16.mxu0 %v9158_v0  ;;  %v6681_v32 = vld [vmem:[#allocation11] sm:$0xff]   ;;  %v6682_v33 = vld [vmem:[#allocation11 + $0x8] sm:$0xff]   ;;  %v6686_v36 = vld [vmem:[#allocation11 + $0x10] sm:$0xff]  }
  0xae   :  { %6400 = vmatprep.subr.bf16.mxu1 %v6681_v32  ;;  %v6636_v35 = vld [vmem:[#allocation2 + $0x84] ss:$8 sps:$4 sm:$0xff]   ;;  %v6687_v37 = vld [vmem:[#allocation11 + $0x18] sm:$0xff]   ;;  %v6638_v38 = vld [vmem:[#allocation2 + $0x80] ss:$8 sps:$4 sm:$0xff]  }
  0xaf   :  { %6408 = vmatpush3.bf16.msra.mxu1 %v6681_v32  ;;  %v6639_v39 = vld [vmem:[#allocation2 + $0x94] ss:$8 sps:$4 sm:$0xff]   ;;  %v6641_v40 = vld [vmem:[#allocation2 + $0x90] ss:$8 sps:$4 sm:$0xff]   ;;  %v6642_v41 = vld [vmem:[#allocation2 + $0xa4] ss:$8 sps:$4 sm:$0xff]  }
  0xb0   :  { %595 = vmatpush1.bf16.msra.mxu0 %v6599_v4  ;;  %6401 = vmatprep.subr.bf16.mxu1 %v6682_v33  ;;  %v6644_v42 = vld [vmem:[#allocation2 + $0xa0] ss:$8 sps:$4 sm:$0xff]   ;;  %v6645_v43 = vld [vmem:[#allocation2 + $0xb4] ss:$8 sps:$4 sm:$0xff]   ;;  %v6647_v45 = vld [vmem:[#allocation2 + $0xb0] ss:$8 sps:$4 sm:$0xff]  }
  0xb1   :  { %596 = vmatprep.subr.bf16.mxu0 %v9158_v0  ;;  %v6688_v44 = vld [vmem:[#allocation11 + $0x20] sm:$0xff]   ;;  %v6689_v47 = vld [vmem:[#allocation11 + $0x28] sm:$0xff]   ;;  %v6690_v48 = vld [vmem:[#allocation11 + $0x30] sm:$0xff]  }
  0xb2   :  { %v6648_v46 = vld [vmem:[#allocation2 + $0xc4] ss:$8 sps:$4 sm:$0xff]   ;;  %v6650_v49 = vld [vmem:[#allocation2 + $0xc0] ss:$8 sps:$4 sm:$0xff]   ;;  %v6651_v50 = vld [vmem:[#allocation2 + $0xd4] ss:$8 sps:$4 sm:$0xff]  }
  0xb3   :  { %6409 = vmatpush3.bf16.msra.mxu1 %v6682_v33  ;;  %v6691_v51 = vld [vmem:[#allocation11 + $0x38] sm:$0xff]   ;;  %v6654_v53 = vld [vmem:[#allocation2 + $0xe4] ss:$8 sps:$4 sm:$0xff]   ;;  %v6656_v54 = vld [vmem:[#allocation2 + $0xe0] ss:$8 sps:$4 sm:$0xff]  }
  0xb4   :  { %597 = vmatpush1.bf16.msra.mxu0 %v6600_v5  ;;  %6402 = vmatprep.subr.bf16.mxu1 %v6686_v36  ;;  %v6653_v52 = vld [vmem:[#allocation2 + $0xd0] ss:$8 sps:$4 sm:$0xff]   ;;  %v6657_v55 = vld [vmem:[#allocation2 + $0xf4] ss:$8 sps:$4 sm:$0xff]   ;;  %v6660_v57 = vld [vmem:[#allocation2 + $0x104] ss:$8 sps:$4 sm:$0xff]  }
  0xb5   :  { %598 = vmatprep.subr.bf16.mxu0 %v9158_v0  ;;  %v6659_v56 = vld [vmem:[#allocation2 + $0xf0] ss:$8 sps:$4 sm:$0xff]   ;;  %v6662_v58 = vld [vmem:[#allocation2 + $0x100] ss:$8 sps:$4 sm:$0xff]   ;;  %v6663_v59 = vld [vmem:[#allocation2 + $0x114] ss:$8 sps:$4 sm:$0xff]  }
  0xb6   :  { %v6665_v60 = vld [vmem:[#allocation2 + $0x110] ss:$8 sps:$4 sm:$0xff]   ;;  %v6666_v61 = vld [vmem:[#allocation2 + $0x124] ss:$8 sps:$4 sm:$0xff]   ;;  %v6668_v62 = vld [vmem:[#allocation2 + $0x120] ss:$8 sps:$4 sm:$0xff]  }
  0xb7   :  { %6410 = vmatpush3.bf16.msra.mxu1 %v6686_v36  ;;  %v6669_v63 = vld [vmem:[#allocation2 + $0x134] ss:$8 sps:$4 sm:$0xff]   ;;  %v6671_v1 = vld [vmem:[#allocation2 + $0x130] ss:$8 sps:$4 sm:$0xff]   ;;  %v6672_v2 = vld [vmem:[#allocation2 + $0x144] ss:$8 sps:$4 sm:$0xff]  }
  0xb8   :  { %599 = vmatpush1.bf16.msra.mxu0 %v6601_v7  ;;  %6403 = vmatprep.subr.bf16.mxu1 %v6687_v37  ;;  %v6674_v3 = vld [vmem:[#allocation2 + $0x140] ss:$8 sps:$4 sm:$0xff]   ;;  %v6675_v4 = vld [vmem:[#allocation2 + $0x154] ss:$8 sps:$4 sm:$0xff]   ;;  %v6677_v5 = vld [vmem:[#allocation2 + $0x150] ss:$8 sps:$4 sm:$0xff]  }
  0xb9   :  { %600 = vmatprep.subr.bf16.mxu0 %v9158_v0  ;;  %v6678_v6 = vld [vmem:[#allocation2 + $0x164] ss:$8 sps:$4 sm:$0xff]   ;;  %v6680_v7 = vld [vmem:[#allocation2 + $0x160] ss:$8 sps:$4 sm:$0xff]  }
  0xbb   :  { %6411 = vmatpush3.bf16.msra.mxu1 %v6687_v37 }
  0xbc   :  { %601 = vmatpush1.bf16.msra.mxu0 %v6602_v8  ;;  %6404 = vmatprep.subr.bf16.mxu1 %v6688_v44  ;;  %v6683_v8 = vld [vmem:[#allocation2 + $0x174] ss:$8 sps:$4 sm:$0xff]  }
  0xbd   :  { %602 = vmatprep.subr.bf16.mxu0 %v9158_v0 }
  0xbf   :  { %6412 = vmatpush3.bf16.msra.mxu1 %v6688_v44 }
  0xc0   :  { %603 = vmatpush1.bf16.msra.mxu0 %v6603_v9  ;;  %6405 = vmatprep.subr.bf16.mxu1 %v6689_v47  ;;  %v6685_v9 = vld [vmem:[#allocation2 + $0x170] ss:$8 sps:$4 sm:$0xff]  }
  0xc1   :  { %604 = vmatprep.subr.bf16.mxu0 %v9158_v0 }
  0xc3   :  { %6413 = vmatpush3.bf16.msra.mxu1 %v6689_v47 }
  0xc4   :  { %605 = vmatpush1.bf16.msra.mxu0 %v6604_v10  ;;  %6406 = vmatprep.subr.bf16.mxu1 %v6690_v48  ;;  %v8079_v10 = vld [vmem:[%s9150_s5] ss:$0 sm:$0xff] }
  0xc5   :  { %606 = vmatprep.subr.bf16.mxu0 %v9158_v0 }
  0xc7   :  { %6414 = vmatpush3.bf16.msra.mxu1 %v6690_v48 }
  0xc8   :  { %607 = vmatpush1.bf16.msra.mxu0 %v6605_v11  ;;  %6407 = vmatprep.subr.bf16.mxu1 %v6691_v51 }
  0xc9   :  { %608 = vmatprep.subr.bf16.mxu0 %v9158_v0 }
  0xcb   :  { %6415 = vmatpush3.bf16.msra.mxu1 %v6691_v51 }
  0xcc   :  { %609 = vmatpush1.bf16.msra.mxu0 %v6606_v12 }
  0xcd   :  { %610 = vmatprep.subr.bf16.mxu0 %v9158_v0 }
  0xd0   :  { %611 = vmatpush1.bf16.msra.mxu0 %v6607_v13 }
  0xd1   :  { %612 = vmatprep.subr.bf16.mxu0 %v9158_v0 }
  0xd4   :  { %613 = vmatpush1.bf16.msra.mxu0 %v6608_v14 }
  0xd5   :  { %614 = vmatprep.subr.bf16.mxu0 %v9158_v0 }
  0xd8   :  { %615 = vmatpush1.bf16.msra.mxu0 %v6609_v15 }
  0xd9   :  { %616 = vmatprep.subr.bf16.mxu0 %v9158_v0 }
  0xdc   :  { %617 = vmatpush1.bf16.msra.mxu0 %v6610_v16 }
  0xdd   :  { %618 = vmatprep.subr.bf16.mxu0 %v9158_v0 }
  0xe0   :  { %619 = vmatpush1.bf16.msra.mxu0 %v6611_v17 }
  0xe1   :  { %6144 = vmatprep.subr.bf16.mxu0 %v6681_v32 }
  0xe3   :  { %621 = vmatmul.mubr.bf16.vlgmr.msra.gmra.mrb[0].mxu0 %v6612_v18 }
  0xe4   :  { %628 = vmatprep.mubr.bf16.mxu0 %v6615_v19  ;;  %6145 = vmatpush3.bf16.msra.mxu0 %v6681_v32 }
  0xe5   :  { %6146 = vmatprep.subr.bf16.mxu0 %v6682_v33 }
  0xe8   :  { %6147 = vmatpush3.bf16.msra.mxu0 %v6682_v33 }
  0xe9   :  { %6148 = vmatprep.subr.bf16.mxu0 %v6686_v36 }
  0xeb   :  { %629 = vmatmul.mubr.bf16.gmra.mrb[4].mxu0 %v6617_v20 }
  0xec   :  { %636 = vmatprep.mubr.bf16.mxu0 %v6618_v21  ;;  %6149 = vmatpush3.bf16.msra.mxu0 %v6686_v36 }
  0xed   :  { %6150 = vmatprep.subr.bf16.mxu0 %v6687_v37 }
  0xf0   :  { %6151 = vmatpush3.bf16.msra.mxu0 %v6687_v37 }
  0xf1   :  { %6152 = vmatprep.subr.bf16.mxu0 %v6688_v44 }
  0xf3   :  { %637 = vmatmul.mubr.bf16.gmra.mrb[8].mxu0 %v6620_v22 }
  0xf4   :  { %644 = vmatprep.mubr.bf16.mxu0 %v6621_v23  ;;  %6153 = vmatpush3.bf16.msra.mxu0 %v6688_v44 }
  0xf5   :  { %6154 = vmatprep.subr.bf16.mxu0 %v6689_v47 }
  0xf8   :  { %6155 = vmatpush3.bf16.msra.mxu0 %v6689_v47 }
  0xf9   :  { %6156 = vmatprep.subr.bf16.mxu0 %v6690_v48 }
  0xfb   :  { %645 = vmatmul.mubr.bf16.gmra.mrb[12].mxu0 %v6623_v24 }
  0xfc   :  { %652 = vmatprep.mubr.bf16.mxu0 %v6624_v25  ;;  %6157 = vmatpush3.bf16.msra.mxu0 %v6690_v48 }
  0xfd   :  { %6158 = vmatprep.subr.bf16.mxu0 %v6691_v51 }
 0x100   :  { %6159 = vmatpush3.bf16.msra.mxu0 %v6691_v51 }
 0x103   :  { %653 = vmatmul.mubr.bf16.gmra.mrb[16].mxu0 %v6626_v26 }
 0x104   :  { %660 = vmatprep.mubr.bf16.mxu0 %v6627_v27 }
 0x10b   :  { %661 = vmatmul.mubr.bf16.gmra.mrb[20].mxu0 %v6629_v28 }
 0x10c   :  { %668 = vmatprep.mubr.bf16.mxu0 %v6630_v29 }
 0x113   :  { %669 = vmatmul.mubr.bf16.gmra.mrb[24].mxu0 %v6632_v30 }
 0x114   :  { %676 = vmatprep.mubr.bf16.mxu0 %v6633_v31 }
 0x11b   :  { %677 = vmatmul.mubr.bf16.gmra.mrb[28].mxu0 %v6635_v34 }
 0x11c   :  { %684 = vmatprep.mubr.bf16.mxu0 %v6636_v35 }
 0x123   :  { %685 = vmatmul.mubr.bf16.gmra.mrb[32].mxu0 %v6638_v38 }
 0x124   :  { %692 = vmatprep.mubr.bf16.mxu0 %v6639_v39 }
 0x12b   :  { %693 = vmatmul.mubr.bf16.gmra.mrb[36].mxu0 %v6641_v40 }
 0x12c   :  { %700 = vmatprep.mubr.bf16.mxu0 %v6642_v41 }
 0x133   :  { %701 = vmatmul.mubr.bf16.gmra.mrb[40].mxu0 %v6644_v42 }
 0x134   :  { %708 = vmatprep.mubr.bf16.mxu0 %v6645_v43 }
 0x13b   :  { %709 = vmatmul.mubr.bf16.gmra.mrb[44].mxu0 %v6647_v45 }
 0x13c   :  { %716 = vmatprep.mubr.bf16.mxu0 %v6648_v46 }
 0x143   :  { %717 = vmatmul.mubr.bf16.gmra.mrb[48].mxu0 %v6650_v49 }
 0x144   :  { %724 = vmatprep.mubr.bf16.mxu0 %v6651_v50 }
 0x14b   :  { %725 = vmatmul.mubr.bf16.gmra.mrb[52].mxu0 %v6653_v52 }
 0x14c   :  { %732 = vmatprep.mubr.bf16.mxu0 %v6654_v53 }
 0x153   :  { %733 = vmatmul.mubr.bf16.gmra.mrb[56].mxu0 %v6656_v54 }
 0x154   :  { %740 = vmatprep.mubr.bf16.mxu0 %v6657_v55 }
 0x15b   :  { %741 = vmatmul.mubr.bf16.gmra.mrb[60].mxu0 %v6659_v56 }
 0x15c   :  { %748 = vmatprep.mubr.bf16.mxu0 %v6660_v57 }
 0x163   :  { %749 = vmatmul.mubr.bf16.gmra.mrb[64].mxu0 %v6662_v58 }
 0x164   :  { %756 = vmatprep.mubr.bf16.mxu0 %v6663_v59 }
 0x16b   :  { %757 = vmatmul.mubr.bf16.gmra.mrb[68].mxu0 %v6665_v60 }
 0x16c   :  { %764 = vmatprep.mubr.bf16.mxu0 %v6666_v61 }
 0x173   :  { %765 = vmatmul.mubr.bf16.gmra.mrb[72].mxu0 %v6668_v62 }
 0x174   :  { %772 = vmatprep.mubr.bf16.mxu0 %v6669_v63 }
 0x17b   :  { %773 = vmatmul.mubr.bf16.gmra.mrb[76].mxu0 %v6671_v1 }
 0x17c   :  { %780 = vmatprep.mubr.bf16.mxu0 %v6672_v2 }
 0x183   :  { %781 = vmatmul.mubr.bf16.gmra.mrb[80].mxu0 %v6674_v3 }
 0x184   :  { %788 = vmatprep.mubr.bf16.mxu0 %v6675_v4 }
 0x18b   :  { %789 = vmatmul.mubr.bf16.gmra.mrb[84].mxu0 %v6677_v5 }
 0x18c   :  { %796 = vmatprep.mubr.bf16.mxu0 %v6678_v6 }
 0x193   :  { %797 = vmatmul.mubr.bf16.gmra.mrb[88].mxu0 %v6680_v7 }
 0x194   :  { %804 = vmatprep.mubr.bf16.mxu0 %v6683_v8 }
 0x19b   :  { %805 = vmatmul.mubr.bf16.gmra.mrb[92].mxu0 %v6685_v9 }
 0x1b6   :  { %v622_v11 = vpop.f32.mrb[0].mxu0 }
 0x1b7   :  { %v623_v12 = vadd.f32 %v8079_v10, %v622_v11  ;;  %v624_v13 = vpop.f32.mrb[1].mxu0 }
 0x1b8   :  { %v625_v14 = vpop.f32.mrb[2].mxu0 }
 0x1b9   :  { %v626_v15 = vadd.f32 %v8079_v10, %v625_v14  ;;  %v627_v16 = vpop.f32.mrb[3].mxu0  ;;  %v813_v17 = vmax.f32 %v623_v12, 0.0 }
 0x1bb   :  { %v814_v18 = vmax.f32 %v626_v15, 0.0 }
 0x1bd   :  { %v861_v19 = vpack.c.bf16 %v814_v18, %v813_v17 }
 0x1be   :  { %v630_v20 = vpop.f32.mrb[4].mxu0 }
 0x1bf   :  { %v631_v21 = vadd.f32 %v8079_v10, %v630_v20  ;;  %v632_v22 = vpop.f32.mrb[5].mxu0  ;;  %6160 = vmatprep.mubr.bf16.mxu0 %v861_v19 }
 0x1c0   :  { %v633_v23 = vpop.f32.mrb[6].mxu0  ;;  %v6695_v22 = vld [vmem:[#allocation13 + $0x8] ss:$16 sps:$4 sm:$0xff]  }
 0x1c1   :  { %v634_v24 = vadd.f32 %v8079_v10, %v633_v23  ;;  %v635_v25 = vpop.f32.mrb[7].mxu0  ;;  %v815_v26 = vmax.f32 %v631_v21, 0.0  ;;  %v6694_v21 = vld [vmem:[#allocation13 + $0x4] ss:$16 sps:$4 sm:$0xff]  }
 0x1c2   :  { %1467 = vmatprep.subr.bf16.mxu1 %v6694_v21 }
 0x1c3   :  { %v816_v27 = vmax.f32 %v634_v24, 0.0  ;;  %v6697_v24 = vld [vmem:[#allocation13 + $0xc] ss:$16 sps:$4 sm:$0xff]  }
 0x1c4   :  { %1740 = vmatprep.subr.bf16.mxu0 %v6697_v24 }
 0x1c5   :  { %v862_v28 = vpack.c.bf16 %v816_v27, %v815_v26 }
 0x1c6   :  { %v638_v29 = vpop.f32.mrb[8].mxu0 }
 0x1c7   :  { %v639_v30 = vadd.f32 %v8079_v10, %v638_v29  ;;  %v640_v31 = vpop.f32.mrb[9].mxu0  ;;  %6161 = vmatmul.mubr.bf16.vlgmr.msra.gmra.mrb[96].mxu0 %v862_v28  ;;  %v6703_v28 = vld [vmem:[#allocation13 + $0x2c] ss:$16 sps:$4 sm:$0xff]  }
 0x1c8   :  { %v641_v32 = vpop.f32.mrb[10].mxu0  ;;  %1741 = vmatpush1.bf16.msra.mxu0 %v6695_v22  ;;  %v6722_v22 = vld [vmem:[#allocation13 + $0xa0] ss:$16 sps:$4 sm:$0xff]  }
 0x1c9   :  { %v642_v33 = vadd.f32 %v8079_v10, %v641_v32  ;;  %v643_v34 = vpop.f32.mrb[11].mxu0  ;;  %v817_v35 = vmax.f32 %v639_v30, 0.0  ;;  %v6701_v32 = vld [vmem:[#allocation13 + $0x28] ss:$16 sps:$4 sm:$0xff]   ;;  %1742 = vmatprep.subr.bf16.mxu0 %v6703_v28 }
 0x1cb   :  { %v818_v36 = vmax.f32 %v642_v33, 0.0  ;;  %v6709_v33 = vld [vmem:[#allocation13 + $0x4c] ss:$16 sps:$4 sm:$0xff]  }
 0x1cc   :  { %1743 = vmatpush1.bf16.msra.mxu0 %v6701_v32 }
 0x1cd   :  { %v863_v37 = vpack.c.bf16 %v818_v36, %v817_v35  ;;  %v6707_v36 = vld [vmem:[#allocation13 + $0x48] ss:$16 sps:$4 sm:$0xff]   ;;  %1744 = vmatprep.subr.bf16.mxu0 %v6709_v33  ;;  %v6736_v33 = vld [vmem:[#allocation13 + $0xe4] ss:$16 sps:$4 sm:$0xff]  }
 0x1ce   :  { %v646_v38 = vpop.f32.mrb[12].mxu0 }
 0x1cf   :  { %v647_v39 = vadd.f32 %v8079_v10, %v646_v38  ;;  %v648_v40 = vpop.f32.mrb[13].mxu0  ;;  %6164 = vmatprep.mubr.bf16.mxu0 %v863_v37  ;;  %v6715_v38 = vld [vmem:[#allocation13 + $0x6c] ss:$16 sps:$4 sm:$0xff]  }
 0x1d0   :  { %v649_v41 = vpop.f32.mrb[14].mxu0  ;;  %1745 = vmatpush1.bf16.msra.mxu0 %v6707_v36 }
 0x1d1   :  { %v650_v42 = vadd.f32 %v8079_v10, %v649_v41  ;;  %v651_v43 = vpop.f32.mrb[15].mxu0  ;;  %v819_v44 = vmax.f32 %v647_v39, 0.0  ;;  %1746 = vmatprep.subr.bf16.mxu0 %v6715_v38 }
 0x1d3   :  { %v820_v45 = vmax.f32 %v650_v42, 0.0 }
 0x1d5   :  { %v864_v46 = vpack.c.bf16 %v820_v45, %v819_v44  ;;  %v6713_v45 = vld [vmem:[#allocation13 + $0x68] ss:$16 sps:$4 sm:$0xff]  }
 0x1d6   :  { %v654_v47 = vpop.f32.mrb[16].mxu0  ;;  %1747 = vmatpush1.bf16.msra.mxu0 %v6713_v45 }
 0x1d7   :  { %v655_v48 = vadd.f32 %v8079_v10, %v654_v47  ;;  %v656_v49 = vpop.f32.mrb[17].mxu0  ;;  %6165 = vmatmul.mubr.bf16.gmra.mrb[100].mxu0 %v864_v46  ;;  %v6721_v46 = vld [vmem:[#allocation13 + $0x8c] ss:$16 sps:$4 sm:$0xff]  }
 0x1d8   :  { %v657_v50 = vpop.f32.mrb[18].mxu0  ;;  %1748 = vmatprep.subr.bf16.mxu0 %v6721_v46 }
 0x1d9   :  { %v658_v51 = vadd.f32 %v8079_v10, %v657_v50  ;;  %v659_v52 = vpop.f32.mrb[19].mxu0  ;;  %v821_v53 = vmax.f32 %v655_v48, 0.0  ;;  %v6692_v48 = vld [vmem:[#allocation13] ss:$16 sps:$4 sm:$0xff]   ;;  %v6700_v50 = vld [vmem:[#allocation13 + $0x24] ss:$16 sps:$4 sm:$0xff]  }
 0x1db   :  { %v822_v54 = vmax.f32 %v658_v51, 0.0  ;;  %v6719_v51 = vld [vmem:[#allocation13 + $0x88] ss:$16 sps:$4 sm:$0xff]  }
 0x1dc   :  { %1749 = vmatpush1.bf16.msra.mxu0 %v6719_v51 }
 0x1dd   :  { %v865_v55 = vpack.c.bf16 %v822_v54, %v821_v53  ;;  %v6727_v53 = vld [vmem:[#allocation13 + $0xac] ss:$16 sps:$4 sm:$0xff]  }
 0x1de   :  { %v662_v56 = vpop.f32.mrb[20].mxu0  ;;  %1750 = vmatprep.subr.bf16.mxu0 %v6727_v53 }
 0x1df   :  { %v663_v57 = vadd.f32 %v8079_v10, %v662_v56  ;;  %v664_v58 = vpop.f32.mrb[21].mxu0  ;;  %6168 = vmatprep.mubr.bf16.mxu0 %v865_v55 }
 0x1e0   :  { %v665_v59 = vpop.f32.mrb[22].mxu0 }
 0x1e1   :  { %v666_v60 = vadd.f32 %v8079_v10, %v665_v59  ;;  %v667_v61 = vpop.f32.mrb[23].mxu0  ;;  %v823_v62 = vmax.f32 %v663_v57, 0.0  ;;  %v6698_v57 = vld [vmem:[#allocation13 + $0x20] ss:$16 sps:$4 sm:$0xff]  }
 0x1e2   :  { %v6706_v61 = vld [vmem:[#allocation13 + $0x44] ss:$16 sps:$4 sm:$0xff]  }
 0x1e3   :  { %v824_v63 = vmax.f32 %v666_v60, 0.0 }
 0x1e5   :  { %v866_v1 = vpack.c.bf16 %v824_v63, %v823_v62  ;;  %v6725_v62 = vld [vmem:[#allocation13 + $0xa8] ss:$16 sps:$4 sm:$0xff]  }
 0x1e6   :  { %v670_v2 = vpop.f32.mrb[24].mxu0  ;;  %1751 = vmatpush1.bf16.msra.mxu0 %v6725_v62 }
 0x1e7   :  { %v671_v3 = vadd.f32 %v8079_v10, %v670_v2  ;;  %v672_v4 = vpop.f32.mrb[25].mxu0  ;;  %6169 = vmatmul.mubr.bf16.gmra.mrb[104].mxu0 %v866_v1  ;;  %v6704_v1 = vld [vmem:[#allocation13 + $0x40] ss:$16 sps:$4 sm:$0xff]  }
 0x1e8   :  { %v673_v5 = vpop.f32.mrb[26].mxu0 }
 0x1e9   :  { %v674_v6 = vadd.f32 %v8079_v10, %v673_v5  ;;  %v675_v7 = vpop.f32.mrb[27].mxu0  ;;  %v825_v8 = vmax.f32 %v671_v3, 0.0  ;;  %v6712_v3 = vld [vmem:[#allocation13 + $0x64] ss:$16 sps:$4 sm:$0xff]  }
 0x1eb   :  { %v826_v9 = vmax.f32 %v674_v6, 0.0 }
 0x1ed   :  { %v867_v11 = vpack.c.bf16 %v826_v9, %v825_v8  ;;  %v6710_v8 = vld [vmem:[#allocation13 + $0x60] ss:$16 sps:$4 sm:$0xff]  }
 0x1ee   :  { %v678_v12 = vpop.f32.mrb[28].mxu0 }
 0x1ef   :  { %v679_v13 = vadd.f32 %v8079_v10, %v678_v12  ;;  %v680_v14 = vpop.f32.mrb[29].mxu0  ;;  %6172 = vmatprep.mubr.bf16.mxu0 %v867_v11 }
 0x1f0   :  { %v681_v15 = vpop.f32.mrb[30].mxu0 }
 0x1f1   :  { %v682_v16 = vadd.f32 %v8079_v10, %v681_v15  ;;  %v683_v17 = vpop.f32.mrb[31].mxu0  ;;  %v827_v18 = vmax.f32 %v679_v13, 0.0  ;;  %v6718_v13 = vld [vmem:[#allocation13 + $0x84] ss:$16 sps:$4 sm:$0xff]   ;;  %v6716_v15 = vld [vmem:[#allocation13 + $0x80] ss:$16 sps:$4 sm:$0xff]  }
 0x1f2   :  { %v6724_v17 = vld [vmem:[#allocation13 + $0xa4] ss:$16 sps:$4 sm:$0xff]  }
 0x1f3   :  { %v828_v19 = vmax.f32 %v682_v16, 0.0 }
 0x1f5   :  { %v868_v20 = vpack.c.bf16 %v828_v19, %v827_v18 }
 0x1f6   :  { %v686_v23 = vpop.f32.mrb[32].mxu0 }
 0x1f7   :  { %6173 = vmatmul.mubr.bf16.gmra.mrb[108].mxu0 %v868_v20  ;;  %v687_v25 = vadd.f32 %v8079_v10, %v686_v23  ;;  %v688_v26 = vpop.f32.mrb[33].mxu0 }
 0x1f8   :  { %v689_v27 = vpop.f32.mrb[34].mxu0  ;;  %1772 = vmatprep.mubr.bf16.mxu0 %v9158_v0  ;;  %v6730_v26 = vld [vmem:[#allocation13 + $0xc4] ss:$16 sps:$4 sm:$0xff]  }
 0x1f9   :  { %v829_v29 = vmax.f32 %v687_v25, 0.0  ;;  %v690_v30 = vadd.f32 %v8079_v10, %v689_v27  ;;  %v691_v31 = vpop.f32.mrb[35].mxu0  ;;  %v6733_v27 = vld [vmem:[#allocation13 + $0xcc] ss:$16 sps:$4 sm:$0xff]  }
 0x1fa   :  { %1752 = vmatprep.subr.bf16.mxu0 %v6733_v27 }
 0x1fb   :  { %v830_v34 = vmax.f32 %v690_v30, 0.0  ;;  %v6728_v30 = vld [vmem:[#allocation13 + $0xc0] ss:$16 sps:$4 sm:$0xff]  }
 0x1fd   :  { %v869_v35 = vpack.c.bf16 %v830_v34, %v829_v29  ;;  %v6731_v29 = vld [vmem:[#allocation13 + $0xc8] ss:$16 sps:$4 sm:$0xff]   ;;  %v6739_v34 = vld [vmem:[#allocation13 + $0xec] ss:$16 sps:$4 sm:$0xff]  }
 0x1fe   :  { %v694_v37 = vpop.f32.mrb[36].mxu0  ;;  %1753 = vmatpush1.bf16.msra.mxu0 %v6731_v29 }
 0x1ff   :  { %v695_v39 = vadd.f32 %v8079_v10, %v694_v37  ;;  %v696_v40 = vpop.f32.mrb[37].mxu0  ;;  %6176 = vmatprep.mubr.bf16.mxu1 %v869_v35  ;;  %v6737_v37 = vld [vmem:[#allocation13 + $0xe8] ss:$16 sps:$4 sm:$0xff]   ;;  %1754 = vmatprep.subr.bf16.mxu0 %v6739_v34 }
 0x200   :  { %v697_v41 = vpop.f32.mrb[38].mxu0 }
 0x201   :  { %v831_v42 = vmax.f32 %v695_v39, 0.0  ;;  %v698_v43 = vadd.f32 %v8079_v10, %v697_v41  ;;  %v699_v44 = vpop.f32.mrb[39].mxu0  ;;  %v6734_v39 = vld [vmem:[#allocation13 + $0xe0] ss:$16 sps:$4 sm:$0xff]  }
 0x202   :  { %1755 = vmatpush1.bf16.msra.mxu0 %v6737_v37 }
 0x203   :  { %v832_v47 = vmax.f32 %v698_v43, 0.0 }
 0x205   :  { %v870_v49 = vpack.c.bf16 %v832_v47, %v831_v42 }
 0x206   :  { %v702_v52 = vpop.f32.mrb[40].mxu0 }
 0x207   :  { %6177 = vmatmul.mubr.bf16.vlgmr.msra.gmra.mrb[0].mxu1 %v870_v49  ;;  %v703_v54 = vadd.f32 %v8079_v10, %v702_v52  ;;  %v704_v55 = vpop.f32.mrb[41].mxu0 }
 0x208   :  { %v705_v56 = vpop.f32.mrb[42].mxu0  ;;  %1468 = vmatpush1.bf16.msra.mxu1 %v6692_v48 }
 0x209   :  { %v833_v58 = vmax.f32 %v703_v54, 0.0  ;;  %v706_v59 = vadd.f32 %v8079_v10, %v705_v56  ;;  %v707_v60 = vpop.f32.mrb[43].mxu0  ;;  %1469 = vmatprep.subr.bf16.mxu1 %v6700_v50 }
 0x20b   :  { %v834_v63 = vmax.f32 %v706_v59, 0.0 }
 0x20c   :  { %1470 = vmatpush1.bf16.msra.mxu1 %v6698_v57 }
 0x20d   :  { %v871_v2 = vpack.c.bf16 %v834_v63, %v833_v58  ;;  %1471 = vmatprep.subr.bf16.mxu1 %v6706_v61 }
 0x20e   :  { %v710_v4 = vpop.f32.mrb[44].mxu0 }
 0x20f   :  { %v711_v5 = vadd.f32 %v8079_v10, %v710_v4  ;;  %v712_v6 = vpop.f32.mrb[45].mxu0  ;;  %6180 = vmatprep.mubr.bf16.mxu1 %v871_v2 }
 0x210   :  { %v713_v7 = vpop.f32.mrb[46].mxu0  ;;  %1472 = vmatpush1.bf16.msra.mxu1 %v6704_v1 }
 0x211   :  { %v835_v9 = vmax.f32 %v711_v5, 0.0  ;;  %v714_v11 = vadd.f32 %v8079_v10, %v713_v7  ;;  %v715_v12 = vpop.f32.mrb[47].mxu0  ;;  %1473 = vmatprep.subr.bf16.mxu1 %v6712_v3 }
 0x213   :  { %v836_v14 = vmax.f32 %v714_v11, 0.0 }
 0x214   :  { %1474 = vmatpush1.bf16.msra.mxu1 %v6710_v8 }
 0x215   :  { %v872_v16 = vpack.c.bf16 %v836_v14, %v835_v9  ;;  %1475 = vmatprep.subr.bf16.mxu1 %v6718_v13 }
 0x216   :  { %v718_v18 = vpop.f32.mrb[48].mxu0 }
 0x217   :  { %6181 = vmatmul.mubr.bf16.gmra.mrb[4].mxu1 %v872_v16  ;;  %v719_v19 = vadd.f32 %v8079_v10, %v718_v18  ;;  %v720_v20 = vpop.f32.mrb[49].mxu0 }
 0x218   :  { %v721_v21 = vpop.f32.mrb[50].mxu0  ;;  %1476 = vmatpush1.bf16.msra.mxu1 %v6716_v15 }
 0x219   :  { %v837_v23 = vmax.f32 %v719_v19, 0.0  ;;  %v722_v24 = vadd.f32 %v8079_v10, %v721_v21  ;;  %v723_v25 = vpop.f32.mrb[51].mxu0  ;;  %1477 = vmatprep.subr.bf16.mxu1 %v6724_v17 }
 0x21b   :  { %v838_v28 = vmax.f32 %v722_v24, 0.0 }
 0x21c   :  { %1478 = vmatpush1.bf16.msra.mxu1 %v6722_v22 }
 0x21d   :  { %v873_v31 = vpack.c.bf16 %v838_v28, %v837_v23  ;;  %1479 = vmatprep.subr.bf16.mxu1 %v6730_v26 }
 0x21e   :  { %v726_v32 = vpop.f32.mrb[52].mxu0 }
 0x21f   :  { %v727_v35 = vadd.f32 %v8079_v10, %v726_v32  ;;  %v728_v36 = vpop.f32.mrb[53].mxu0  ;;  %6184 = vmatprep.mubr.bf16.mxu1 %v873_v31 }
 0x220   :  { %v729_v38 = vpop.f32.mrb[54].mxu0  ;;  %1480 = vmatpush1.bf16.msra.mxu1 %v6728_v30 }
 0x221   :  { %v839_v40 = vmax.f32 %v727_v35, 0.0  ;;  %v730_v41 = vadd.f32 %v8079_v10, %v729_v38  ;;  %v731_v42 = vpop.f32.mrb[55].mxu0  ;;  %1481 = vmatprep.subr.bf16.mxu1 %v6736_v33 }
 0x223   :  { %v840_v43 = vmax.f32 %v730_v41, 0.0 }
 0x224   :  { %1482 = vmatpush1.bf16.msra.mxu1 %v6734_v39 }
 0x225   :  { %v874_v44 = vpack.c.bf16 %v840_v43, %v839_v40 }
 0x226   :  { %v734_v45 = vpop.f32.mrb[56].mxu0 }
 0x227   :  { %6185 = vmatmul.mubr.bf16.gmra.mrb[8].mxu1 %v874_v44  ;;  %v735_v46 = vadd.f32 %v8079_v10, %v734_v45  ;;  %v736_v47 = vpop.f32.mrb[57].mxu0 }
 0x228   :  { %v737_v48 = vpop.f32.mrb[58].mxu0 }
 0x229   :  { %v841_v49 = vmax.f32 %v735_v46, 0.0  ;;  %v738_v50 = vadd.f32 %v8079_v10, %v737_v48  ;;  %v739_v51 = vpop.f32.mrb[59].mxu0 }
 0x22b   :  { %v842_v52 = vmax.f32 %v738_v50, 0.0 }
 0x22d   :  { %v875_v53 = vpack.c.bf16 %v842_v52, %v841_v49 }
 0x22e   :  { %v742_v54 = vpop.f32.mrb[60].mxu0 }
 0x22f   :  { %v743_v55 = vadd.f32 %v8079_v10, %v742_v54  ;;  %v744_v56 = vpop.f32.mrb[61].mxu0  ;;  %6188 = vmatprep.mubr.bf16.mxu1 %v875_v53 }
 0x230   :  { %v745_v57 = vpop.f32.mrb[62].mxu0 }
 0x231   :  { %v843_v58 = vmax.f32 %v743_v55, 0.0  ;;  %v746_v59 = vadd.f32 %v8079_v10, %v745_v57  ;;  %v747_v60 = vpop.f32.mrb[63].mxu0 }
 0x233   :  { %v844_v61 = vmax.f32 %v746_v59, 0.0 }
 0x235   :  { %v876_v62 = vpack.c.bf16 %v844_v61, %v843_v58 }
 0x236   :  { %v750_v63 = vpop.f32.mrb[64].mxu0 }
 0x237   :  { %6189 = vmatmul.mubr.bf16.gmra.mrb[12].mxu1 %v876_v62  ;;  %v751_v1 = vadd.f32 %v8079_v10, %v750_v63  ;;  %v752_v2 = vpop.f32.mrb[65].mxu0 }
 0x238   :  { %v753_v3 = vpop.f32.mrb[66].mxu0 }
 0x239   :  { %v845_v4 = vmax.f32 %v751_v1, 0.0  ;;  %v754_v5 = vadd.f32 %v8079_v10, %v753_v3  ;;  %v755_v6 = vpop.f32.mrb[67].mxu0 }
 0x23b   :  { %v846_v7 = vmax.f32 %v754_v5, 0.0 }
 0x23d   :  { %v877_v8 = vpack.c.bf16 %v846_v7, %v845_v4 }
 0x23e   :  { %v758_v9 = vpop.f32.mrb[68].mxu0 }
 0x23f   :  { %v759_v11 = vadd.f32 %v8079_v10, %v758_v9  ;;  %v760_v12 = vpop.f32.mrb[69].mxu0  ;;  %6192 = vmatprep.mubr.bf16.mxu1 %v877_v8 }
 0x240   :  { %v761_v13 = vpop.f32.mrb[70].mxu0 }
 0x241   :  { %v847_v14 = vmax.f32 %v759_v11, 0.0  ;;  %v762_v15 = vadd.f32 %v8079_v10, %v761_v13  ;;  %v763_v16 = vpop.f32.mrb[71].mxu0  ;;  %v8134_v11 = vld [vmem:[%s9152_s7] ss:$0 sm:$0xff] }
 0x243   :  { %v848_v17 = vmax.f32 %v762_v15, 0.0 }
 0x245   :  { %v878_v18 = vpack.c.bf16 %v848_v17, %v847_v14 }
 0x246   :  { %v766_v19 = vpop.f32.mrb[72].mxu0 }
 0x247   :  { %6193 = vmatmul.mubr.bf16.gmra.mrb[16].mxu1 %v878_v18  ;;  %v767_v20 = vadd.f32 %v8079_v10, %v766_v19  ;;  %v768_v21 = vpop.f32.mrb[73].mxu0 }
 0x248   :  { %v769_v22 = vpop.f32.mrb[74].mxu0 }
 0x249   :  { %v849_v23 = vmax.f32 %v767_v20, 0.0  ;;  %v770_v24 = vadd.f32 %v8079_v10, %v769_v22  ;;  %v771_v25 = vpop.f32.mrb[75].mxu0 }
 0x24b   :  { %v850_v26 = vmax.f32 %v770_v24, 0.0 }
 0x24d   :  { %v879_v27 = vpack.c.bf16 %v850_v26, %v849_v23 }
 0x24e   :  { %v774_v28 = vpop.f32.mrb[76].mxu0 }
 0x24f   :  { %v775_v29 = vadd.f32 %v8079_v10, %v774_v28  ;;  %v776_v30 = vpop.f32.mrb[77].mxu0  ;;  %6196 = vmatprep.mubr.bf16.mxu1 %v879_v27 }
 0x250   :  { %v777_v31 = vpop.f32.mrb[78].mxu0 }
 0x251   :  { %v851_v32 = vmax.f32 %v775_v29, 0.0  ;;  %v778_v33 = vadd.f32 %v8079_v10, %v777_v31  ;;  %v779_v34 = vpop.f32.mrb[79].mxu0 }
 0x253   :  { %v852_v35 = vmax.f32 %v778_v33, 0.0 }
 0x255   :  { %v880_v36 = vpack.c.bf16 %v852_v35, %v851_v32 }
 0x256   :  { %v782_v37 = vpop.f32.mrb[80].mxu0 }
 0x257   :  { %6197 = vmatmul.mubr.bf16.gmra.mrb[20].mxu1 %v880_v36  ;;  %v783_v38 = vadd.f32 %v8079_v10, %v782_v37  ;;  %v784_v39 = vpop.f32.mrb[81].mxu0 }
 0x258   :  { %v785_v40 = vpop.f32.mrb[82].mxu0 }
 0x259   :  { %v853_v41 = vmax.f32 %v783_v38, 0.0  ;;  %v786_v42 = vadd.f32 %v8079_v10, %v785_v40  ;;  %v787_v43 = vpop.f32.mrb[83].mxu0 }
 0x25b   :  { %v854_v44 = vmax.f32 %v786_v42, 0.0 }
 0x25d   :  { %v881_v45 = vpack.c.bf16 %v854_v44, %v853_v41 }
 0x25e   :  { %v790_v46 = vpop.f32.mrb[84].mxu0 }
 0x25f   :  { %v791_v47 = vadd.f32 %v8079_v10, %v790_v46  ;;  %v792_v48 = vpop.f32.mrb[85].mxu0  ;;  %6200 = vmatprep.mubr.bf16.mxu1 %v881_v45 }
 0x260   :  { %v793_v49 = vpop.f32.mrb[86].mxu0 }
 0x261   :  { %v855_v50 = vmax.f32 %v791_v47, 0.0  ;;  %v794_v51 = vadd.f32 %v8079_v10, %v793_v49  ;;  %v795_v52 = vpop.f32.mrb[87].mxu0 }
 0x263   :  { %v856_v53 = vmax.f32 %v794_v51, 0.0 }
 0x265   :  { %v882_v54 = vpack.c.bf16 %v856_v53, %v855_v50 }
 0x266   :  { %v798_v55 = vpop.f32.mrb[88].mxu0 }
 0x267   :  { %6201 = vmatmul.mubr.bf16.gmra.mrb[24].mxu1 %v882_v54  ;;  %v799_v56 = vadd.f32 %v8079_v10, %v798_v55  ;;  %v800_v57 = vpop.f32.mrb[89].mxu0 }
 0x268   :  { %v801_v58 = vpop.f32.mrb[90].mxu0 }
 0x269   :  { %v857_v59 = vmax.f32 %v799_v56, 0.0  ;;  %v802_v60 = vadd.f32 %v8079_v10, %v801_v58  ;;  %v803_v61 = vpop.f32.mrb[91].mxu0 }
 0x26b   :  { %v858_v62 = vmax.f32 %v802_v60, 0.0 }
 0x26d   :  { %v883_v63 = vpack.c.bf16 %v858_v62, %v857_v59 }
 0x26e   :  { %v806_v1 = vpop.f32.mrb[92].mxu0 }
 0x26f   :  { %v807_v2 = vadd.f32 %v8079_v10, %v806_v1  ;;  %v808_v3 = vpop.f32.mrb[93].mxu0  ;;  %6204 = vmatprep.mubr.bf16.mxu1 %v883_v63 }
 0x270   :  { %v809_v4 = vpop.f32.mrb[94].mxu0 }
 0x271   :  { %v859_v5 = vmax.f32 %v807_v2, 0.0  ;;  %v810_v6 = vadd.f32 %v8079_v10, %v809_v4  ;;  %v811_v7 = vpop.f32.mrb[95].mxu0 }
 0x273   :  { %v860_v8 = vmax.f32 %v810_v6, 0.0 }
 0x275   :  { %v884_v9 = vpack.c.bf16 %v860_v8, %v859_v5 }
 0x277   :  { %6205 = vmatmul.mubr.bf16.gmra.mrb[28].mxu1 %v884_v9 }
 0x278   :  { %1499 = vmatprep.mubr.bf16.mxu1 %v9158_v0 }
 0x29a   :  { %v6162_v12 = vpop.f32.mrb[96].mxu0 }
 0x29b   :  { %v999_v13 = vadd.f32 %v6162_v12, %v8134_v11  ;;  %v990_v14 = vpop.f32.mrb[97].mxu0 }
 0x29c   :  { %v991_v15 = vadd.f32 %v8134_v11, %v990_v14  ;;  %v6163_v16 = vpop.f32.mrb[98].mxu0 }
 0x29d   :  { %v1002_v10 = vadd.f32 %v6163_v16, %v8134_v11  ;;  %v993_v17 = vpop.f32.mrb[99].mxu0  ;;  %v1183_v19 = vmax.f32 %v999_v13, 0.0 }
 0x29e   :  { %v994_v18 = vadd.f32 %v8134_v11, %v993_v17  ;;  %v1181_v21 = vmax.f32 %v991_v15, 0.0 }
 0x29f   :  { %v1184_v20 = vmax.f32 %v1002_v10, 0.0 }
 0x2a0   :  { %v1182_v22 = vmax.f32 %v994_v18, 0.0 }
 0x2a1   :  { %v1230_v23 = vpack.c.bf16 %v1184_v20, %v1183_v19 }
 0x2a2   :  { %v1229_v24 = vpack.c.bf16 %v1182_v22, %v1181_v21 }
 0x2a4   :  { %1500 = vmatmul.mubr.bf16.vlgmr.msra.gmra.mrb[32].mxu1 %v1229_v24  ;;  %1773 = vmatmul.mubr.bf16.vlgmr.msra.gmra.mrb[112].mxu0 %v1229_v24 }
 0x2a5   :  { %1509 = vmatprep.mubr.bf16.mxu1 %v9158_v0  ;;  %1780 = vmatprep.mubr.bf16.mxu0 %v9158_v0 }
 0x2aa   :  { %v6166_v25 = vpop.f32.mrb[100].mxu0 }
 0x2ab   :  { %v1015_v26 = vadd.f32 %v6166_v25, %v8134_v11  ;;  %v1006_v27 = vpop.f32.mrb[101].mxu0 }
 0x2ac   :  { %v1007_v28 = vadd.f32 %v8134_v11, %v1006_v27  ;;  %v6167_v29 = vpop.f32.mrb[102].mxu0  ;;  %1510 = vmatmul.mubr.bf16.gmra.mrb[36].mxu1 %v1230_v23  ;;  %1781 = vmatmul.mubr.bf16.gmra.mrb[116].mxu0 %v1230_v23 }
 0x2ad   :  { %v1018_v30 = vadd.f32 %v6167_v29, %v8134_v11  ;;  %v1009_v31 = vpop.f32.mrb[103].mxu0  ;;  %1519 = vmatprep.mubr.bf16.mxu1 %v9158_v0  ;;  %1788 = vmatprep.mubr.bf16.mxu0 %v9158_v0  ;;  %v1187_v33 = vmax.f32 %v1015_v26, 0.0 }
 0x2ae   :  { %v1010_v32 = vadd.f32 %v8134_v11, %v1009_v31  ;;  %v1185_v35 = vmax.f32 %v1007_v28, 0.0 }
 0x2af   :  { %v1188_v34 = vmax.f32 %v1018_v30, 0.0 }
 0x2b0   :  { %v1186_v36 = vmax.f32 %v1010_v32, 0.0 }
 0x2b1   :  { %v1232_v37 = vpack.c.bf16 %v1188_v34, %v1187_v33 }
 0x2b2   :  { %v1231_v38 = vpack.c.bf16 %v1186_v36, %v1185_v35 }
 0x2b4   :  { %1520 = vmatmul.mubr.bf16.gmra.mrb[40].mxu1 %v1231_v38  ;;  %1789 = vmatmul.mubr.bf16.gmra.mrb[120].mxu0 %v1231_v38 }
 0x2b5   :  { %1529 = vmatprep.mubr.bf16.mxu1 %v9158_v0  ;;  %1796 = vmatprep.mubr.bf16.mxu0 %v9158_v0 }
 0x2ba   :  { %v6170_v39 = vpop.f32.mrb[104].mxu0 }
 0x2bb   :  { %v1031_v40 = vadd.f32 %v6170_v39, %v8134_v11  ;;  %v1022_v41 = vpop.f32.mrb[105].mxu0 }
 0x2bc   :  { %v1023_v42 = vadd.f32 %v8134_v11, %v1022_v41  ;;  %v6171_v43 = vpop.f32.mrb[106].mxu0  ;;  %1530 = vmatmul.mubr.bf16.gmra.mrb[44].mxu1 %v1232_v37  ;;  %1797 = vmatmul.mubr.bf16.gmra.mrb[124].mxu0 %v1232_v37 }
 0x2bd   :  { %v1034_v44 = vadd.f32 %v6171_v43, %v8134_v11  ;;  %v1025_v45 = vpop.f32.mrb[107].mxu0  ;;  %1539 = vmatprep.mubr.bf16.mxu1 %v9158_v0  ;;  %1804 = vmatprep.mubr.bf16.mxu0 %v9158_v0  ;;  %v1191_v47 = vmax.f32 %v1031_v40, 0.0 }
 0x2be   :  { %v1026_v46 = vadd.f32 %v8134_v11, %v1025_v45  ;;  %v1189_v49 = vmax.f32 %v1023_v42, 0.0 }
 0x2bf   :  { %v1192_v48 = vmax.f32 %v1034_v44, 0.0 }
 0x2c0   :  { %v1190_v50 = vmax.f32 %v1026_v46, 0.0 }
 0x2c1   :  { %v1234_v51 = vpack.c.bf16 %v1192_v48, %v1191_v47 }
 0x2c2   :  { %v1233_v52 = vpack.c.bf16 %v1190_v50, %v1189_v49 }
 0x2c4   :  { %1540 = vmatmul.mubr.bf16.gmra.mrb[48].mxu1 %v1233_v52  ;;  %1805 = vmatmul.mubr.bf16.gmra.mrb[128].mxu0 %v1233_v52 }
 0x2c5   :  { %1549 = vmatprep.mubr.bf16.mxu1 %v9158_v0  ;;  %1812 = vmatprep.mubr.bf16.mxu0 %v9158_v0 }
 0x2ca   :  { %v6174_v53 = vpop.f32.mrb[108].mxu0 }
 0x2cb   :  { %v1047_v54 = vadd.f32 %v6174_v53, %v8134_v11  ;;  %v1038_v55 = vpop.f32.mrb[109].mxu0 }
 0x2cc   :  { %v1039_v56 = vadd.f32 %v8134_v11, %v1038_v55  ;;  %v6175_v57 = vpop.f32.mrb[110].mxu0  ;;  %1550 = vmatmul.mubr.bf16.gmra.mrb[52].mxu1 %v1234_v51  ;;  %1813 = vmatmul.mubr.bf16.gmra.mrb[132].mxu0 %v1234_v51 }
 0x2cd   :  { %v1050_v58 = vadd.f32 %v6175_v57, %v8134_v11  ;;  %v1041_v59 = vpop.f32.mrb[111].mxu0  ;;  %1559 = vmatprep.mubr.bf16.mxu1 %v9158_v0  ;;  %1820 = vmatprep.mubr.bf16.mxu0 %v9158_v0  ;;  %v1195_v61 = vmax.f32 %v1047_v54, 0.0 }
 0x2ce   :  { %v1042_v60 = vadd.f32 %v8134_v11, %v1041_v59  ;;  %v1193_v63 = vmax.f32 %v1039_v56, 0.0 }
 0x2cf   :  { %v1196_v62 = vmax.f32 %v1050_v58, 0.0 }
 0x2d0   :  { %v1194_v1 = vmax.f32 %v1042_v60, 0.0 }
 0x2d1   :  { %v1236_v2 = vpack.c.bf16 %v1196_v62, %v1195_v61 }
 0x2d2   :  { %v1235_v3 = vpack.c.bf16 %v1194_v1, %v1193_v63 }
 0x2d4   :  { %1560 = vmatmul.mubr.bf16.gmra.mrb[56].mxu1 %v1235_v3  ;;  %1821 = vmatmul.mubr.bf16.gmra.mrb[136].mxu0 %v1235_v3 }
 0x2d5   :  { %1569 = vmatprep.mubr.bf16.mxu1 %v9158_v0  ;;  %1828 = vmatprep.mubr.bf16.mxu0 %v9158_v0 }
 0x2da   :  { %v6178_v4 = vpop.f32.mrb[0].mxu1 }
 0x2db   :  { %v1063_v5 = vadd.f32 %v6178_v4, %v8134_v11  ;;  %v1054_v6 = vpop.f32.mrb[1].mxu1 }
 0x2dc   :  { %1570 = vmatmul.mubr.bf16.gmra.mrb[60].mxu1 %v1236_v2  ;;  %1829 = vmatmul.mubr.bf16.gmra.mrb[140].mxu0 %v1236_v2  ;;  %v1055_v7 = vadd.f32 %v8134_v11, %v1054_v6  ;;  %v6179_v8 = vpop.f32.mrb[2].mxu1 }
 0x2dd   :  { %v1199_v9 = vmax.f32 %v1063_v5, 0.0  ;;  %v1066_v12 = vadd.f32 %v6179_v8, %v8134_v11  ;;  %v1057_v13 = vpop.f32.mrb[3].mxu1  ;;  %1836 = vmatprep.mubr.bf16.mxu0 %v9158_v0  ;;  %1579 = vmatprep.mubr.bf16.mxu1 %v9158_v0 }
 0x2de   :  { %v1197_v14 = vmax.f32 %v1055_v7, 0.0  ;;  %v1058_v15 = vadd.f32 %v8134_v11, %v1057_v13 }
 0x2df   :  { %v1200_v16 = vmax.f32 %v1066_v12, 0.0 }
 0x2e0   :  { %v1198_v10 = vmax.f32 %v1058_v15, 0.0 }
 0x2e1   :  { %v1238_v17 = vpack.c.bf16 %v1200_v16, %v1199_v9 }
 0x2e2   :  { %v1237_v18 = vpack.c.bf16 %v1198_v10, %v1197_v14 }
 0x2e4   :  { %1837 = vmatmul.mubr.bf16.gmra.mrb[144].mxu0 %v1237_v18  ;;  %1580 = vmatmul.mubr.bf16.gmra.mrb[64].mxu1 %v1237_v18 }
 0x2e5   :  { %1846 = vmatprep.mubr.bf16.mxu0 %v9158_v0  ;;  %1589 = vmatprep.mubr.bf16.mxu1 %v9158_v0 }
 0x2ea   :  { %v6182_v19 = vpop.f32.mrb[4].mxu1 }
 0x2eb   :  { %v1079_v20 = vadd.f32 %v6182_v19, %v8134_v11  ;;  %v1070_v21 = vpop.f32.mrb[5].mxu1 }
 0x2ec   :  { %v1071_v22 = vadd.f32 %v8134_v11, %v1070_v21  ;;  %v6183_v23 = vpop.f32.mrb[6].mxu1  ;;  %1847 = vmatmul.mubr.bf16.gmra.mrb[148].mxu0 %v1238_v17  ;;  %1590 = vmatmul.mubr.bf16.gmra.mrb[68].mxu1 %v1238_v17 }
 0x2ed   :  { %v1203_v24 = vmax.f32 %v1079_v20, 0.0  ;;  %v1082_v25 = vadd.f32 %v6183_v23, %v8134_v11  ;;  %v1073_v26 = vpop.f32.mrb[7].mxu1  ;;  %1856 = vmatprep.mubr.bf16.mxu0 %v9158_v0  ;;  %1599 = vmatprep.mubr.bf16.mxu1 %v9158_v0 }
 0x2ee   :  { %v1201_v27 = vmax.f32 %v1071_v22, 0.0  ;;  %v1074_v28 = vadd.f32 %v8134_v11, %v1073_v26 }
 0x2ef   :  { %v1204_v29 = vmax.f32 %v1082_v25, 0.0 }
 0x2f0   :  { %v1202_v30 = vmax.f32 %v1074_v28, 0.0 }
 0x2f1   :  { %v1240_v31 = vpack.c.bf16 %v1204_v29, %v1203_v24 }
 0x2f2   :  { %v1239_v32 = vpack.c.bf16 %v1202_v30, %v1201_v27 }
 0x2f4   :  { %1857 = vmatmul.mubr.bf16.gmra.mrb[152].mxu0 %v1239_v32  ;;  %1600 = vmatmul.mubr.bf16.gmra.mrb[72].mxu1 %v1239_v32 }
 0x2f5   :  { %1866 = vmatprep.mubr.bf16.mxu0 %v9158_v0  ;;  %1609 = vmatprep.mubr.bf16.mxu1 %v9158_v0 }
 0x2fa   :  { %v6186_v33 = vpop.f32.mrb[8].mxu1 }
 0x2fb   :  { %v1095_v34 = vadd.f32 %v6186_v33, %v8134_v11  ;;  %v1086_v35 = vpop.f32.mrb[9].mxu1 }
 0x2fc   :  { %v1087_v36 = vadd.f32 %v8134_v11, %v1086_v35  ;;  %v6187_v37 = vpop.f32.mrb[10].mxu1  ;;  %1867 = vmatmul.mubr.bf16.gmra.mrb[156].mxu0 %v1240_v31  ;;  %1610 = vmatmul.mubr.bf16.gmra.mrb[76].mxu1 %v1240_v31 }
 0x2fd   :  { %v1207_v38 = vmax.f32 %v1095_v34, 0.0  ;;  %v1098_v39 = vadd.f32 %v6187_v37, %v8134_v11  ;;  %v1089_v40 = vpop.f32.mrb[11].mxu1  ;;  %1876 = vmatprep.mubr.bf16.mxu0 %v9158_v0  ;;  %1619 = vmatprep.mubr.bf16.mxu1 %v9158_v0 }
 0x2fe   :  { %v1205_v41 = vmax.f32 %v1087_v36, 0.0  ;;  %v1090_v42 = vadd.f32 %v8134_v11, %v1089_v40 }
 0x2ff   :  { %v1208_v43 = vmax.f32 %v1098_v39, 0.0 }
 0x300   :  { %v1206_v44 = vmax.f32 %v1090_v42, 0.0 }
 0x301   :  { %v1242_v45 = vpack.c.bf16 %v1208_v43, %v1207_v38 }
 0x302   :  { %v1241_v46 = vpack.c.bf16 %v1206_v44, %v1205_v41 }
 0x304   :  { %1877 = vmatmul.mubr.bf16.gmra.mrb[160].mxu0 %v1241_v46  ;;  %1620 = vmatmul.mubr.bf16.gmra.mrb[80].mxu1 %v1241_v46 }
 0x305   :  { %1886 = vmatprep.mubr.bf16.mxu0 %v9158_v0  ;;  %1629 = vmatprep.mubr.bf16.mxu1 %v9158_v0 }
 0x30a   :  { %v6190_v47 = vpop.f32.mrb[12].mxu1 }
 0x30b   :  { %v1111_v48 = vadd.f32 %v6190_v47, %v8134_v11  ;;  %v1102_v49 = vpop.f32.mrb[13].mxu1 }
 0x30c   :  { %v1103_v50 = vadd.f32 %v8134_v11, %v1102_v49  ;;  %v6191_v51 = vpop.f32.mrb[14].mxu1  ;;  %1887 = vmatmul.mubr.bf16.gmra.mrb[164].mxu0 %v1242_v45  ;;  %1630 = vmatmul.mubr.bf16.gmra.mrb[84].mxu1 %v1242_v45 }
 0x30d   :  { %v1211_v52 = vmax.f32 %v1111_v48, 0.0  ;;  %v1114_v53 = vadd.f32 %v6191_v51, %v8134_v11  ;;  %v1105_v54 = vpop.f32.mrb[15].mxu1  ;;  %1896 = vmatprep.mubr.bf16.mxu0 %v9158_v0  ;;  %1639 = vmatprep.mubr.bf16.mxu1 %v9158_v0 }
 0x30e   :  { %v1209_v55 = vmax.f32 %v1103_v50, 0.0  ;;  %v1106_v56 = vadd.f32 %v8134_v11, %v1105_v54 }
 0x30f   :  { %v1212_v57 = vmax.f32 %v1114_v53, 0.0 }
 0x310   :  { %v1210_v58 = vmax.f32 %v1106_v56, 0.0 }
 0x311   :  { %v1244_v59 = vpack.c.bf16 %v1212_v57, %v1211_v52  ;;  %v8238_v57 = vld [vmem:[%s9154_s9] sm:$0xf]  ;;  %s7838_s9 = smov [#allocation17]  }
 0x312   :  { %v1243_v60 = vpack.c.bf16 %v1210_v58, %v1209_v55  ;;  %v1287_v55 = vlaneseq  ;;  %s5646_s28 = sshll.u32 %s7838_s9, 4  ;;  %s5647_s28 = int_to_ptr.vmem [resolvable:$true] %s5646_s28 }
 0x313   :  { %s7786_s30 = scalar_lea.vmem %s5647_s28, 12288  ;;  %p7791_p3 = scmp.lt.s32.totalorder %s5647_s28, %s5647_s28 }
 0x314   :  { %1897 = vmatmul.mubr.bf16.gmra.mrb[168].mxu0 %v1243_v60  ;;  %1640 = vmatmul.mubr.bf16.gmra.mrb[88].mxu1 %v1243_v60  ;;  %v8232_v56 = vshrl.u32 %v1287_v55, 7  ;;  %p7787_p2 = scmp.ne.s32.totalorder %s5647_s28, %s7786_s30  ;;  %p7792_p4 = scmp.lt.s32.totalorder %s7786_s30, %s7786_s30 }
 0x315   :  { %1906 = vmatprep.mubr.bf16.mxu0 %v9158_v0  ;;  %1649 = vmatprep.mubr.bf16.mxu1 %v9158_v0 }
 0x316   :  { %v1293_v58 = vsub.s32 1, %v8232_v56  ;;  %p7793_p5 = por %p7792_p4, %p7791_p3 }
 0x318   :  { %v8245_v60 = vrot.slane %v8238_v57, %v1293_v58  ;;  %p7794_p6 = pnand %p7793_p5, %p7787_p2 }
 0x31a   :  { %v6194_v61 = vpop.f32.mrb[16].mxu1 }
 0x31b   :  { %v1127_v62 = vadd.f32 %v6194_v61, %v8134_v11  ;;  %v1118_v63 = vpop.f32.mrb[17].mxu1 }
 0x31c   :  { %v1119_v1 = vadd.f32 %v8134_v11, %v1118_v63  ;;  %v6195_v2 = vpop.f32.mrb[18].mxu1  ;;  %1907 = vmatmul.mubr.bf16.gmra.mrb[172].mxu0 %v1244_v59  ;;  %1650 = vmatmul.mubr.bf16.gmra.mrb[92].mxu1 %v1244_v59 }
 0x31d   :  { %v1215_v3 = vmax.f32 %v1127_v62, 0.0  ;;  %v1130_v4 = vadd.f32 %v6195_v2, %v8134_v11  ;;  %v1121_v5 = vpop.f32.mrb[19].mxu1  ;;  %1916 = vmatprep.mubr.bf16.mxu0 %v9158_v0  ;;  %1659 = vmatprep.mubr.bf16.mxu1 %v9158_v0  ;;  %v1297_v62 = vsub.s32 2, %v8232_v56 }
 0x31e   :  { %v1213_v6 = vmax.f32 %v1119_v1, 0.0  ;;  %v1122_v7 = vadd.f32 %v8134_v11, %v1121_v5 }
 0x31f   :  { %v1216_v8 = vmax.f32 %v1130_v4, 0.0 }
 0x320   :  { %v1214_v9 = vmax.f32 %v1122_v7, 0.0 }
 0x321   :  { %v1246_v12 = vpack.c.bf16 %v1216_v8, %v1215_v3 }
 0x322   :  { %v1245_v13 = vpack.c.bf16 %v1214_v9, %v1213_v6 }
 0x324   :  { %1917 = vmatmul.mubr.bf16.gmra.mrb[176].mxu0 %v1245_v13  ;;  %1660 = vmatmul.mubr.bf16.gmra.mrb[96].mxu1 %v1245_v13  ;;  %v8252_v13 = vrot.slane %v8238_v57, %v1297_v62 }
 0x325   :  { %1926 = vmatprep.mubr.bf16.mxu0 %v9158_v0  ;;  %1669 = vmatprep.mubr.bf16.mxu1 %v9158_v0 }
 0x32a   :  { %v6198_v14 = vpop.f32.mrb[20].mxu1 }
 0x32b   :  { %v1143_v15 = vadd.f32 %v6198_v14, %v8134_v11  ;;  %v1134_v16 = vpop.f32.mrb[21].mxu1 }
 0x32c   :  { %v1135_v10 = vadd.f32 %v8134_v11, %v1134_v16  ;;  %v6199_v17 = vpop.f32.mrb[22].mxu1  ;;  %1927 = vmatmul.mubr.bf16.gmra.mrb[180].mxu0 %v1246_v12  ;;  %1670 = vmatmul.mubr.bf16.gmra.mrb[100].mxu1 %v1246_v12 }
 0x32d   :  { %v1219_v18 = vmax.f32 %v1143_v15, 0.0  ;;  %v1146_v19 = vadd.f32 %v6199_v17, %v8134_v11  ;;  %v1137_v20 = vpop.f32.mrb[23].mxu1  ;;  %1936 = vmatprep.mubr.bf16.mxu0 %v9158_v0  ;;  %1679 = vmatprep.mubr.bf16.mxu1 %v9158_v0 }
 0x32e   :  { %v1217_v21 = vmax.f32 %v1135_v10, 0.0  ;;  %v1138_v22 = vadd.f32 %v8134_v11, %v1137_v20 }
 0x32f   :  { %v1220_v23 = vmax.f32 %v1146_v19, 0.0 }
 0x330   :  { %v1218_v24 = vmax.f32 %v1138_v22, 0.0 }
 0x331   :  { %v1248_v25 = vpack.c.bf16 %v1220_v23, %v1219_v18 }
 0x332   :  { %v1247_v26 = vpack.c.bf16 %v1218_v24, %v1217_v21 }
 0x334   :  { %1937 = vmatmul.mubr.bf16.gmra.mrb[184].mxu0 %v1247_v26  ;;  %1680 = vmatmul.mubr.bf16.gmra.mrb[104].mxu1 %v1247_v26 }
 0x335   :  { %1946 = vmatprep.mubr.bf16.mxu0 %v9158_v0  ;;  %1689 = vmatprep.mubr.bf16.mxu1 %v9158_v0 }
 0x33a   :  { %v6202_v27 = vpop.f32.mrb[24].mxu1 }
 0x33b   :  { %v1159_v28 = vadd.f32 %v6202_v27, %v8134_v11  ;;  %v1150_v29 = vpop.f32.mrb[25].mxu1 }
 0x33c   :  { %v1151_v30 = vadd.f32 %v8134_v11, %v1150_v29  ;;  %v6203_v31 = vpop.f32.mrb[26].mxu1  ;;  %1947 = vmatmul.mubr.bf16.gmra.mrb[188].mxu0 %v1248_v25  ;;  %1690 = vmatmul.mubr.bf16.gmra.mrb[108].mxu1 %v1248_v25 }
 0x33d   :  { %v1223_v32 = vmax.f32 %v1159_v28, 0.0  ;;  %v1162_v33 = vadd.f32 %v6203_v31, %v8134_v11  ;;  %v1153_v34 = vpop.f32.mrb[27].mxu1  ;;  %1956 = vmatprep.mubr.bf16.mxu0 %v9158_v0  ;;  %1699 = vmatprep.mubr.bf16.mxu1 %v9158_v0 }
 0x33e   :  { %v1221_v35 = vmax.f32 %v1151_v30, 0.0  ;;  %v1154_v36 = vadd.f32 %v8134_v11, %v1153_v34 }
 0x33f   :  { %v1224_v37 = vmax.f32 %v1162_v33, 0.0 }
 0x340   :  { %v1222_v38 = vmax.f32 %v1154_v36, 0.0 }
 0x341   :  { %v1250_v39 = vpack.c.bf16 %v1224_v37, %v1223_v32 }
 0x342   :  { %v1249_v40 = vpack.c.bf16 %v1222_v38, %v1221_v35 }
 0x344   :  { %1957 = vmatmul.mubr.bf16.gmra.mrb[192].mxu0 %v1249_v40  ;;  %1700 = vmatmul.mubr.bf16.gmra.mrb[112].mxu1 %v1249_v40 }
 0x345   :  { %1966 = vmatprep.mubr.bf16.mxu0 %v9158_v0  ;;  %1709 = vmatprep.mubr.bf16.mxu1 %v9158_v0 }
 0x34a   :  { %v6206_v41 = vpop.f32.mrb[28].mxu1 }
 0x34b   :  { %v1175_v42 = vadd.f32 %v6206_v41, %v8134_v11  ;;  %v1166_v43 = vpop.f32.mrb[29].mxu1 }
 0x34c   :  { %v1167_v44 = vadd.f32 %v8134_v11, %v1166_v43  ;;  %v6207_v45 = vpop.f32.mrb[30].mxu1  ;;  %1967 = vmatmul.mubr.bf16.gmra.mrb[196].mxu0 %v1250_v39  ;;  %1710 = vmatmul.mubr.bf16.gmra.mrb[116].mxu1 %v1250_v39 }
 0x34d   :  { %v1227_v46 = vmax.f32 %v1175_v42, 0.0  ;;  %v1178_v47 = vadd.f32 %v6207_v45, %v8134_v11  ;;  %v1169_v48 = vpop.f32.mrb[31].mxu1  ;;  %1976 = vmatprep.mubr.bf16.mxu0 %v9158_v0  ;;  %1719 = vmatprep.mubr.bf16.mxu1 %v9158_v0 }
 0x34e   :  { %v1225_v49 = vmax.f32 %v1167_v44, 0.0  ;;  %v1170_v50 = vadd.f32 %v8134_v11, %v1169_v48  ;;  %v1289_v11 = vsub.s32 0, %v8232_v56 }
 0x34f   :  { %v1228_v51 = vmax.f32 %v1178_v47, 0.0 }
 0x350   :  { %v1226_v52 = vmax.f32 %v1170_v50, 0.0  ;;  %v8242_v59 = vrot.slane %v8238_v57, %v1289_v11 }
 0x351   :  { %v1252_v53 = vpack.c.bf16 %v1228_v51, %v1227_v46 }
 0x352   :  { %v1251_v54 = vpack.c.bf16 %v1226_v52, %v1225_v49 }
 0x354   :  { %1977 = vmatmul.mubr.bf16.gmra.mrb[200].mxu0 %v1251_v54  ;;  %1720 = vmatmul.mubr.bf16.gmra.mrb[120].mxu1 %v1251_v54 }
 0x355   :  { %1986 = vmatprep.mubr.bf16.mxu0 %v9158_v0  ;;  %1729 = vmatprep.mubr.bf16.mxu1 %v9158_v0 }
 0x35c   :  { %1987 = vmatmul.mubr.bf16.gmra.mrb[204].mxu0 %v1252_v53  ;;  %1730 = vmatmul.mubr.bf16.gmra.mrb[124].mxu1 %v1252_v53 }
 0x35d   :  { %2525 = vmatprep.mubr.bf16.mxu1 %v9158_v0  ;;  %3160 = vmatprep.mubr.bf16.mxu0 %v9158_v0 }
 0x377   :  { %v1501_v61 = vpop.f32.mrb[32].mxu1  ;;  %v1774_v63 = vpop.f32.mrb[112].mxu0 }
 0x378   :  { %v1502_v1 = vadd.f32 %v1501_v61, %v8242_v59  ;;  %v1503_v2 = vpop.f32.mrb[33].mxu1  ;;  %v1776_v3 = vpop.f32.mrb[113].mxu0  ;;  %v1775_v17 = vadd.f32 %v1774_v63, %v8252_v13 }
 0x379   :  { %v1504_v4 = vadd.f32 %v1503_v2, %v8245_v60  ;;  %v1505_v5 = vpop.f32.mrb[34].mxu1  ;;  %v1777_v6 = vpop.f32.mrb[114].mxu0 }
 0x37a   :  { %v5768_v7 = vmul.f32 -1.442695, %v1502_v1  ;;  %v1506_v8 = vadd.f32 %v1505_v5, %v8242_v59  ;;  %v1507_v9 = vpop.f32.mrb[35].mxu1  ;;  %v1779_v12 = vpop.f32.mrb[115].mxu0  ;;  %v1778_v30 = vadd.f32 %v1777_v6, %v8252_v13 }
 0x37b   :  { %v5784_v14 = vmul.f32 -1.442695, %v1504_v4  ;;  %v1508_v15 = vadd.f32 %v1507_v9, %v8245_v60 }
 0x37c   :  { %6884 = vpow2.f32 %v5768_v7  ;;  %v5769_v16 = vmul.f32 -1.442695, %v1506_v8 }
 0x37d   :  { %6886 = vpow2.f32 %v5784_v14  ;;  %v5785_v10 = vmul.f32 -1.442695, %v1508_v15 }
 0x37e   :  { %6888 = vpow2.f32 %v5769_v16 }
 0x37f   :  { %v1511_v18 = vpop.f32.mrb[36].mxu1  ;;  %v1782_v19 = vpop.f32.mrb[116].mxu0  ;;  %6890 = vpow2.f32 %v5785_v10 }
 0x380   :  { %v1512_v20 = vadd.f32 %v1511_v18, %v8242_v59  ;;  %v1513_v21 = vpop.f32.mrb[37].mxu1  ;;  %v1784_v22 = vpop.f32.mrb[117].mxu0  ;;  %6892 = vtanh.f32 %v1775_v17  ;;  %v1783_v33 = vadd.f32 %v1782_v19, %v8252_v13 }
 0x381   :  { %v1514_v23 = vadd.f32 %v1513_v21, %v8245_v60  ;;  %v1515_v24 = vpop.f32.mrb[38].mxu1  ;;  %v1785_v25 = vpop.f32.mrb[118].mxu0 }
 0x382   :  { %v5770_v26 = vmul.f32 -1.442695, %v1512_v20  ;;  %v1516_v27 = vadd.f32 %v1515_v24, %v8242_v59  ;;  %v1517_v28 = vpop.f32.mrb[39].mxu1  ;;  %v1787_v29 = vpop.f32.mrb[119].mxu0  ;;  %v1786_v47 = vadd.f32 %v1785_v25, %v8252_v13 }
 0x383   :  { %v5786_v31 = vmul.f32 -1.442695, %v1514_v23  ;;  %v1518_v32 = vadd.f32 %v1517_v28, %v8245_v60 }
 0x384   :  { %6894 = vpow2.f32 %v5770_v26  ;;  %v5771_v34 = vmul.f32 -1.442695, %v1516_v27 }
 0x385   :  { %6896 = vpow2.f32 %v5786_v31  ;;  %v5787_v36 = vmul.f32 -1.442695, %v1518_v32 }
 0x386   :  { %v6885_v35 = vpop.eup %6884  ;;  %6898 = vpow2.f32 %v5771_v34 }
 0x387   :  { %v6887_v37 = vpop.eup %6886  ;;  %v2141_v38 = vadd.f32 1.0, %v6885_v35  ;;  %6900 = vtanh.f32 %v1778_v30  ;;  %v1521_v39 = vpop.f32.mrb[40].mxu1 }
 0x388   :  { %v1790_v40 = vpop.f32.mrb[120].mxu0  ;;  %v6889_v41 = vpop.eup %6888  ;;  %6902 = vtanh.f32 %v1783_v33  ;;  %v1522_v42 = vadd.f32 %v1521_v39, %v8242_v59  ;;  %v2237_v45 = vadd.f32 1.0, %v6887_v37 }
 0x389   :  { %v1523_v43 = vpop.f32.mrb[41].mxu1  ;;  %v1792_v44 = vpop.f32.mrb[121].mxu0  ;;  %6904 = vrcp.f32 %v2141_v38  ;;  %v2142_v46 = vadd.f32 1.0, %v6889_v41  ;;  %v1791_v7 = vadd.f32 %v1790_v40, %v8252_v13 }
 0x38a   :  { %v1525_v48 = vpop.f32.mrb[42].mxu1  ;;  %v1793_v49 = vpop.f32.mrb[122].mxu0  ;;  %6906 = vpow2.f32 %v5787_v36  ;;  %v5772_v51 = vmul.f32 -1.442695, %v1522_v42  ;;  %v1524_v52 = vadd.f32 %v1523_v43, %v8245_v60 }
 0x38b   :  { %v6891_v50 = vpop.eup %6890  ;;  %v1526_v53 = vadd.f32 %v1525_v48, %v8242_v59  ;;  %v1527_v54 = vpop.f32.mrb[43].mxu1  ;;  %6908 = vrcp.f32 %v2142_v46  ;;  %v1794_v31 = vadd.f32 %v1793_v49, %v8252_v13 }
 0x38c   :  { %v1795_v55 = vpop.f32.mrb[123].mxu0  ;;  %v2238_v11 = vadd.f32 1.0, %v6891_v50  ;;  %6910 = vpow2.f32 %v5772_v51  ;;  %v6893_v61 = vpop.eup %6892  ;;  %v5788_v63 = vmul.f32 -1.442695, %v1524_v52  ;;  %v1528_v3 = vadd.f32 %v1527_v54, %v8245_v60 }
 0x38d   :  { %v5773_v58 = vmul.f32 -1.442695, %v1526_v53  ;;  %6912 = vtanh.f32 %v1786_v47 }
 0x38e   :  { %v6895_v62 = vpop.eup %6894  ;;  %6914 = vrcp.f32 %v2237_v45  ;;  %v5789_v22 = vmul.f32 -1.442695, %v1528_v3 }
 0x38f   :  { %v6897_v1 = vpop.eup %6896  ;;  %6916 = vrcp.f32 %v2238_v11  ;;  %v2143_v2 = vadd.f32 1.0, %v6895_v62  ;;  %v1531_v4 = vpop.f32.mrb[44].mxu1 }
 0x390   :  { %v8267_v5 = vpop.f32.mrb[124].mxu0  ;;  %v6899_v6 = vpop.eup %6898  ;;  %6918 = vpow2.f32 %v5773_v58  ;;  %v2239_v14 = vadd.f32 1.0, %v6897_v1  ;;  %v1532_v18 = vadd.f32 %v1531_v4, %v8242_v59 }
 0x391   :  { %v1533_v8 = vpop.f32.mrb[45].mxu1  ;;  %v1800_v9 = vpop.f32.mrb[125].mxu0  ;;  %6920 = vrcp.f32 %v2143_v2  ;;  %v2144_v15 = vadd.f32 1.0, %v6899_v6 }
 0x392   :  { %v6901_v12 = vpop.eup %6900  ;;  %v1535_v16 = vpop.f32.mrb[46].mxu1  ;;  %6922 = vpow2.f32 %v5788_v63  ;;  %v5774_v28 = vmul.f32 -1.442695, %v1532_v18  ;;  %v1534_v32 = vadd.f32 %v1533_v8, %v8245_v60 }
 0x393   :  { %v8270_v10 = vpop.f32.mrb[126].mxu0  ;;  %v6903_v17 = vpop.eup %6902  ;;  %6924 = vrcp.f32 %v2144_v15  ;;  %v1536_v41 = vadd.f32 %v1535_v16, %v8242_v59 }
 0x394   :  { %v1537_v19 = vpop.f32.mrb[47].mxu1  ;;  %v1803_v20 = vpop.f32.mrb[127].mxu0  ;;  %6926 = vtanh.f32 %v1791_v7  ;;  %v5790_v49 = vmul.f32 -1.442695, %v1534_v32 }
 0x395   :  { %v6905_v21 = vpop.eup %6904  ;;  %6928 = vrcp.f32 %v2239_v14  ;;  %v1538_v52 = vadd.f32 %v1537_v19, %v8245_v60  ;;  %v5775_v54 = vmul.f32 -1.442695, %v1536_v41 }
 0x396   :  { %v6907_v23 = vpop.eup %6906  ;;  %v2301_v24 = vmul.f32 %v6905_v21, %v6893_v61  ;;  %v1799_v61 = vadd.f32 %v8267_v5, %v8252_v13 }
 0x397   :  { %v6909_v25 = vpop.eup %6908  ;;  %v1541_v33 = vpop.f32.mrb[48].mxu1  ;;  %v2240_v36 = vadd.f32 1.0, %v6907_v23  ;;  %v5791_v4 = vmul.f32 -1.442695, %v1538_v52 }
 0x398   :  { %v6911_v26 = vpop.eup %6910  ;;  %6930 = vtanh.f32 %v2301_v24  ;;  %2365 = vst [vmem:[#allocation17 + $0x8] sm:$0xff] %v2301_v24  ;;  %v2302_v27 = vmul.f32 %v6909_v25, %v6901_v12  ;;  %v8275_v34 = vpop.f32.mrb[128].mxu0  ;;  %v1542_v55 = vadd.f32 %v1541_v33, %v8242_v59 }
 0x399   :  { %v6913_v29 = vpop.eup %6912  ;;  %v2145_v30 = vadd.f32 1.0, %v6911_v26  ;;  %6932 = vpow2.f32 %v5789_v22  ;;  %v1543_v37 = vpop.f32.mrb[49].mxu1 }
 0x39a   :  { %v6915_v35 = vpop.eup %6914  ;;  %6934 = vtanh.f32 %v2302_v27  ;;  %2366 = vst [vmem:[#allocation17 + $0x18] sm:$0xff] %v2302_v27  ;;  %v1808_v38 = vpop.f32.mrb[129].mxu0  ;;  %v2414_v39 = vpack.c.bf16 %v2302_v27, %v2301_v24  ;;  %v5776_v14 = vmul.f32 -1.442695, %v1542_v55  ;;  %v1544_v5 = vadd.f32 %v1543_v37, %v8245_v60 }
 0x39b   :  { %v6917_v40 = vpop.eup %6916  ;;  %6936 = vrcp.f32 %v2145_v30  ;;  %v1545_v42 = vpop.f32.mrb[50].mxu1  ;;  %v1802_v38 = vadd.f32 %v8270_v10, %v8252_v13 }
 0x39c   :  { %v8278_v43 = vpop.f32.mrb[130].mxu0  ;;  %v6919_v44 = vpop.eup %6918  ;;  %6938 = vpow2.f32 %v5774_v28  ;;  %2493 = vmatprep.subr.bf16.mxu1 %v2414_v39  ;;  %v1546_v22 = vadd.f32 %v1545_v42, %v8242_v59  ;;  %v5792_v28 = vmul.f32 -1.442695, %v1544_v5 }
 0x39d   :  { %v8280_v45 = vpop.f32.mrb[51].mxu1  ;;  %v1811_v46 = vpop.f32.mrb[131].mxu0  ;;  %v2146_v48 = vadd.f32 1.0, %v6919_v44  ;;  %6940 = vtanh.f32 %v1794_v31 }
 0x39e   :  { %v6921_v47 = vpop.eup %6920  ;;  %6942 = vrcp.f32 %v2240_v36  ;;  %v5777_v32 = vmul.f32 -1.442695, %v1546_v22  ;;  %v1548_v39 = vadd.f32 %v8280_v45, %v8245_v60  ;;  %v1807_v46 = vadd.f32 %v8275_v34, %v8252_v13 }
 0x39f   :  { %v6923_v50 = vpop.eup %6922  ;;  %v8282_v51 = vmul.f32 %v6921_v47, %v6903_v17  ;;  %6944 = vrcp.f32 %v2146_v48  ;;  %v1551_v1 = vpop.f32.mrb[52].mxu1 }
 0x3a0   :  { %v6925_v53 = vpop.eup %6924  ;;  %v2241_v63 = vadd.f32 1.0, %v6923_v50  ;;  %v8290_v2 = vpop.f32.mrb[132].mxu0  ;;  %v1552_v47 = vadd.f32 %v1551_v1, %v8242_v59  ;;  %v5793_v55 = vmul.f32 -1.442695, %v1548_v39 }
 0x3a1   :  { %v6927_v11 = vpop.eup %6926  ;;  %6946 = vtanh.f32 %v8282_v51  ;;  %2367 = vst [vmem:[#allocation17 + $0x28] sm:$0xff] %v8282_v51  ;;  %v2304_v58 = vmul.f32 %v6925_v53, %v6913_v29  ;;  %v8292_v6 = vpop.f32.mrb[53].mxu1 }
 0x3a2   :  { %v6929_v62 = vpop.eup %6928  ;;  %6948 = vpow2.f32 %v5790_v49  ;;  %v1816_v7 = vpop.f32.mrb[133].mxu0  ;;  %v1554_v1 = vadd.f32 %v8292_v6, %v8245_v60  ;;  %v1301_v6 = vsub.s32 3, %v8232_v56 }
 0x3a3   :  { %v6931_v3 = vpop.eup %6930  ;;  %6950 = vtanh.f32 %v2304_v58  ;;  %2368 = vst [vmem:[#allocation17 + $0x38] sm:$0xff] %v2304_v58  ;;  %v2416_v8 = vpack.c.bf16 %v2304_v58, %v8282_v51  ;;  %v8296_v15 = vpop.f32.mrb[54].mxu1  ;;  %v5778_v58 = vmul.f32 -1.442695, %v1552_v47 }
 0x3a4   :  { %v6933_v9 = vpop.eup %6932  ;;  %v2333_v12 = vmul.f32 %v6931_v3, %v6915_v35  ;;  %6952 = vpow2.f32 %v5775_v54  ;;  %v8298_v16 = vpop.f32.mrb[134].mxu0  ;;  %v1556_v7 = vadd.f32 %v8296_v15, %v8242_v59 }
 0x3a5   :  { %v6935_v17 = vpop.eup %6934  ;;  %6954 = vtanh.f32 %v1799_v61  ;;  %v8300_v18 = vpop.f32.mrb[55].mxu1  ;;  %v2242_v25 = vadd.f32 1.0, %v6933_v9 }
 0x3a6   :  { %v1819_v19 = vpop.f32.mrb[135].mxu0  ;;  %v6937_v20 = vpop.eup %6936  ;;  %2349 = vst [vmem:[#allocation17] sm:$0xff] %v2333_v12  ;;  %v2334_v21 = vmul.f32 %v6935_v17, %v6917_v40  ;;  %6956 = vrcp.f32 %v2241_v63 }
 0x3a7   :  { %v6939_v23 = vpop.eup %6938  ;;  %v8303_v24 = vmul.f32 %v6937_v20, %v6927_v11  ;;  %6958 = vpow2.f32 %v5791_v4  ;;  %v8307_v33 = vpop.f32.mrb[56].mxu1  ;;  %v1810_v4 = vadd.f32 %v8278_v43, %v8252_v13 }
 0x3a8   :  { %v6941_v26 = vpop.eup %6940  ;;  %2350 = vst [vmem:[#allocation17 + $0x10] sm:$0xff] %v2334_v21  ;;  %v2147_v27 = vadd.f32 1.0, %v6939_v23  ;;  %6960 = vpow2.f32 %v5776_v14  ;;  %v2413_v29 = vpack.c.bf16 %v2334_v21, %v2333_v12  ;;  %v8309_v35 = vpop.f32.mrb[136].mxu0 }
 0x3a9   :  { %v6943_v30 = vpop.eup %6942  ;;  %6962 = vtanh.f32 %v8303_v24  ;;  %2369 = vst [vmem:[#allocation17 + $0x48] sm:$0xff] %v8303_v24  ;;  %v8315_v40 = vpop.f32.mrb[57].mxu1 }
 0x3aa   :  { %v6945_v31 = vpop.eup %6944  ;;  %6964 = vrcp.f32 %v2147_v27  ;;  %2494 = vmatpush1.bf16.msra.mxu1 %v2413_v29  ;;  %v1824_v41 = vpop.f32.mrb[137].mxu0  ;;  %v1558_v29 = vadd.f32 %v8300_v18, %v8245_v60 }
 0x3ab   :  { %v6947_v36 = vpop.eup %6946  ;;  %v2306_v37 = vmul.f32 %v6945_v31, %v6941_v26  ;;  %6966 = vrcp.f32 %v2242_v25  ;;  %2495 = vmatprep.subr.bf16.mxu1 %v2416_v8  ;;  %v8320_v48 = vpop.f32.mrb[58].mxu1 }
 0x3ac   :  { %v6949_v42 = vpop.eup %6948  ;;  %v2335_v44 = vmul.f32 %v6947_v36, %v6929_v62  ;;  %6968 = vpow2.f32 %v5792_v28  ;;  %v8322_v49 = vpop.f32.mrb[138].mxu0  ;;  %v5779_v28 = vmul.f32 -1.442695, %v1556_v7  ;;  %v1815_v36 = vadd.f32 %v8290_v2, %v8252_v13 }
 0x3ad   :  { %v6951_v10 = vpop.eup %6950  ;;  %6970 = vtanh.f32 %v2306_v37  ;;  %2370 = vst [vmem:[#allocation17 + $0x58] sm:$0xff] %v2306_v37  ;;  %v8324_v45 = vpop.f32.mrb[59].mxu1  ;;  %v2243_v53 = vadd.f32 1.0, %v6949_v42  ;;  %v2418_v62 = vpack.c.bf16 %v2306_v37, %v8303_v24  ;;  %v5794_v24 = vmul.f32 -1.442695, %v1554_v1 }
 0x3ae   :  { %v1827_v50 = vpop.f32.mrb[139].mxu0  ;;  %v6953_v51 = vpop.eup %6952  ;;  %2351 = vst [vmem:[#allocation17 + $0x20] sm:$0xff] %v2335_v44  ;;  %v2336_v52 = vmul.f32 %v6951_v10, %v6943_v30  ;;  %6972 = vpow2.f32 %v5777_v32  ;;  %v8349_v30 = vrot.slane %v8238_v57, %v1301_v6  ;;  %v1562_v37 = vadd.f32 %v8307_v33, %v8242_v59 }
 0x3af   :  { %v6955_v54 = vpop.eup %6954  ;;  %v2148_v34 = vadd.f32 1.0, %v6953_v51  ;;  %6974 = vtanh.f32 %v1802_v38  ;;  %v8333_v8 = vpop.f32.mrb[60].mxu1 }
 0x3b0   :  { %v6957_v11 = vpop.eup %6956  ;;  %2352 = vst [vmem:[#allocation17 + $0x30] sm:$0xff] %v2336_v52  ;;  %6976 = vtanh.f32 %v1807_v46  ;;  %v2415_v61 = vpack.c.bf16 %v2336_v52, %v2335_v44  ;;  %v8335_v9 = vpop.f32.mrb[140].mxu0  ;;  %v5795_v46 = vmul.f32 -1.442695, %v1558_v29  ;;  %v5780_v2 = vmul.f32 -1.442695, %v1562_v37 }
 0x3b1   :  { %v6959_v63 = vpop.eup %6958  ;;  %6978 = vrcp.f32 %v2148_v34  ;;  %v8337_v5 = vpop.f32.mrb[61].mxu1 }
 0x3b2   :  { %v6961_v3 = vpop.eup %6960  ;;  %6980 = vrcp.f32 %v2243_v53  ;;  %2496 = vmatpush1.bf16.msra.mxu1 %v2415_v61  ;;  %v1832_v17 = vpop.f32.mrb[141].mxu0  ;;  %v2244_v43 = vadd.f32 1.0, %v6959_v63  ;;  %v1564_v53 = vadd.f32 %v8315_v40, %v8245_v60  ;;  %v1818_v63 = vadd.f32 %v8298_v16, %v8252_v13 }
 0x3b3   :  { %v6963_v12 = vpop.eup %6962  ;;  %v2149_v14 = vadd.f32 1.0, %v6961_v3  ;;  %6982 = vpow2.f32 %v5793_v55  ;;  %2497 = vmatprep.subr.bf16.mxu1 %v2418_v62  ;;  %v8340_v21 = vpop.f32.mrb[62].mxu1  ;;  %v1566_v55 = vadd.f32 %v8320_v48, %v8242_v59 }
 0x3b4   :  { %v6965_v19 = vpop.eup %6964  ;;  %v2337_v20 = vmul.f32 %v6963_v12, %v6957_v11  ;;  %6984 = vpow2.f32 %v5778_v58  ;;  %v8342_v15 = vpop.f32.mrb[142].mxu0  ;;  %v5796_v48 = vmul.f32 -1.442695, %v1564_v53 }
 0x3b5   :  { %v6967_v22 = vpop.eup %6966  ;;  %v2307_v23 = vmul.f32 %v6965_v19, %v6955_v54  ;;  %6986 = vrcp.f32 %v2149_v14  ;;  %v8344_v25 = vpop.f32.mrb[63].mxu1  ;;  %v5781_v17 = vmul.f32 -1.442695, %v1566_v55  ;;  %v1568_v19 = vadd.f32 %v8324_v45, %v8245_v60 }
 0x3b6   :  { %v1835_v26 = vpop.f32.mrb[143].mxu0  ;;  %v6969_v27 = vpop.eup %6968  ;;  %2353 = vst [vmem:[#allocation17 + $0x40] sm:$0xff] %v2337_v20  ;;  %6988 = vtanh.f32 %v1810_v4 }
 0x3b7   :  { %v6971_v56 = vpop.eup %6970  ;;  %6990 = vtanh.f32 %v2307_v23  ;;  %2371 = vst [vmem:[#allocation17 + $0x68] sm:$0xff] %v2307_v23  ;;  %v2245_v39 = vadd.f32 1.0, %v6969_v27  ;;  %v8355_v44 = vpop.f32.mrb[144].mxu0 }
 0x3b8   :  { %v6973_v31 = vpop.eup %6972  ;;  %v2338_v32 = vmul.f32 %v6971_v56, %v6967_v22  ;;  %6992 = vrcp.f32 %v2244_v43  ;;  %v1840_v47 = vpop.f32.mrb[145].mxu0  ;;  %v1572_v22 = vadd.f32 %v8333_v8, %v8242_v59  ;;  %v5797_v8 = vmul.f32 -1.442695, %v1568_v19 }
 0x3b9   :  { %v6975_v38 = vpop.eup %6974  ;;  %v2150_v41 = vadd.f32 1.0, %v6973_v31  ;;  %6994 = vpow2.f32 %v5794_v24  ;;  %v1841_v33 = vadd.f32 %v1840_v47, %v8349_v30  ;;  %v8358_v51 = vpop.f32.mrb[146].mxu0 }
 0x3ba   :  { %v6977_v42 = vpop.eup %6976  ;;  %2354 = vst [vmem:[#allocation17 + $0x50] sm:$0xff] %v2338_v32  ;;  %6996 = vpow2.f32 %v5779_v28  ;;  %v2417_v18 = vpack.c.bf16 %v2338_v32, %v2337_v20  ;;  %v1844_v54 = vpop.f32.mrb[147].mxu0  ;;  %v1823_v28 = vadd.f32 %v8309_v35, %v8252_v13 }
 0x3bb   :  { %v6979_v57 = vpop.eup %6978  ;;  %6998 = vrcp.f32 %v2150_v41  ;;  %v1845_v58 = vadd.f32 %v1844_v54, %v8349_v30 }
 0x3bc   :  { %v6981_v10 = vpop.eup %6980  ;;  %v2308_v50 = vmul.f32 %v6979_v57, %v6975_v38  ;;  %7000 = vtanh.f32 %v1815_v36  ;;  %2498 = vmatpush1.bf16.msra.mxu1 %v2417_v18  ;;  %v5782_v38 = vmul.f32 -1.442695, %v1572_v22  ;;  %v1574_v18 = vadd.f32 %v8337_v5, %v8245_v60 }
 0x3bd   :  { %v6983_v52 = vpop.eup %6982  ;;  %7002 = vrcp.f32 %v2245_v39  ;;  %v8369_v4 = vpack.c.bf16 %v1845_v58, %v1841_v33 }
 0x3be   :  { %v6985_v34 = vpop.eup %6984  ;;  %7004 = vtanh.f32 %v2308_v50  ;;  %2372 = vst [vmem:[#allocation17 + $0x78] sm:$0xff] %v2308_v50  ;;  %v2420_v11 = vpack.c.bf16 %v2308_v50, %v2307_v23  ;;  %v2246_v40 = vadd.f32 1.0, %v6983_v52  ;;  %v5798_v58 = vmul.f32 -1.442695, %v1574_v18 }
 0x3bf   :  { %v6987_v61 = vpop.eup %6986  ;;  %v2151_v62 = vadd.f32 1.0, %v6985_v34  ;;  %7006 = vpow2.f32 %v5795_v46  ;;  %v8373_v16 = vpop.f32.mrb[148].mxu0  ;;  %v1576_v46 = vadd.f32 %v8340_v21, %v8242_v59  ;;  %v1834_v18 = vadd.f32 %v8342_v15, %v8252_v13 }
 0x3c0   :  { %v6989_v1 = vpop.eup %6988  ;;  %v8367_v3 = vmul.f32 %v6987_v61, %v6977_v42  ;;  %7008 = vpow2.f32 %v5780_v2  ;;  %2499 = vmatprep.subr.bf16.mxu1 %v2420_v11  ;;  %v1850_v20 = vpop.f32.mrb[149].mxu0  ;;  %v1826_v2 = vadd.f32 %v8322_v49, %v8252_v13 }
 0x3c1   :  { %v6991_v7 = vpop.eup %6990  ;;  %7010 = vrcp.f32 %v2151_v62  ;;  %v1851_v23 = vadd.f32 %v1850_v20, %v8349_v30  ;;  %v8380_v24 = vpop.f32.mrb[150].mxu0  ;;  %v5783_v49 = vmul.f32 -1.442695, %v1576_v46 }
 0x3c2   :  { %v6993_v12 = vpop.eup %6992  ;;  %v2339_v14 = vmul.f32 %v6991_v7, %v6981_v10  ;;  %7012 = vtanh.f32 %v8367_v3  ;;  %2373 = vst [vmem:[#allocation17 + $0x88] sm:$0xff] %v8367_v3  ;;  %v1854_v56 = vpop.f32.mrb[151].mxu0 }
 0x3c3   :  { %v6995_v6 = vpop.eup %6994  ;;  %7014 = vtanh.f32 %v1818_v63  ;;  %v1855_v32 = vadd.f32 %v1854_v56, %v8349_v30 }
 0x3c4   :  { %v6997_v43 = vpop.eup %6996  ;;  %2355 = vst [vmem:[#allocation17 + $0x60] sm:$0xff] %v2339_v14  ;;  %7016 = vrcp.f32 %v2246_v40  ;;  %v2247_v31 = vadd.f32 1.0, %v6995_v6  ;;  %v1578_v40 = vadd.f32 %v8344_v25, %v8245_v60  ;;  %v1831_v6 = vadd.f32 %v8335_v9, %v8252_v13 }
 0x3c5   :  { %v6999_v26 = vpop.eup %6998  ;;  %v2152_v27 = vadd.f32 1.0, %v6997_v43  ;;  %7018 = vpow2.f32 %v5796_v48  ;;  %v8386_v41 = vpack.c.bf16 %v1855_v32, %v1851_v23 }
 0x3c6   :  { %v7001_v29 = vpop.eup %7000  ;;  %v2310_v45 = vmul.f32 %v6999_v26, %v6989_v1  ;;  %7020 = vpow2.f32 %v5781_v17  ;;  %v5799_v25 = vmul.f32 -1.442695, %v1578_v40 }
 0x3c7   :  { %v7003_v36 = vpop.eup %7002  ;;  %7022 = vrcp.f32 %v2152_v27  ;;  %v8392_v47 = vpop.f32.mrb[152].mxu0 }
 0x3c8   :  { %v7005_v37 = vpop.eup %7004  ;;  %7024 = vtanh.f32 %v2310_v45  ;;  %2374 = vst [vmem:[#allocation17 + $0x98] sm:$0xff] %v2310_v45  ;;  %v2422_v39 = vpack.c.bf16 %v2310_v45, %v8367_v3  ;;  %v1860_v52 = vpop.f32.mrb[153].mxu0 }
 0x3c9   :  { %v7007_v35 = vpop.eup %7006  ;;  %v2340_v42 = vmul.f32 %v7005_v37, %v6993_v12  ;;  %7026 = vtanh.f32 %v1823_v28  ;;  %v1861_v5 = vadd.f32 %v1860_v52, %v8349_v30  ;;  %v8397_v55 = vpop.f32.mrb[154].mxu0 }
 0x3ca   :  { %v7009_v57 = vpop.eup %7008  ;;  %7028 = vrcp.f32 %v2247_v31  ;;  %v2248_v34 = vadd.f32 1.0, %v7007_v35  ;;  %v1864_v61 = vpop.f32.mrb[155].mxu0 }
 0x3cb   :  { %v7011_v10 = vpop.eup %7010  ;;  %2356 = vst [vmem:[#allocation17 + $0x70] sm:$0xff] %v2340_v42  ;;  %v2153_v50 = vadd.f32 1.0, %v7009_v57  ;;  %7030 = vpow2.f32 %v5797_v8  ;;  %v2419_v33 = vpack.c.bf16 %v2340_v42, %v2339_v14  ;;  %v1865_v63 = vadd.f32 %v1864_v61, %v8349_v30 }
 0x3cc   :  { %v7013_v53 = vpop.eup %7012  ;;  %v2311_v54 = vmul.f32 %v7011_v10, %v7001_v29  ;;  %7032 = vpow2.f32 %v5782_v38 }
 0x3cd   :  { %v7015_v21 = vpop.eup %7014  ;;  %v2341_v11 = vmul.f32 %v7013_v53, %v7003_v36  ;;  %7034 = vrcp.f32 %v2153_v50  ;;  %2500 = vmatpush1.bf16.msra.mxu1 %v2419_v33  ;;  %v8402_v7 = vpack.c.bf16 %v1865_v63, %v1861_v5 }
 0x3ce   :  { %v7017_v62 = vpop.eup %7016  ;;  %7036 = vtanh.f32 %v2311_v54  ;;  %2375 = vst [vmem:[#allocation17 + $0xa8] sm:$0xff] %v2311_v54  ;;  %2501 = vmatprep.subr.bf16.mxu1 %v2422_v39 }
 0x3cf   :  { %v7019_v1 = vpop.eup %7018  ;;  %2357 = vst [vmem:[#allocation17 + $0x80] sm:$0xff] %v2341_v11  ;;  %7038 = vtanh.f32 %v1826_v2  ;;  %v8406_v19 = vpop.f32.mrb[156].mxu0 }
 0x3d0   :  { %v7021_v3 = vpop.eup %7020  ;;  %7040 = vrcp.f32 %v2248_v34  ;;  %v2249_v22 = vadd.f32 1.0, %v7019_v1  ;;  %v1870_v23 = vpop.f32.mrb[157].mxu0 }
 0x3d1   :  { %v7023_v48 = vpop.eup %7022  ;;  %v2154_v12 = vadd.f32 1.0, %v7021_v3  ;;  %7042 = vpow2.f32 %v5798_v58  ;;  %v1871_v28 = vadd.f32 %v1870_v23, %v8349_v30  ;;  %v8409_v56 = vpop.f32.mrb[158].mxu0 }
 0x3d2   :  { %v7025_v14 = vpop.eup %7024  ;;  %v2312_v17 = vmul.f32 %v7023_v48, %v7015_v21  ;;  %7044 = vpow2.f32 %v5783_v49  ;;  %v1874_v45 = vpop.f32.mrb[159].mxu0 }
 0x3d3   :  { %v7027_v20 = vpop.eup %7026  ;;  %v2342_v43 = vmul.f32 %v7025_v14, %v7017_v62  ;;  %7046 = vrcp.f32 %v2154_v12  ;;  %v1875_v32 = vadd.f32 %v1874_v45, %v8349_v30 }
 0x3d4   :  { %v7029_v26 = vpop.eup %7028  ;;  %7048 = vtanh.f32 %v2312_v17  ;;  %2376 = vst [vmem:[#allocation17 + $0xb8] sm:$0xff] %v2312_v17  ;;  %v2424_v27 = vpack.c.bf16 %v2312_v17, %v2311_v54 }
 0x3d5   :  { %v7031_v29 = vpop.eup %7030  ;;  %2358 = vst [vmem:[#allocation17 + $0x90] sm:$0xff] %v2342_v43  ;;  %v2421_v9 = vpack.c.bf16 %v2342_v43, %v2341_v11  ;;  %7050 = vtanh.f32 %v1831_v6  ;;  %v8412_v39 = vpack.c.bf16 %v1875_v32, %v1871_v28 }
 0x3d6   :  { %v7033_v31 = vpop.eup %7032  ;;  %7052 = vrcp.f32 %v2249_v22  ;;  %v2250_v46 = vadd.f32 1.0, %v7031_v29 }
 0x3d7   :  { %v7035_v36 = vpop.eup %7034  ;;  %v2155_v8 = vadd.f32 1.0, %v7033_v31  ;;  %2502 = vmatpush1.bf16.msra.mxu1 %v2421_v9  ;;  %7054 = vpow2.f32 %v5799_v25  ;;  %v8416_v10 = vpop.f32.mrb[160].mxu0 }
 0x3d8   :  { %v7037_v37 = vpop.eup %7036  ;;  %v2313_v38 = vmul.f32 %v7035_v36, %v7027_v20  ;;  %2503 = vmatprep.subr.bf16.mxu1 %v2424_v27  ;;  %v1880_v2 = vpop.f32.mrb[161].mxu0 }
 0x3d9   :  { %v7039_v35 = vpop.eup %7038  ;;  %v2343_v42 = vmul.f32 %v7037_v37, %v7029_v26  ;;  %7056 = vrcp.f32 %v2155_v8  ;;  %v1881_v52 = vadd.f32 %v1880_v2, %v8349_v30  ;;  %v8419_v53 = vpop.f32.mrb[162].mxu0 }
 0x3da   :  { %v7041_v57 = vpop.eup %7040  ;;  %7058 = vtanh.f32 %v2313_v38  ;;  %2377 = vst [vmem:[#allocation17 + $0xc8] sm:$0xff] %v2313_v38  ;;  %v1884_v5 = vpop.f32.mrb[163].mxu0 }
 0x3db   :  { %v7043_v50 = vpop.eup %7042  ;;  %2359 = vst [vmem:[#allocation17 + $0xa0] sm:$0xff] %v2343_v42  ;;  %7060 = vtanh.f32 %v1834_v18  ;;  %v1885_v11 = vadd.f32 %v1884_v5, %v8349_v30 }
 0x3dc   :  { %v7045_v33 = vpop.eup %7044  ;;  %7062 = vrcp.f32 %v2250_v46  ;;  %v2251_v1 = vadd.f32 1.0, %v7043_v50 }
 0x3dd   :  { %v7047_v54 = vpop.eup %7046  ;;  %v2156_v34 = vadd.f32 1.0, %v7045_v33  ;;  %v8422_v49 = vpack.c.bf16 %v1885_v11, %v1881_v52 }
 0x3de   :  { %v7049_v21 = vpop.eup %7048  ;;  %v2314_v15 = vmul.f32 %v7047_v54, %v7039_v35 }
 0x3df   :  { %v2344_v58 = vmul.f32 %v7049_v21, %v7041_v57  ;;  %7064 = vrcp.f32 %v2156_v34  ;;  %v7051_v61 = vpop.eup %7050  ;;  %v8424_v48 = vpop.f32.mrb[164].mxu0 }
 0x3e0   :  { %7066 = vtanh.f32 %v2314_v15  ;;  %2378 = vst [vmem:[#allocation17 + $0xd8] sm:$0xff] %v2314_v15  ;;  %v2426_v62 = vpack.c.bf16 %v2314_v15, %v2313_v38  ;;  %v7053_v63 = vpop.eup %7052  ;;  %v1890_v14 = vpop.f32.mrb[165].mxu0 }
 0x3e1   :  { %2360 = vst [vmem:[#allocation17 + $0xb0] sm:$0xff] %v2344_v58  ;;  %v2423_v3 = vpack.c.bf16 %v2344_v58, %v2343_v42  ;;  %v7055_v40 = vpop.eup %7054  ;;  %v1891_v20 = vadd.f32 %v1890_v14, %v8349_v30  ;;  %v8427_v43 = vpop.f32.mrb[166].mxu0  ;;  %7068 = vrcp.f32 %v2251_v1  ;;  %v6742_v14 = vld [vmem:[#allocation16 + $0x8] sm:$0xff]  }
 0x3e2   :  { %v1894_v23 = vpop.f32.mrb[167].mxu0  ;;  %v2252_v27 = vadd.f32 1.0, %v7055_v40 }
 0x3e3   :  { %v7057_v12 = vpop.eup %7056  ;;  %2504 = vmatpush1.bf16.msra.mxu1 %v2423_v3  ;;  %v1895_v26 = vadd.f32 %v1894_v23, %v8349_v30  ;;  %v6740_v3 = vld [vmem:[#allocation5] ss:$12 sps:$4 sm:$0xff]   ;;  %v6744_v23 = vld [vmem:[#allocation16 + $0x10] sm:$0xff]  }
 0x3e4   :  { %v7059_v17 = vpop.eup %7058  ;;  %v2315_v6 = vmul.f32 %v7057_v12, %v7051_v61  ;;  %2505 = vmatprep.subr.bf16.mxu1 %v2426_v62  ;;  %v6741_v62 = vld [vmem:[#allocation16] sm:$0xff]  }
 0x3e5   :  { %v2345_v22 = vmul.f32 %v7059_v17, %v7053_v63  ;;  %v7061_v25 = vpop.eup %7060  ;;  %v8430_v29 = vpack.c.bf16 %v1895_v26, %v1891_v20 }
 0x3e6   :  { %7070 = vtanh.f32 %v2315_v6  ;;  %2379 = vst [vmem:[#allocation17 + $0xe8] sm:$0xff] %v2315_v6  ;;  %v7063_v28 = vpop.eup %7062 }
 0x3e7   :  { %2361 = vst [vmem:[#allocation17 + $0xc0] sm:$0xff] %v2345_v22  ;;  %v8432_v32 = vpop.f32.mrb[168].mxu0  ;;  %7072 = vrcp.f32 %v2252_v27 }
 0x3e8   :  { %v1900_v8 = vpop.f32.mrb[169].mxu0 }
 0x3e9   :  { %v7065_v9 = vpop.eup %7064  ;;  %v1901_v38 = vadd.f32 %v1900_v8, %v8349_v30  ;;  %v8435_v35 = vpop.f32.mrb[170].mxu0 }
 0x3ea   :  { %v7067_v45 = vpop.eup %7066  ;;  %v2316_v31 = vmul.f32 %v7065_v9, %v7061_v25  ;;  %v1904_v18 = vpop.f32.mrb[171].mxu0  ;;  %v6743_v25 = vld [vmem:[#allocation5 + $0x18] ss:$12 sps:$4 sm:$0xff]  }
 0x3eb   :  { %v2346_v36 = vmul.f32 %v7067_v45, %v7063_v28  ;;  %v1905_v57 = vadd.f32 %v1904_v18, %v8349_v30  ;;  %v7069_v46 = vpop.eup %7068  ;;  %v6745_v9 = vld [vmem:[#allocation16 + $0x18] sm:$0xff]  }
 0x3ec   :  { %7074 = vtanh.f32 %v2316_v31  ;;  %2380 = vst [vmem:[#allocation17 + $0xf8] sm:$0xff] %v2316_v31  ;;  %v2428_v37 = vpack.c.bf16 %v2316_v31, %v2315_v6 }
 0x3ed   :  { %2362 = vst [vmem:[#allocation17 + $0xd0] sm:$0xff] %v2346_v36  ;;  %v2425_v42 = vpack.c.bf16 %v2346_v36, %v2345_v22  ;;  %v8438_v2 = vpack.c.bf16 %v1905_v57, %v1901_v38 }
 0x3ef   :  { %2506 = vmatpush1.bf16.msra.mxu1 %v2425_v42  ;;  %v8440_v52 = vpop.f32.mrb[172].mxu0  ;;  %v6746_v42 = vld [vmem:[#allocation5 + $0x30] ss:$12 sps:$4 sm:$0xff]  }
 0x3f0   :  { %v7071_v50 = vpop.eup %7070  ;;  %2507 = vmatprep.subr.bf16.mxu1 %v2428_v37  ;;  %v1910_v54 = vpop.f32.mrb[173].mxu0  ;;  %v6747_v37 = vld [vmem:[#allocation16 + $0x20] sm:$0xff]  }
 0x3f1   :  { %v2347_v33 = vmul.f32 %v7071_v50, %v7069_v46  ;;  %v1911_v34 = vadd.f32 %v1910_v54, %v8349_v30  ;;  %v8443_v5 = vpop.f32.mrb[174].mxu0  ;;  %v7073_v21 = vpop.eup %7072  ;;  %v6748_v46 = vld [vmem:[#allocation16 + $0x28] sm:$0xff]  }
 0x3f2   :  { %v1914_v15 = vpop.f32.mrb[175].mxu0 }
 0x3f3   :  { %2363 = vst [vmem:[#allocation17 + $0xe0] sm:$0xff] %v2347_v33  ;;  %v1915_v58 = vadd.f32 %v1914_v15, %v8349_v30 }
 0x3f5   :  { %v8446_v63 = vpack.c.bf16 %v1915_v58, %v1911_v34 }
 0x3f6   :  { %v7075_v11 = vpop.eup %7074 }
 0x3f7   :  { %v2348_v61 = vmul.f32 %v7075_v11, %v7073_v21  ;;  %v8448_v40 = vpop.f32.mrb[176].mxu0  ;;  %v6750_v21 = vld [vmem:[#allocation16 + $0x30] sm:$0xff]  }
 0x3f8   :  { %9167 = vst [vmem:[#allocation24_spill] sm:$0xff] %v8448_v40  ;;  %v1920_v12 = vpop.f32.mrb[177].mxu0  ;;  %v6749_v11 = vld [vmem:[#allocation5 + $0x48] ss:$12 sps:$4 sm:$0xff]  }
 0x3f9   :  { %2364 = vst [vmem:[#allocation17 + $0xf0] sm:$0xff] %v2348_v61  ;;  %v2427_v1 = vpack.c.bf16 %v2348_v61, %v2347_v33  ;;  %v1921_v17 = vadd.f32 %v1920_v12, %v8349_v30  ;;  %v8451_v6 = vpop.f32.mrb[178].mxu0  ;;  %v6769_v40 = vld [vmem:[#allocation14 + $0x48] ss:$12 sps:$4 sm:$0xff]  }
 0x3fa   :  { %9168 = vst [vmem:[#allocation25_spill] sm:$0xff] %v8451_v6  ;;  %v1924_v20 = vpop.f32.mrb[179].mxu0  ;;  %v6768_v6 = vld [vmem:[#allocation7 + $0x4c] ss:$12 sps:$4 sm:$0xff]  }
 0x3fb   :  { %2508 = vmatpush1.bf16.msra.mxu1 %v2427_v1  ;;  %v1925_v22 = vadd.f32 %v1924_v20, %v8349_v30  ;;  %v6752_v20 = vld [vmem:[#allocation5 + $0x60] ss:$12 sps:$4 sm:$0xff]  }
 0x3fc   :  { %6208 = vmatprep.subr.bf16.mxu1 %v6741_v62 }
 0x3fd   :  { %v8455_v26 = vpack.c.bf16 %v1925_v22, %v1921_v17 }
 0x3fe   :  { %2526 = vmatmul.mubr.bf16.vlgmr.msra.gmra.mrb[128].mxu1 %v6740_v3 }
 0x3ff   :  { %6209 = vmatpush3.bf16.msra.mxu1 %v6741_v62  ;;  %2535 = vmatprep.mubr.bf16.mxu1 %v9158_v0  ;;  %v8457_v27 = vpop.f32.mrb[180].mxu0  ;;  %v6751_v62 = vld [vmem:[#allocation16 + $0x38] sm:$0xff]  }
 0x400   :  { %6210 = vmatprep.subr.bf16.mxu1 %v6742_v14  ;;  %9169 = vst [vmem:[#allocation26_spill] sm:$0xff] %v8457_v27  ;;  %v1930_v28 = vpop.f32.mrb[181].mxu0  ;;  %v6776_v27 = vld [vmem:[#allocation7 + $0x7c] ss:$12 sps:$4 sm:$0xff]  }
 0x401   :  { %v1931_v45 = vadd.f32 %v1930_v28, %v8349_v30  ;;  %v8460_v31 = vpop.f32.mrb[182].mxu0 }
 0x402   :  { %9170 = vst [vmem:[#allocation27_spill] sm:$0xff] %v8460_v31  ;;  %v1934_v36 = vpop.f32.mrb[183].mxu0  ;;  %v6765_v31 = vld [vmem:[#allocation14 + $0x30] ss:$12 sps:$4 sm:$0xff]  }
 0x403   :  { %6211 = vmatpush3.bf16.msra.mxu1 %v6742_v14  ;;  %v1935_v8 = vadd.f32 %v1934_v36, %v8349_v30 }
 0x404   :  { %6212 = vmatprep.subr.bf16.mxu1 %v6744_v23 }
 0x405   :  { %v8464_v38 = vpack.c.bf16 %v1935_v8, %v1931_v45  ;;  %v6753_v8 = vld [vmem:[#allocation5 + $0x78] ss:$12 sps:$4 sm:$0xff]  }
 0x406   :  { %2536 = vmatmul.mubr.bf16.gmra.mrb[132].mxu1 %v6743_v25 }
 0x407   :  { %6213 = vmatpush3.bf16.msra.mxu1 %v6744_v23  ;;  %2545 = vmatprep.mubr.bf16.mxu1 %v9158_v0  ;;  %9171 = vst [vmem:[#allocation28_spill] sm:$0xff] %v8464_v38  ;;  %v8466_v18 = vpop.f32.mrb[184].mxu0 }
 0x408   :  { %6214 = vmatprep.subr.bf16.mxu1 %v6745_v9  ;;  %9172 = vst [vmem:[#allocation29_spill] sm:$0xff] %v8466_v18  ;;  %v1940_v57 = vpop.f32.mrb[185].mxu0  ;;  %v6767_v18 = vld [vmem:[#allocation14 + $0x34] ss:$12 sps:$4 sm:$0xff]  }
 0x409   :  { %v1941_v50 = vadd.f32 %v1940_v57, %v8349_v30  ;;  %v8469_v33 = vpop.f32.mrb[186].mxu0 }
 0x40a   :  { %9173 = vst [vmem:[#allocation30_spill] sm:$0xff] %v8469_v33  ;;  %v1944_v54 = vpop.f32.mrb[187].mxu0  ;;  %v6760_v33 = vld [vmem:[#allocation7 + $0x1c] ss:$12 sps:$4 sm:$0xff]  }
 0x40b   :  { %6215 = vmatpush3.bf16.msra.mxu1 %v6745_v9  ;;  %v1945_v34 = vadd.f32 %v1944_v54, %v8349_v30 }
 0x40c   :  { %6216 = vmatprep.subr.bf16.mxu1 %v6747_v37 }
 0x40d   :  { %v8473_v15 = vpack.c.bf16 %v1945_v34, %v1941_v50 }
 0x40e   :  { %2546 = vmatmul.mubr.bf16.gmra.mrb[136].mxu1 %v6746_v42 }
 0x40f   :  { %6217 = vmatpush3.bf16.msra.mxu1 %v6747_v37  ;;  %2555 = vmatprep.mubr.bf16.mxu1 %v9158_v0  ;;  %9174 = vst [vmem:[#allocation31_spill] sm:$0xff] %v8473_v15  ;;  %v8475_v58 = vpop.f32.mrb[188].mxu0 }
 0x410   :  { %6218 = vmatprep.subr.bf16.mxu1 %v6748_v46  ;;  %9175 = vst [vmem:[#allocation32_spill] sm:$0xff] %v8475_v58  ;;  %v1950_v61 = vpop.f32.mrb[189].mxu0  ;;  %v6761_v58 = vld [vmem:[#allocation14 + $0x18] ss:$12 sps:$4 sm:$0xff]  }
 0x411   :  { %v1951_v1 = vadd.f32 %v1950_v61, %v8349_v30  ;;  %v8478_v3 = vpop.f32.mrb[190].mxu0 }
 0x412   :  { %9176 = vst [vmem:[#allocation33_spill] sm:$0xff] %v8478_v3  ;;  %v1954_v12 = vpop.f32.mrb[191].mxu0  ;;  %v6757_v3 = vld [vmem:[#allocation14] ss:$12 sps:$4 sm:$0xff]  }
 0x413   :  { %6219 = vmatpush3.bf16.msra.mxu1 %v6748_v46  ;;  %v1955_v14 = vadd.f32 %v1954_v12, %v8349_v30 }
 0x414   :  { %6220 = vmatprep.subr.bf16.mxu1 %v6750_v21 }
 0x415   :  { %v8482_v17 = vpack.c.bf16 %v1955_v14, %v1951_v1 }
 0x416   :  { %2556 = vmatmul.mubr.bf16.gmra.mrb[140].mxu1 %v6749_v11 }
 0x417   :  { %6221 = vmatpush3.bf16.msra.mxu1 %v6750_v21  ;;  %2565 = vmatprep.mubr.bf16.mxu1 %v9158_v0  ;;  %9177 = vst [vmem:[#allocation34_spill] sm:$0xff] %v8482_v17  ;;  %v8484_v22 = vpop.f32.mrb[192].mxu0  ;;  %v6754_v21 = vld [vmem:[#allocation5 + $0x90] ss:$12 sps:$4 sm:$0xff]  }
 0x418   :  { %6222 = vmatprep.subr.bf16.mxu1 %v6751_v62  ;;  %9178 = vst [vmem:[#allocation35_spill] sm:$0xff] %v8484_v22  ;;  %v1960_v23 = vpop.f32.mrb[193].mxu0 }
 0x419   :  { %v1961_v25 = vadd.f32 %v1960_v23, %v8349_v30  ;;  %v8488_v28 = vpop.f32.mrb[194].mxu0  ;;  %v6755_v23 = vld [vmem:[#allocation5 + $0xa8] ss:$12 sps:$4 sm:$0xff]  }
 0x41a   :  { %9179 = vst [vmem:[#allocation36_spill] sm:$0xff] %v8488_v28  ;;  %v1964_v9 = vpop.f32.mrb[195].mxu0 }
 0x41b   :  { %6223 = vmatpush3.bf16.msra.mxu1 %v6751_v62  ;;  %v1965_v45 = vadd.f32 %v1964_v9, %v8349_v30 }
 0x41c   :  { %6240 = vmatprep.subr.bf16.mxu1 %v8369_v4 }
 0x41d   :  { %v8492_v36 = vpack.c.bf16 %v1965_v45, %v1961_v25 }
 0x41e   :  { %2566 = vmatmul.mubr.bf16.gmra.mrb[144].mxu1 %v6752_v20 }
 0x41f   :  { %2575 = vmatprep.mubr.bf16.mxu1 %v9158_v0  ;;  %9180 = vst [vmem:[#allocation37_spill] sm:$0xff] %v8492_v36  ;;  %v8494_v37 = vpop.f32.mrb[196].mxu0 }
 0x420   :  { %9181 = vst [vmem:[#allocation38_spill] sm:$0xff] %v8494_v37  ;;  %v1970_v42 = vpop.f32.mrb[197].mxu0 }
 0x421   :  { %v1971_v57 = vadd.f32 %v1970_v42, %v8349_v30  ;;  %v8497_v46 = vpop.f32.mrb[198].mxu0 }
 0x422   :  { %9182 = vst [vmem:[#allocation39_spill] sm:$0xff] %v8497_v46  ;;  %v1974_v50 = vpop.f32.mrb[199].mxu0 }
 0x423   :  { %v1975_v54 = vadd.f32 %v1974_v50, %v8349_v30 }
 0x425   :  { %v8501_v34 = vpack.c.bf16 %v1975_v54, %v1971_v57 }
 0x426   :  { %2576 = vmatmul.mubr.bf16.gmra.mrb[148].mxu1 %v6753_v8 }
 0x427   :  { %2585 = vmatprep.mubr.bf16.mxu1 %v9158_v0  ;;  %9183 = vst [vmem:[#allocation40_spill] sm:$0xff] %v8501_v34  ;;  %v8503_v11 = vpop.f32.mrb[200].mxu0 }
 0x428   :  { %9184 = vst [vmem:[#allocation41_spill] sm:$0xff] %v8503_v11  ;;  %v1980_v61 = vpop.f32.mrb[201].mxu0 }
 0x429   :  { %v1981_v62 = vadd.f32 %v1980_v61, %v8349_v30  ;;  %v8506_v1 = vpop.f32.mrb[202].mxu0 }
 0x42a   :  { %9185 = vst [vmem:[#allocation42_spill] sm:$0xff] %v8506_v1  ;;  %v1984_v12 = vpop.f32.mrb[203].mxu0 }
 0x42b   :  { %v1985_v14 = vadd.f32 %v1984_v12, %v8349_v30 }
 0x42d   :  { %v8510_v20 = vpack.c.bf16 %v1985_v14, %v1981_v62 }
 0x42e   :  { %2586 = vmatmul.mubr.bf16.gmra.mrb[152].mxu1 %v6754_v21 }
 0x42f   :  { %2595 = vmatprep.mubr.bf16.mxu1 %v9158_v0  ;;  %9186 = vst [vmem:[#allocation43_spill] sm:$0xff] %v8510_v20  ;;  %v8512_v25 = vpop.f32.mrb[204].mxu0 }
 0x430   :  { %9187 = vst [vmem:[#allocation44_spill] sm:$0xff] %v8512_v25  ;;  %v1990_v9 = vpop.f32.mrb[205].mxu0 }
 0x431   :  { %v1991_v45 = vadd.f32 %v1990_v9, %v8349_v30  ;;  %v8515_v8 = vpop.f32.mrb[206].mxu0 }
 0x432   :  { %9188 = vst [vmem:[#allocation45_spill] sm:$0xff] %v8515_v8  ;;  %v1994_v42 = vpop.f32.mrb[207].mxu0 }
 0x433   :  { %v1995_v57 = vadd.f32 %v1994_v42, %v8349_v30 }
 0x435   :  { %v8518_v50 = vpack.c.bf16 %v1995_v57, %v1991_v45 }
 0x436   :  { %2596 = vmatmul.mubr.bf16.gmra.mrb[156].mxu1 %v6755_v23 }
 0x437   :  { %9189 = vst [vmem:[#allocation46_spill] sm:$0xff] %v8518_v50 }
 0x4d1   :  { %v2527_v54 = vpop.f32.mrb[128].mxu1 }
 0x4d2   :  { %v8520_v21 = vpop.f32.mrb[129].mxu1 }
 0x4d3   :  { %v2531_v61 = vpop.f32.mrb[130].mxu1 }
 0x4d4   :  { %v8522_v62 = vpack.c.bf16 %v2531_v61, %v2527_v54  ;;  %v8524_v12 = vpop.f32.mrb[131].mxu1 }
 0x4d6   :  { %6224 = vmatprep.mubr.bf16.mxu1 %v8522_v62 }
 0x4d9   :  { %v2537_v14 = vpop.f32.mrb[132].mxu1 }
 0x4da   :  { %v8527_v9 = vpop.f32.mrb[133].mxu1 }
 0x4db   :  { %v2541_v0 = vpop.f32.mrb[134].mxu1 }
 0x4dc   :  { %v8529_v1 = vpack.c.bf16 %v2541_v0, %v2537_v14  ;;  %v8531_v23 = vpop.f32.mrb[135].mxu1 }
 0x4de   :  { %6225 = vmatmul.mubr.bf16.vlgmr.msra.gmra.mrb[160].mxu1 %v8529_v1 }
 0x4df   :  { %6241 = vmatpush3.bf16.msra.mxu1 %v8369_v4 }
 0x4e0   :  { %6242 = vmatprep.subr.bf16.mxu1 %v8386_v41 }
 0x4e1   :  { %v2547_v30 = vpop.f32.mrb[136].mxu1 }
 0x4e2   :  { %v8536_v45 = vpop.f32.mrb[137].mxu1 }
 0x4e3   :  { %6243 = vmatpush3.bf16.msra.mxu1 %v8386_v41  ;;  %v2551_v42 = vpop.f32.mrb[138].mxu1 }
 0x4e4   :  { %v8539_v57 = vpack.c.bf16 %v2551_v42, %v2547_v30  ;;  %6244 = vmatprep.subr.bf16.mxu1 %v8402_v7  ;;  %v8542_v0 = vpop.f32.mrb[139].mxu1 }
 0x4e6   :  { %6228 = vmatprep.mubr.bf16.mxu1 %v8539_v57 }
 0x4e7   :  { %6245 = vmatpush3.bf16.msra.mxu1 %v8402_v7 }
 0x4e8   :  { %6246 = vmatprep.subr.bf16.mxu1 %v8412_v39 }
 0x4e9   :  { %v2557_v4 = vpop.f32.mrb[140].mxu1 }
 0x4ea   :  { %v8547_v54 = vpop.f32.mrb[141].mxu1 }
 0x4eb   :  { %6247 = vmatpush3.bf16.msra.mxu1 %v8412_v39  ;;  %v2561_v61 = vpop.f32.mrb[142].mxu1 }
 0x4ec   :  { %v8550_v41 = vpack.c.bf16 %v2561_v61, %v2557_v4  ;;  %6248 = vmatprep.subr.bf16.mxu1 %v8422_v49  ;;  %v8553_v14 = vpop.f32.mrb[143].mxu1 }
 0x4ee   :  { %6229 = vmatmul.mubr.bf16.gmra.mrb[164].mxu1 %v8550_v41 }
 0x4ef   :  { %6249 = vmatpush3.bf16.msra.mxu1 %v8422_v49  ;;  %v6759_v49 = vld [vmem:[#allocation14 + $0x4] ss:$12 sps:$4 sm:$0xff]  }
 0x4f0   :  { %6250 = vmatprep.subr.bf16.mxu1 %v8430_v29 }
 0x4f1   :  { %v2567_v7 = vpop.f32.mrb[144].mxu1 }
 0x4f2   :  { %v8558_v30 = vpop.f32.mrb[145].mxu1 }
 0x4f3   :  { %6251 = vmatpush3.bf16.msra.mxu1 %v8430_v29  ;;  %v2571_v42 = vpop.f32.mrb[146].mxu1 }
 0x4f4   :  { %v8561_v39 = vpack.c.bf16 %v2571_v42, %v2567_v7  ;;  %6252 = vmatprep.subr.bf16.mxu1 %v8438_v2  ;;  %v8564_v4 = vpop.f32.mrb[147].mxu1 }
 0x4f6   :  { %6232 = vmatprep.mubr.bf16.mxu1 %v8561_v39 }
 0x4f7   :  { %6253 = vmatpush3.bf16.msra.mxu1 %v8438_v2 }
 0x4f8   :  { %6254 = vmatprep.subr.bf16.mxu1 %v8446_v63 }
 0x4f9   :  { %v2577_v61 = vpop.f32.mrb[148].mxu1 }
 0x4fa   :  { %v8569_v8 = vpop.f32.mrb[149].mxu1 }
 0x4fb   :  { %6255 = vmatpush3.bf16.msra.mxu1 %v8446_v63  ;;  %v2581_v29 = vpop.f32.mrb[150].mxu1 }
 0x4fc   :  { %v8572_v25 = vpack.c.bf16 %v2581_v29, %v2577_v61  ;;  %v8574_v7 = vpop.f32.mrb[151].mxu1  ;;  %3409 = vmatprep.subr.bf16.mxu1 %v6759_v49  ;;  %v6756_v29 = vld [vmem:[#allocation7 + $0x4] ss:$12 sps:$4 sm:$0xff]  }
 0x4fe   :  { %6233 = vmatmul.mubr.bf16.gmra.mrb[168].mxu1 %v8572_v25 }
 0x501   :  { %v2587_v42 = vpop.f32.mrb[152].mxu1 }
 0x502   :  { %v8577_v11 = vpop.f32.mrb[153].mxu1 }
 0x503   :  { %v2591_v2 = vpop.f32.mrb[154].mxu1 }
 0x504   :  { %v8579_v28 = vpack.c.bf16 %v2591_v2, %v2587_v42  ;;  %v8581_v46 = vpop.f32.mrb[155].mxu1  ;;  %v6764_v42 = vld [vmem:[#allocation7 + $0x34] ss:$12 sps:$4 sm:$0xff]   ;;  %v6763_v2 = vld [vmem:[#allocation14 + $0x1c] ss:$12 sps:$4 sm:$0xff]  }
 0x506   :  { %6236 = vmatprep.mubr.bf16.mxu1 %v8579_v28 }
 0x509   :  { %v2597_v22 = vpop.f32.mrb[156].mxu1 }
 0x50a   :  { %v8584_v63 = vpop.f32.mrb[157].mxu1 }
 0x50b   :  { %v2601_v61 = vpop.f32.mrb[158].mxu1 }
 0x50c   :  { %v8586_v37 = vpack.c.bf16 %v2601_v61, %v2597_v22  ;;  %v8588_v49 = vpop.f32.mrb[159].mxu1  ;;  %v6772_v22 = vld [vmem:[#allocation7 + $0x64] ss:$12 sps:$4 sm:$0xff]   ;;  %v6771_v61 = vld [vmem:[#allocation14 + $0x4c] ss:$12 sps:$4 sm:$0xff]  }
 0x50e   :  { %6237 = vmatmul.mubr.bf16.gmra.mrb[172].mxu1 %v8586_v37 }
 0x50f   :  { %6256 = vmatprep.mubr.bf16.mxu1 %v6756_v29  ;;  %v6775_v29 = vld [vmem:[#allocation14 + $0x64] ss:$12 sps:$4 sm:$0xff]  }
 0x516   :  { %6257 = vmatmul.mubr.bf16.vlgmr.msra.gmra.mrb[160].mxu1 %v6760_v33  ;;  %v6773_v33 = vld [vmem:[#allocation14 + $0x60] ss:$12 sps:$4 sm:$0xff]  }
 0x517   :  { %3410 = vmatpush1.bf16.msra.mxu1 %v6757_v3  ;;  %6260 = vmatprep.mubr.bf16.mxu1 %v6764_v42  ;;  %v6780_v3 = vld [vmem:[#allocation7 + $0x94] ss:$12 sps:$4 sm:$0xff]   ;;  %v6779_v42 = vld [vmem:[#allocation14 + $0x7c] ss:$12 sps:$4 sm:$0xff]  }
 0x518   :  { %3411 = vmatprep.subr.bf16.mxu1 %v6763_v2  ;;  %v6777_v2 = vld [vmem:[#allocation14 + $0x78] ss:$12 sps:$4 sm:$0xff]  }
 0x51b   :  { %3412 = vmatpush1.bf16.msra.mxu1 %v6761_v58  ;;  %v6783_v58 = vld [vmem:[#allocation14 + $0x94] ss:$12 sps:$4 sm:$0xff]  }
 0x51c   :  { %3413 = vmatprep.subr.bf16.mxu1 %v6767_v18  ;;  %v6784_v18 = vld [vmem:[#allocation7 + $0xac] ss:$12 sps:$4 sm:$0xff]  }
 0x51e   :  { %6261 = vmatmul.mubr.bf16.gmra.mrb[164].mxu1 %v6768_v6  ;;  %v6781_v6 = vld [vmem:[#allocation14 + $0x90] ss:$12 sps:$4 sm:$0xff]  }
 0x51f   :  { %3414 = vmatpush1.bf16.msra.mxu1 %v6765_v31  ;;  %6264 = vmatprep.mubr.bf16.mxu1 %v6772_v22  ;;  %v6787_v31 = vld [vmem:[#allocation14 + $0xac] ss:$12 sps:$4 sm:$0xff]   ;;  %v6785_v22 = vld [vmem:[#allocation14 + $0xa8] ss:$12 sps:$4 sm:$0xff]  }
 0x520   :  { %3415 = vmatprep.subr.bf16.mxu1 %v6771_v61  ;;  %v3974_v61 = vld [vmem:[#allocation17 + $0x18] sm:$0xff] }
 0x523   :  { %3416 = vmatpush1.bf16.msra.mxu1 %v6769_v40  ;;  %v9190_v40 = vmov 0  }
 0x524   :  { %3417 = vmatprep.subr.bf16.mxu1 %v6775_v29  ;;  %v3972_v29 = vld [vmem:[#allocation17 + $0x8] sm:$0xff] }
 0x525   :  { %v4036_v50 = vpack.c.bf16 %v3974_v61, %v3972_v29 }
 0x526   :  { %6265 = vmatmul.mubr.bf16.gmra.mrb[168].mxu1 %v6776_v27 }
 0x527   :  { %3418 = vmatpush1.bf16.msra.mxu1 %v6773_v33  ;;  %6268 = vmatprep.mubr.bf16.mxu1 %v6780_v3 }
 0x528   :  { %3419 = vmatprep.subr.bf16.mxu1 %v6779_v42 }
 0x52b   :  { %3420 = vmatpush1.bf16.msra.mxu1 %v6777_v2 }
 0x52c   :  { %3421 = vmatprep.subr.bf16.mxu1 %v6783_v58 }
 0x52e   :  { %6269 = vmatmul.mubr.bf16.gmra.mrb[172].mxu1 %v6784_v18 }
 0x52f   :  { %3422 = vmatpush1.bf16.msra.mxu1 %v6781_v6  ;;  %3441 = vmatprep.mubr.bf16.mxu1 %v9190_v40 }
 0x530   :  { %3423 = vmatprep.subr.bf16.mxu1 %v6787_v31 }
 0x533   :  { %3424 = vmatpush1.bf16.msra.mxu1 %v6785_v22 }
 0x534   :  { %4163 = vmatprep.subr.bf16.mxu1 %v4036_v50 }
 0x5e9   :  { %v6258_v27 = vpop.f32.mrb[160].mxu1 }
 0x5ea   :  { %v5826_v33 = vmul.f32 -1.442695, %v6258_v27  ;;  %v2881_v3 = vpop.f32.mrb[161].mxu1 }
 0x5eb   :  { %v5824_v42 = vmul.f32 -1.442695, %v2881_v3  ;;  %v6259_v20 = vpop.f32.mrb[162].mxu1 }
 0x5ec   :  { %7076 = vpow2.f32 %v5826_v33  ;;  %v5827_v2 = vmul.f32 -1.442695, %v6259_v20  ;;  %v2884_v58 = vpop.f32.mrb[163].mxu1 }
 0x5ed   :  { %7078 = vpow2.f32 %v5824_v42  ;;  %v5825_v18 = vmul.f32 -1.442695, %v2884_v58 }
 0x5ee   :  { %7080 = vpow2.f32 %v5827_v2 }
 0x5ef   :  { %7082 = vpow2.f32 %v5825_v18 }
 0x5f1   :  { %v6262_v6 = vpop.f32.mrb[164].mxu1 }
 0x5f2   :  { %v5830_v34 = vmul.f32 -1.442695, %v6262_v6  ;;  %v2897_v36 = vpop.f32.mrb[165].mxu1 }
 0x5f3   :  { %v5828_v31 = vmul.f32 -1.442695, %v2897_v36  ;;  %v6263_v17 = vpop.f32.mrb[166].mxu1 }
 0x5f4   :  { %7084 = vpow2.f32 %v5830_v34  ;;  %v5831_v22 = vmul.f32 -1.442695, %v6263_v17  ;;  %v2900_v50 = vpop.f32.mrb[167].mxu1 }
 0x5f5   :  { %7086 = vpow2.f32 %v5828_v31  ;;  %v5829_v61 = vmul.f32 -1.442695, %v2900_v50 }
 0x5f6   :  { %v7077_v29 = vpop.eup %7076  ;;  %7088 = vpow2.f32 %v5831_v22 }
 0x5f7   :  { %v7079_v27 = vpop.eup %7078  ;;  %v2994_v33 = vadd.f32 1.0, %v7077_v29  ;;  %7090 = vpow2.f32 %v5829_v61 }
 0x5f8   :  { %v7081_v20 = vpop.eup %7080  ;;  %v2992_v3 = vadd.f32 1.0, %v7079_v27 }
 0x5f9   :  { %v7083_v42 = vpop.eup %7082  ;;  %7092 = vrcp.f32 %v2994_v33  ;;  %v2995_v2 = vadd.f32 1.0, %v7081_v20  ;;  %v6266_v58 = vpop.f32.mrb[168].mxu1 }
 0x5fa   :  { %7094 = vrcp.f32 %v2992_v3  ;;  %v2993_v18 = vadd.f32 1.0, %v7083_v42  ;;  %v5834_v36 = vmul.f32 -1.442695, %v6266_v58  ;;  %v2913_v6 = vpop.f32.mrb[169].mxu1 }
 0x5fb   :  { %7096 = vrcp.f32 %v2995_v2  ;;  %v5832_v17 = vmul.f32 -1.442695, %v2913_v6  ;;  %v6267_v34 = vpop.f32.mrb[170].mxu1 }
 0x5fc   :  { %7098 = vrcp.f32 %v2993_v18  ;;  %v5835_v31 = vmul.f32 -1.442695, %v6267_v34  ;;  %v2916_v50 = vpop.f32.mrb[171].mxu1 }
 0x5fd   :  { %7100 = vpow2.f32 %v5834_v36  ;;  %v5833_v22 = vmul.f32 -1.442695, %v2916_v50 }
 0x5fe   :  { %v7085_v29 = vpop.eup %7084  ;;  %7102 = vpow2.f32 %v5832_v17 }
 0x5ff   :  { %v7087_v61 = vpop.eup %7086  ;;  %v2998_v27 = vadd.f32 1.0, %v7085_v29  ;;  %7104 = vpow2.f32 %v5835_v31 }
 0x600   :  { %v7089_v33 = vpop.eup %7088  ;;  %v2996_v20 = vadd.f32 1.0, %v7087_v61  ;;  %7106 = vpow2.f32 %v5833_v22 }
 0x601   :  { %v7091_v3 = vpop.eup %7090  ;;  %7108 = vrcp.f32 %v2998_v27  ;;  %v2999_v42 = vadd.f32 1.0, %v7089_v33  ;;  %v6270_v58 = vpop.f32.mrb[172].mxu1 }
 0x602   :  { %7110 = vrcp.f32 %v2996_v20  ;;  %v2997_v2 = vadd.f32 1.0, %v7091_v3  ;;  %v5838_v6 = vmul.f32 -1.442695, %v6270_v58  ;;  %v2929_v18 = vpop.f32.mrb[173].mxu1 }
 0x603   :  { %v7093_v34 = vpop.eup %7092  ;;  %7112 = vrcp.f32 %v2999_v42  ;;  %v5836_v36 = vmul.f32 -1.442695, %v2929_v18  ;;  %v6271_v50 = vpop.f32.mrb[174].mxu1 }
 0x604   :  { %v7095_v15 = vpop.eup %7094  ;;  %7114 = vrcp.f32 %v2997_v2  ;;  %v5839_v17 = vmul.f32 -1.442695, %v6271_v50  ;;  %v2932_v29 = vpop.f32.mrb[175].mxu1  ;;  %v3058_v31 = vmul.f32 %v7093_v34, %v8527_v9 }
 0x605   :  { %v7097_v61 = vpop.eup %7096  ;;  %7116 = vpow2.f32 %v5838_v6  ;;  %v5837_v22 = vmul.f32 -1.442695, %v2932_v29  ;;  %v3056_v27 = vmul.f32 %v7095_v15, %v8520_v21 }
 0x606   :  { %v7099_v33 = vpop.eup %7098  ;;  %7118 = vpow2.f32 %v5836_v36  ;;  %v3059_v20 = vmul.f32 %v7097_v61, %v8531_v23 }
 0x607   :  { %v7101_v3 = vpop.eup %7100  ;;  %7120 = vpow2.f32 %v5839_v17  ;;  %v3057_v42 = vmul.f32 %v7099_v33, %v8524_v12 }
 0x608   :  { %v7103_v58 = vpop.eup %7102  ;;  %v3002_v18 = vadd.f32 1.0, %v7101_v3  ;;  %7122 = vpow2.f32 %v5837_v22  ;;  %v3073_v2 = vpack.c.bf16 %v3059_v20, %v3058_v31 }
 0x609   :  { %v7105_v50 = vpop.eup %7104  ;;  %v3000_v38 = vadd.f32 1.0, %v7103_v58  ;;  %v3072_v9 = vpack.c.bf16 %v3057_v42, %v3056_v27 }
 0x60a   :  { %v7107_v34 = vpop.eup %7106  ;;  %7124 = vrcp.f32 %v3002_v18  ;;  %v3003_v6 = vadd.f32 1.0, %v7105_v50 }
 0x60b   :  { %v7109_v29 = vpop.eup %7108  ;;  %7126 = vrcp.f32 %v3000_v38  ;;  %v3001_v15 = vadd.f32 1.0, %v7107_v34  ;;  %3128 = vmatprep.subr.bf16.mxu0 %v3072_v9 }
 0x60c   :  { %v7111_v21 = vpop.eup %7110  ;;  %7128 = vrcp.f32 %v3003_v6  ;;  %3129 = vmatpush1.bf16.msra.mxu0 %v8522_v62  ;;  %v3062_v12 = vmul.f32 %v7109_v29, %v8547_v54 }
 0x60d   :  { %v7113_v23 = vpop.eup %7112  ;;  %7130 = vrcp.f32 %v3001_v15  ;;  %3130 = vmatprep.subr.bf16.mxu0 %v3073_v2  ;;  %v3060_v36 = vmul.f32 %v7111_v21, %v8536_v45 }
 0x60e   :  { %v7115_v17 = vpop.eup %7114  ;;  %v3063_v31 = vmul.f32 %v7113_v23, %v8553_v14  ;;  %v6788_v23 = vld [vmem:[#allocation8 + $0x80] ss:$8 sps:$4 sm:$0xff]  }
 0x60f   :  { %v7117_v61 = vpop.eup %7116  ;;  %v3061_v22 = vmul.f32 %v7115_v17, %v8542_v0  ;;  %v6793_v17 = vld [vmem:[#allocation8 + $0xd0] ss:$8 sps:$4 sm:$0xff]  }
 0x610   :  { %v7119_v38 = vpop.eup %7118  ;;  %v3006_v27 = vadd.f32 1.0, %v7117_v61  ;;  %3131 = vmatpush1.bf16.msra.mxu0 %v8529_v1  ;;  %v3075_v33 = vpack.c.bf16 %v3063_v31, %v3062_v12  ;;  %v6794_v31 = vld [vmem:[#allocation8 + $0xe0] ss:$8 sps:$4 sm:$0xff]   ;;  %v6795_v61 = vld [vmem:[#allocation8 + $0xf0] ss:$8 sps:$4 sm:$0xff]  }
 0x611   :  { %v7121_v20 = vpop.eup %7120  ;;  %v3004_v62 = vadd.f32 1.0, %v7119_v38  ;;  %v3074_v3 = vpack.c.bf16 %v3061_v22, %v3060_v36  ;;  %v6792_v36 = vld [vmem:[#allocation8 + $0xc0] ss:$8 sps:$4 sm:$0xff]   ;;  %v6802_v38 = vld [vmem:[#allocation14 + $0x98] ss:$12 sps:$4 sm:$0xff]  }
 0x612   :  { %v7123_v54 = vpop.eup %7122  ;;  %7132 = vrcp.f32 %v3006_v27  ;;  %v3007_v42 = vadd.f32 1.0, %v7121_v20  ;;  %v6801_v22 = vld [vmem:[#allocation14 + $0x80] ss:$12 sps:$4 sm:$0xff]   ;;  %v6803_v27 = vld [vmem:[#allocation14 + $0xb0] ss:$12 sps:$4 sm:$0xff]  }
 0x613   :  { %7134 = vrcp.f32 %v3004_v62  ;;  %v3005_v58 = vadd.f32 1.0, %v7123_v54  ;;  %3132 = vmatprep.subr.bf16.mxu0 %v3074_v3  ;;  %v3973_v3 = vld [vmem:[#allocation17 + $0x10] sm:$0xff] }
 0x614   :  { %v7125_v45 = vpop.eup %7124  ;;  %7136 = vrcp.f32 %v3007_v42  ;;  %3133 = vmatpush1.bf16.msra.mxu0 %v8539_v57  ;;  %v3978_v42 = vld [vmem:[#allocation17 + $0x38] sm:$0xff] }
 0x615   :  { %v7127_v14 = vpop.eup %7126  ;;  %7138 = vrcp.f32 %v3005_v58  ;;  %3134 = vmatprep.subr.bf16.mxu0 %v3075_v33  ;;  %v3066_v0 = vmul.f32 %v7125_v45, %v8569_v8  ;;  %v6804_v33 = vld [vmem:[#allocation16] sm:$0xff]  }
 0x616   :  { %v7129_v1 = vpop.eup %7128  ;;  %v3064_v18 = vmul.f32 %v7127_v14, %v8558_v30  ;;  %v3971_v45 = vld [vmem:[#allocation17] sm:$0xff] }
 0x617   :  { %v7131_v2 = vpop.eup %7130  ;;  %v3067_v50 = vmul.f32 %v7129_v1, %v8574_v7  ;;  %v3976_v1 = vld [vmem:[#allocation17 + $0x28] sm:$0xff] }
 0x618   :  { %3135 = vmatpush1.bf16.msra.mxu0 %v8550_v41  ;;  %v3065_v9 = vmul.f32 %v7131_v2, %v8564_v4  ;;  %v3977_v2 = vld [vmem:[#allocation17 + $0x30] sm:$0xff] }
 0x619   :  { %v3077_v34 = vpack.c.bf16 %v3067_v50, %v3066_v0  ;;  %v4035_v0 = vpack.c.bf16 %v3973_v3, %v3971_v45  ;;  %v3982_v50 = vld [vmem:[#allocation17 + $0x58] sm:$0xff]  ;;  %v3993_v45 = vld [vmem:[#allocation17 + $0xb0] sm:$0xff] }
 0x61a   :  { %v3076_v6 = vpack.c.bf16 %v3065_v9, %v3064_v18  ;;  %v4038_v18 = vpack.c.bf16 %v3978_v42, %v3976_v1  ;;  %v3975_v9 = vld [vmem:[#allocation17 + $0x20] sm:$0xff]  ;;  %v6807_v3 = vld [vmem:[#allocation16 + $0x18] sm:$0xff]   ;;  %v3992_v42 = vld [vmem:[#allocation17 + $0xa8] sm:$0xff] }
 0x61b   :  { %v3991_v1 = vld [vmem:[#allocation17 + $0xa0] sm:$0xff] }
 0x61c   :  { %v7133_v29 = vpop.eup %7132  ;;  %3136 = vmatprep.subr.bf16.mxu0 %v3076_v6  ;;  %v4037_v6 = vpack.c.bf16 %v3977_v2, %v3975_v9  ;;  %v3996_v9 = vld [vmem:[#allocation17 + $0xc8] sm:$0xff] }
 0x61d   :  { %v7135_v57 = vpop.eup %7134  ;;  %3137 = vmatpush1.bf16.msra.mxu0 %v8561_v39  ;;  %v3070_v15 = vmul.f32 %v7133_v29, %v8584_v63  ;;  %v6796_v39 = vld [vmem:[#allocation14 + $0x8] ss:$12 sps:$4 sm:$0xff]   ;;  %v6797_v63 = vld [vmem:[#allocation14 + $0x20] ss:$12 sps:$4 sm:$0xff]  }
 0x61e   :  { %v7137_v8 = vpop.eup %7136  ;;  %3138 = vmatprep.subr.bf16.mxu0 %v3077_v34  ;;  %v3068_v30 = vmul.f32 %v7135_v57, %v8577_v11  ;;  %v6789_v11 = vld [vmem:[#allocation8 + $0x90] ss:$8 sps:$4 sm:$0xff]   ;;  %v3980_v29 = vld [vmem:[#allocation17 + $0x48] sm:$0xff] }
 0x61f   :  { %v7139_v21 = vpop.eup %7138  ;;  %v3071_v7 = vmul.f32 %v7137_v8, %v8588_v49  ;;  %v6790_v49 = vld [vmem:[#allocation8 + $0xa0] ss:$8 sps:$4 sm:$0xff]   ;;  %v3981_v8 = vld [vmem:[#allocation17 + $0x50] sm:$0xff] }
 0x620   :  { %v3069_v41 = vmul.f32 %v7139_v21, %v8581_v46  ;;  %v6798_v46 = vld [vmem:[#allocation14 + $0x38] ss:$12 sps:$4 sm:$0xff]  }
 0x621   :  { %3139 = vmatpush1.bf16.msra.mxu0 %v8572_v25  ;;  %v3079_v4 = vpack.c.bf16 %v3071_v7, %v3070_v15  ;;  %v6799_v25 = vld [vmem:[#allocation14 + $0x50] ss:$12 sps:$4 sm:$0xff]   ;;  %v4040_v15 = vpack.c.bf16 %v3982_v50, %v3980_v29  ;;  %v4045_v50 = vpack.c.bf16 %v3993_v45, %v3991_v1 }
 0x622   :  { %v3078_v12 = vpack.c.bf16 %v3069_v41, %v3068_v30  ;;  %v3986_v21 = vld [vmem:[#allocation17 + $0x78] sm:$0xff]  ;;  %v3979_v41 = vld [vmem:[#allocation17 + $0x40] sm:$0xff]  ;;  %v3997_v29 = vld [vmem:[#allocation17 + $0xd0] sm:$0xff] }
 0x624   :  { %3140 = vmatprep.subr.bf16.mxu0 %v3078_v12  ;;  %v6805_v12 = vld [vmem:[#allocation16 + $0x8] sm:$0xff]  }
 0x625   :  { %3141 = vmatpush1.bf16.msra.mxu0 %v8579_v28  ;;  %v6800_v28 = vld [vmem:[#allocation14 + $0x68] ss:$12 sps:$4 sm:$0xff]  }
 0x626   :  { %3142 = vmatprep.subr.bf16.mxu0 %v3079_v4 }
 0x629   :  { %3143 = vmatpush1.bf16.msra.mxu0 %v8586_v37  ;;  %v6791_v37 = vld [vmem:[#allocation8 + $0xb0] ss:$8 sps:$4 sm:$0xff]  }
 0x62a   :  { %6272 = vmatprep.subr.bf16.mxu0 %v6796_v39 }
 0x62c   :  { %3161 = vmatmul.mubr.bf16.vlgmr.msra.gmra.mrb[208].mxu0 %v6788_v23  ;;  %v3984_v23 = vld [vmem:[#allocation17 + $0x68] sm:$0xff] }
 0x62d   :  { %3170 = vmatprep.mubr.bf16.mxu0 %v9190_v40  ;;  %6273 = vmatpush3.bf16.msra.mxu0 %v6796_v39  ;;  %v4039_v39 = vpack.c.bf16 %v3981_v8, %v3979_v41  ;;  %v4002_v8 = vld [vmem:[#allocation17 + $0xf8] sm:$0xff]  ;;  %v6809_v41 = vld [vmem:[#allocation16 + $0x28] sm:$0xff]  }
 0x62e   :  { %6274 = vmatprep.subr.bf16.mxu0 %v6797_v63 }
 0x631   :  { %6275 = vmatpush3.bf16.msra.mxu0 %v6797_v63  ;;  %v4042_v63 = vpack.c.bf16 %v3986_v21, %v3984_v23  ;;  %v3995_v21 = vld [vmem:[#allocation17 + $0xc0] sm:$0xff] }
 0x632   :  { %6276 = vmatprep.subr.bf16.mxu0 %v6798_v46 }
 0x634   :  { %3171 = vmatmul.mubr.bf16.gmra.mrb[212].mxu0 %v6789_v11  ;;  %v3990_v11 = vld [vmem:[#allocation17 + $0x98] sm:$0xff] }
 0x635   :  { %3180 = vmatprep.mubr.bf16.mxu0 %v9190_v40  ;;  %6277 = vmatpush3.bf16.msra.mxu0 %v6798_v46  ;;  %v3985_v46 = vld [vmem:[#allocation17 + $0x70] sm:$0xff] }
 0x636   :  { %6278 = vmatprep.subr.bf16.mxu0 %v6799_v25 }
 0x639   :  { %6279 = vmatpush3.bf16.msra.mxu0 %v6799_v25  ;;  %v3983_v25 = vld [vmem:[#allocation17 + $0x60] sm:$0xff] }
 0x63a   :  { %6280 = vmatprep.subr.bf16.mxu0 %v6800_v28 }
 0x63c   :  { %3181 = vmatmul.mubr.bf16.gmra.mrb[216].mxu0 %v6790_v49 }
 0x63d   :  { %3190 = vmatprep.mubr.bf16.mxu0 %v9190_v40  ;;  %6281 = vmatpush3.bf16.msra.mxu0 %v6800_v28  ;;  %v6806_v28 = vld [vmem:[#allocation16 + $0x10] sm:$0xff]  }
 0x63e   :  { %6282 = vmatprep.subr.bf16.mxu0 %v6801_v22 }
 0x641   :  { %6283 = vmatpush3.bf16.msra.mxu0 %v6801_v22 }
 0x642   :  { %6284 = vmatprep.subr.bf16.mxu0 %v6802_v38 }
 0x644   :  { %3191 = vmatmul.mubr.bf16.gmra.mrb[220].mxu0 %v6791_v37  ;;  %v4041_v37 = vpack.c.bf16 %v3985_v46, %v3983_v25  ;;  %v3999_v46 = vld [vmem:[#allocation17 + $0xe0] sm:$0xff] }
 0x645   :  { %3200 = vmatprep.mubr.bf16.mxu0 %v9190_v40  ;;  %6285 = vmatpush3.bf16.msra.mxu0 %v6802_v38  ;;  %v3994_v38 = vld [vmem:[#allocation17 + $0xb8] sm:$0xff] }
 0x646   :  { %6286 = vmatprep.subr.bf16.mxu0 %v6803_v27 }
 0x649   :  { %6287 = vmatpush3.bf16.msra.mxu0 %v6803_v27 }
 0x64a   :  { %6304 = vmatprep.subr.bf16.mxu0 %v6804_v33 }
 0x64c   :  { %3201 = vmatmul.mubr.bf16.gmra.mrb[224].mxu0 %v6792_v36  ;;  %v3988_v36 = vld [vmem:[#allocation17 + $0x88] sm:$0xff] }
 0x64d   :  { %3210 = vmatprep.mubr.bf16.mxu0 %v9190_v40 }
 0x654   :  { %3211 = vmatmul.mubr.bf16.gmra.mrb[228].mxu0 %v6793_v17 }
 0x655   :  { %3220 = vmatprep.mubr.bf16.mxu0 %v9190_v40 }
 0x65c   :  { %3221 = vmatmul.mubr.bf16.gmra.mrb[232].mxu0 %v6794_v31  ;;  %v4044_v31 = vpack.c.bf16 %v3990_v11, %v3988_v36  ;;  %v6810_v11 = vld [vmem:[#allocation16 + $0x30] sm:$0xff]  }
 0x65d   :  { %3230 = vmatprep.mubr.bf16.mxu0 %v9190_v40 }
 0x664   :  { %3231 = vmatmul.mubr.bf16.gmra.mrb[236].mxu0 %v6795_v61  ;;  %v3989_v61 = vld [vmem:[#allocation17 + $0x90] sm:$0xff] }
 0x6ff   :  { %v3162_v20 = vpop.f32.mrb[208].mxu0 }
 0x700   :  { %v8623_v62 = vpop.f32.mrb[209].mxu0 }
 0x701   :  { %v3166_v54 = vpop.f32.mrb[210].mxu0 }
 0x702   :  { %v3241_v58 = vpack.c.bf16 %v3166_v54, %v3162_v20  ;;  %v8625_v14 = vpop.f32.mrb[211].mxu0 }
 0x704   :  { %3442 = vmatmul.mubr.bf16.vlgmr.msra.gmra.mrb[64].mxu1 %v3241_v58  ;;  %6288 = vmatprep.mubr.bf16.mxu0 %v3241_v58  ;;  %v4046_v58 = vpack.c.bf16 %v3994_v38, %v3992_v42 }
 0x705   :  { %4164 = vmatpush1.bf16.msra.mxu1 %v4035_v0  ;;  %3451 = vmatprep.mubr.bf16.mxu1 %v9190_v40  ;;  %v3998_v0 = vld [vmem:[#allocation17 + $0xd8] sm:$0xff] }
 0x706   :  { %4165 = vmatprep.subr.bf16.mxu1 %v4038_v18  ;;  %v6808_v18 = vld [vmem:[#allocation16 + $0x20] sm:$0xff]  }
 0x707   :  { %v3172_v34 = vpop.f32.mrb[212].mxu0 }
 0x708   :  { %v8628_v57 = vpop.f32.mrb[213].mxu0 }
 0x709   :  { %4166 = vmatpush1.bf16.msra.mxu1 %v4037_v6  ;;  %v3176_v30 = vpop.f32.mrb[214].mxu0  ;;  %v4048_v6 = vpack.c.bf16 %v3998_v0, %v3996_v9 }
 0x70a   :  { %v3242_v7 = vpack.c.bf16 %v3176_v30, %v3172_v34  ;;  %4167 = vmatprep.subr.bf16.mxu1 %v4040_v15  ;;  %v8630_v4 = vpop.f32.mrb[215].mxu0 }
 0x70c   :  { %3452 = vmatmul.mubr.bf16.gmra.mrb[68].mxu1 %v3242_v7  ;;  %6289 = vmatmul.mubr.bf16.vlgmr.msra.gmra.mrb[240].mxu0 %v3242_v7 }
 0x70d   :  { %4168 = vmatpush1.bf16.msra.mxu1 %v4039_v39  ;;  %6305 = vmatpush3.bf16.msra.mxu0 %v6804_v33  ;;  %v3987_v33 = vld [vmem:[#allocation17 + $0x80] sm:$0xff]  ;;  %v4000_v39 = vld [vmem:[#allocation17 + $0xe8] sm:$0xff] }
 0x70e   :  { %4169 = vmatprep.subr.bf16.mxu1 %v4042_v63  ;;  %6306 = vmatprep.subr.bf16.mxu0 %v6805_v12  ;;  %v4043_v54 = vpack.c.bf16 %v3989_v61, %v3987_v33  ;;  %v4050_v23 = vpack.c.bf16 %v4002_v8, %v4000_v39  ;;  %v4001_v63 = vld [vmem:[#allocation17 + $0xf0] sm:$0xff]  ;;  %v6811_v61 = vld [vmem:[#allocation16 + $0x38] sm:$0xff]  }
 0x70f   :  { %v3182_v49 = vpop.f32.mrb[216].mxu0  ;;  %3461 = vmatprep.mubr.bf16.mxu1 %v9190_v40 }
 0x710   :  { %v8633_v17 = vpop.f32.mrb[217].mxu0 }
 0x711   :  { %4170 = vmatpush1.bf16.msra.mxu1 %v4041_v37  ;;  %6307 = vmatpush3.bf16.msra.mxu0 %v6805_v12  ;;  %v3186_v22 = vpop.f32.mrb[218].mxu0  ;;  %v4047_v12 = vpack.c.bf16 %v3997_v29, %v3995_v21 }
 0x712   :  { %v3243_v27 = vpack.c.bf16 %v3186_v22, %v3182_v49  ;;  %4171 = vmatprep.subr.bf16.mxu1 %v4044_v31  ;;  %6308 = vmatprep.subr.bf16.mxu0 %v6806_v28  ;;  %v8635_v20 = vpop.f32.mrb[219].mxu0 }
 0x714   :  { %3462 = vmatmul.mubr.bf16.gmra.mrb[72].mxu1 %v3243_v27  ;;  %6292 = vmatprep.mubr.bf16.mxu0 %v3243_v27 }
 0x715   :  { %4172 = vmatpush1.bf16.msra.mxu1 %v4043_v54  ;;  %6309 = vmatpush3.bf16.msra.mxu0 %v6806_v28  ;;  %v4049_v28 = vpack.c.bf16 %v4001_v63, %v3999_v46  ;;  %v6814_v63 = vld [vmem:[#allocation5 + $0xc4] ss:$12 sps:$4 sm:$0xff]  }
 0x716   :  { %4173 = vmatprep.subr.bf16.mxu1 %v4046_v58  ;;  %6310 = vmatprep.subr.bf16.mxu0 %v6807_v3 }
 0x717   :  { %v3192_v2 = vpop.f32.mrb[220].mxu0  ;;  %3471 = vmatprep.mubr.bf16.mxu1 %v9190_v40 }
 0x718   :  { %v8638_v34 = vpop.f32.mrb[221].mxu0 }
 0x719   :  { %4174 = vmatpush1.bf16.msra.mxu1 %v4045_v50  ;;  %6311 = vmatpush3.bf16.msra.mxu0 %v6807_v3  ;;  %v3196_v15 = vpop.f32.mrb[222].mxu0 }
 0x71a   :  { %v3244_v30 = vpack.c.bf16 %v3196_v15, %v3192_v2  ;;  %4175 = vmatprep.subr.bf16.mxu1 %v4048_v6  ;;  %6312 = vmatprep.subr.bf16.mxu0 %v6808_v18  ;;  %v8640_v7 = vpop.f32.mrb[223].mxu0 }
 0x71c   :  { %3472 = vmatmul.mubr.bf16.gmra.mrb[76].mxu1 %v3244_v30  ;;  %6293 = vmatmul.mubr.bf16.gmra.mrb[244].mxu0 %v3244_v30 }
 0x71d   :  { %4176 = vmatpush1.bf16.msra.mxu1 %v4047_v12  ;;  %6313 = vmatpush3.bf16.msra.mxu0 %v6808_v18 }
 0x71e   :  { %4177 = vmatprep.subr.bf16.mxu1 %v4050_v23  ;;  %6314 = vmatprep.subr.bf16.mxu0 %v6809_v41 }
 0x71f   :  { %v3202_v25 = vpop.f32.mrb[224].mxu0  ;;  %3481 = vmatprep.mubr.bf16.mxu1 %v9190_v40 }
 0x720   :  { %v8643_v49 = vpop.f32.mrb[225].mxu0 }
 0x721   :  { %4178 = vmatpush1.bf16.msra.mxu1 %v4049_v28  ;;  %6315 = vmatpush3.bf16.msra.mxu0 %v6809_v41  ;;  %v3206_v37 = vpop.f32.mrb[226].mxu0  ;;  %v1839_v28 = vadd.f32 %v8355_v44, %v8252_v13 }
 0x722   :  { %v3245_v36 = vpack.c.bf16 %v3206_v37, %v3202_v25  ;;  %6316 = vmatprep.subr.bf16.mxu0 %v6810_v11  ;;  %v8645_v31 = vpop.f32.mrb[227].mxu0 }
 0x724   :  { %3482 = vmatmul.mubr.bf16.gmra.mrb[80].mxu1 %v3245_v36  ;;  %6296 = vmatprep.mubr.bf16.mxu0 %v3245_v36 }
 0x725   :  { %6317 = vmatpush3.bf16.msra.mxu0 %v6810_v11  ;;  %3491 = vmatprep.mubr.bf16.mxu1 %v9190_v40  ;;  %v1849_v11 = vadd.f32 %v8373_v16, %v8252_v13 }
 0x726   :  { %6318 = vmatprep.subr.bf16.mxu0 %v6811_v61 }
 0x727   :  { %v3212_v22 = vpop.f32.mrb[228].mxu0 }
 0x728   :  { %v8648_v38 = vpop.f32.mrb[229].mxu0 }
 0x729   :  { %6319 = vmatpush3.bf16.msra.mxu0 %v6811_v61  ;;  %v3216_v27 = vpop.f32.mrb[230].mxu0  ;;  %v1853_v61 = vadd.f32 %v8380_v24, %v8252_v13 }
 0x72a   :  { %v3246_v33 = vpack.c.bf16 %v3216_v27, %v3212_v22  ;;  %6336 = vmatprep.subr.bf16.mxu0 %v8455_v26  ;;  %v8651_v3 = vpop.f32.mrb[231].mxu0 }
 0x72c   :  { %3492 = vmatmul.mubr.bf16.gmra.mrb[84].mxu1 %v3246_v33  ;;  %6297 = vmatmul.mubr.bf16.gmra.mrb[248].mxu0 %v3246_v33 }
 0x72d   :  { %3501 = vmatprep.mubr.bf16.mxu1 %v9190_v40 }
 0x72f   :  { %v3222_v54 = vpop.f32.mrb[232].mxu0 }
 0x730   :  { %v8654_v42 = vpop.f32.mrb[233].mxu0 }
 0x731   :  { %v3226_v58 = vpop.f32.mrb[234].mxu0 }
 0x732   :  { %v3247_v45 = vpack.c.bf16 %v3226_v58, %v3222_v54  ;;  %v8656_v0 = vpop.f32.mrb[235].mxu0  ;;  %v1843_v58 = vadd.f32 %v8358_v51, %v8252_v13 }
 0x734   :  { %3502 = vmatmul.mubr.bf16.gmra.mrb[88].mxu1 %v3247_v45  ;;  %6300 = vmatprep.mubr.bf16.mxu0 %v3247_v45 }
 0x735   :  { %3511 = vmatprep.mubr.bf16.mxu1 %v9190_v40 }
 0x737   :  { %v3232_v1 = vpop.f32.mrb[236].mxu0 }
 0x738   :  { %v8659_v18 = vpop.f32.mrb[237].mxu0 }
 0x739   :  { %v3236_v2 = vpop.f32.mrb[238].mxu0 }
 0x73a   :  { %v3248_v50 = vpack.c.bf16 %v3236_v2, %v3232_v1  ;;  %v8661_v9 = vpop.f32.mrb[239].mxu0 }
 0x73c   :  { %3512 = vmatmul.mubr.bf16.gmra.mrb[92].mxu1 %v3248_v50  ;;  %6301 = vmatmul.mubr.bf16.gmra.mrb[252].mxu0 %v3248_v50 }
 0x73d   :  { %4195 = vmatprep.mubr.bf16.mxu1 %v6814_v63 }
 0x7d7   :  { %v3443_v6 = vpop.f32.mrb[64].mxu1 }
 0x7d8   :  { %v6416_v29 = vadd.f32 %v3443_v6, %v8242_v59  ;;  %v3445_v15 = vpop.f32.mrb[65].mxu1 }
 0x7d9   :  { %v6417_v8 = vadd.f32 %v3445_v15, %v8245_v60  ;;  %v3447_v30 = vpop.f32.mrb[66].mxu1 }
 0x7da   :  { %v5872_v21 = vmul.f32 -1.442695, %v6416_v29  ;;  %v6418_v41 = vadd.f32 %v3447_v30, %v8242_v59  ;;  %v3449_v12 = vpop.f32.mrb[67].mxu1 }
 0x7db   :  { %v5888_v39 = vmul.f32 -1.442695, %v6417_v8  ;;  %v6419_v23 = vadd.f32 %v3449_v12, %v8245_v60 }
 0x7dc   :  { %7140 = vpow2.f32 %v5872_v21  ;;  %v5873_v46 = vmul.f32 -1.442695, %v6418_v41 }
 0x7dd   :  { %7142 = vpow2.f32 %v5888_v39  ;;  %v5889_v25 = vmul.f32 -1.442695, %v6419_v23 }
 0x7de   :  { %7144 = vpow2.f32 %v5873_v46 }
 0x7df   :  { %v3453_v37 = vpop.f32.mrb[68].mxu1  ;;  %v6290_v36 = vpop.f32.mrb[240].mxu0  ;;  %7146 = vpow2.f32 %v5889_v25 }
 0x7e0   :  { %v6420_v22 = vadd.f32 %v3453_v37, %v8242_v59  ;;  %v3627_v27 = vadd.f32 %v6290_v36, %v1849_v11  ;;  %v3455_v33 = vpop.f32.mrb[69].mxu1  ;;  %v3556_v54 = vpop.f32.mrb[241].mxu0 }
 0x7e1   :  { %v6421_v16 = vadd.f32 %v3455_v33, %v8245_v60  ;;  %v3621_v45 = vadd.f32 %v3556_v54, %v1839_v28  ;;  %v3457_v1 = vpop.f32.mrb[70].mxu1  ;;  %v6291_v2 = vpop.f32.mrb[242].mxu0 }
 0x7e2   :  { %v5874_v44 = vmul.f32 -1.442695, %v6420_v22  ;;  %v6422_v50 = vadd.f32 %v3457_v1, %v8242_v59  ;;  %v3630_v6 = vadd.f32 %v6291_v2, %v1853_v61  ;;  %v3459_v29 = vpop.f32.mrb[71].mxu1  ;;  %v3559_v24 = vpop.f32.mrb[243].mxu0  ;;  %v1869_v1 = vadd.f32 %v8406_v19, %v8252_v13 }
 0x7e3   :  { %v5890_v15 = vmul.f32 -1.442695, %v6421_v16  ;;  %v3624_v8 = vadd.f32 %v3559_v24, %v1843_v58  ;;  %v6423_v21 = vadd.f32 %v3459_v29, %v8245_v60 }
 0x7e4   :  { %7148 = vpow2.f32 %v5874_v44  ;;  %v5875_v30 = vmul.f32 -1.442695, %v6422_v50  ;;  %v1873_v50 = vadd.f32 %v8409_v56, %v8252_v13 }
 0x7e5   :  { %7150 = vpow2.f32 %v5890_v15  ;;  %v5891_v63 = vmul.f32 -1.442695, %v6423_v21 }
 0x7e6   :  { %v7141_v51 = vpop.eup %7140  ;;  %7152 = vpow2.f32 %v5875_v30 }
 0x7e7   :  { %v7143_v41 = vpop.eup %7142  ;;  %v3715_v12 = vadd.f32 1.0, %v7141_v51  ;;  %7154 = vtanh.f32 %v3627_v27  ;;  %v3463_v39 = vpop.f32.mrb[72].mxu1 }
 0x7e8   :  { %v7145_v23 = vpop.eup %7144  ;;  %7156 = vtanh.f32 %v3621_v45  ;;  %v6424_v46 = vadd.f32 %v3463_v39, %v8242_v59  ;;  %v3465_v11 = vpop.f32.mrb[73].mxu1  ;;  %v3811_v33 = vadd.f32 1.0, %v7143_v41  ;;  %v1859_v45 = vadd.f32 %v8392_v47, %v8252_v13 }
 0x7e9   :  { %7158 = vrcp.f32 %v3715_v12  ;;  %v3716_v25 = vadd.f32 1.0, %v7145_v23  ;;  %v6425_v28 = vadd.f32 %v3465_v11, %v8245_v60  ;;  %v3467_v37 = vpop.f32.mrb[74].mxu1  ;;  %v7147_v27 = vpop.eup %7146  ;;  %v1863_v11 = vadd.f32 %v8397_v55, %v8252_v13 }
 0x7ea   :  { %7160 = vtanh.f32 %v3630_v6  ;;  %v5876_v36 = vmul.f32 -1.442695, %v6424_v46  ;;  %v6426_v61 = vadd.f32 %v3467_v37, %v8242_v59  ;;  %v3469_v22 = vpop.f32.mrb[75].mxu1  ;;  %v3812_v6 = vadd.f32 1.0, %v7147_v27 }
 0x7eb   :  { %7162 = vrcp.f32 %v3716_v25  ;;  %v5892_v54 = vmul.f32 -1.442695, %v6425_v28  ;;  %v6427_v58 = vadd.f32 %v3469_v22, %v8245_v60 }
 0x7ec   :  { %7164 = vpow2.f32 %v5891_v63  ;;  %v5877_v2 = vmul.f32 -1.442695, %v6426_v61 }
 0x7ed   :  { %7166 = vtanh.f32 %v3624_v8  ;;  %v5893_v8 = vmul.f32 -1.442695, %v6427_v58 }
 0x7ee   :  { %v7149_v16 = vpop.eup %7148  ;;  %7168 = vpow2.f32 %v5876_v36 }
 0x7ef   :  { %v7151_v44 = vpop.eup %7150  ;;  %7170 = vrcp.f32 %v3811_v33  ;;  %v3717_v29 = vadd.f32 1.0, %v7149_v16  ;;  %v3473_v24 = vpop.f32.mrb[76].mxu1 }
 0x7f0   :  { %v6294_v15 = vpop.f32.mrb[244].mxu0  ;;  %v7153_v30 = vpop.eup %7152  ;;  %7172 = vpow2.f32 %v5892_v54  ;;  %v6428_v21 = vadd.f32 %v3473_v24, %v8242_v59  ;;  %v3813_v22 = vadd.f32 1.0, %v7151_v44 }
 0x7f1   :  { %v8690_v47 = vadd.f32 %v6294_v15, %v1869_v1  ;;  %v3475_v51 = vpop.f32.mrb[77].mxu1  ;;  %v3572_v19 = vpop.f32.mrb[245].mxu0  ;;  %7174 = vrcp.f32 %v3717_v29  ;;  %v3718_v12 = vadd.f32 1.0, %v7153_v30 }
 0x7f2   :  { %v7155_v41 = vpop.eup %7154  ;;  %v6429_v39 = vadd.f32 %v3475_v51, %v8245_v60  ;;  %v3633_v56 = vadd.f32 %v3572_v19, %v1859_v45  ;;  %v3477_v23 = vpop.f32.mrb[78].mxu1  ;;  %7176 = vpow2.f32 %v5877_v2  ;;  %v5878_v25 = vmul.f32 -1.442695, %v6428_v21 }
 0x7f3   :  { %v6295_v63 = vpop.f32.mrb[246].mxu0  ;;  %v7157_v46 = vpop.eup %7156  ;;  %7178 = vrcp.f32 %v3718_v12  ;;  %v6430_v2 = vadd.f32 %v3477_v23, %v8242_v59 }
 0x7f4   :  { %v8695_v28 = vadd.f32 %v6295_v63, %v1873_v50  ;;  %v3479_v37 = vpop.f32.mrb[79].mxu1  ;;  %v3575_v36 = vpop.f32.mrb[247].mxu0  ;;  %7180 = vpow2.f32 %v5893_v8  ;;  %v5894_v16 = vmul.f32 -1.442695, %v6429_v39 }
 0x7f5   :  { %v7159_v61 = vpop.eup %7158  ;;  %v8697_v54 = vadd.f32 %v3575_v36, %v1863_v11  ;;  %7182 = vrcp.f32 %v3812_v6  ;;  %v5879_v12 = vmul.f32 -1.442695, %v6430_v2  ;;  %v1889_v11 = vadd.f32 %v8424_v48, %v8252_v13 }
 0x7f6   :  { %v7161_v33 = vpop.eup %7160  ;;  %v3875_v27 = vmul.f32 %v7159_v61, %v7157_v46  ;;  %7184 = vpow2.f32 %v5878_v25  ;;  %v6431_v61 = vadd.f32 %v3479_v37, %v8245_v60 }
 0x7f7   :  { %v7163_v58 = vpop.eup %7162  ;;  %7186 = vrcp.f32 %v3813_v22  ;;  %v3483_v50 = vpop.f32.mrb[80].mxu1  ;;  %v1879_v22 = vadd.f32 %v8416_v10, %v8252_v13 }
 0x7f8   :  { %v7165_v45 = vpop.eup %7164  ;;  %v3891_v55 = vadd.f32 %v3875_v27, %v8623_v62  ;;  %v8701_v24 = vpop.f32.mrb[81].mxu1  ;;  %v1893_v27 = vadd.f32 %v8427_v43, %v8252_v13  ;;  %v6432_v48 = vadd.f32 %v3483_v50, %v8242_v59 }
 0x7f9   :  { %v7167_v1 = vpop.eup %7166  ;;  %v3814_v30 = vadd.f32 1.0, %v7165_v45  ;;  %v3487_v6 = vpop.f32.mrb[82].mxu1 }
 0x7fa   :  { %v7169_v29 = vpop.eup %7168  ;;  %7188 = vtanh.f32 %v3891_v55  ;;  %3955 = vst [vmem:[#allocation17 + $0x108] sm:$0xff] %v3891_v55  ;;  %v3876_v44 = vmul.f32 %v7167_v1, %v7163_v58  ;;  %v8704_v51 = vpop.f32.mrb[83].mxu1 }
 0x7fb   :  { %v7171_v15 = vpop.eup %7170  ;;  %v3719_v8 = vadd.f32 1.0, %v7169_v29  ;;  %7190 = vpow2.f32 %v5894_v16 }
 0x7fc   :  { %v7173_v21 = vpop.eup %7172  ;;  %v3892_v62 = vadd.f32 %v3876_v44, %v8625_v14  ;;  %7192 = vtanh.f32 %v3633_v56 }
 0x7fd   :  { %v7175_v19 = vpop.eup %7174  ;;  %7194 = vrcp.f32 %v3719_v8  ;;  %v3815_v25 = vadd.f32 1.0, %v7173_v21 }
 0x7fe   :  { %v7177_v39 = vpop.eup %7176  ;;  %v3877_v23 = vmul.f32 %v7175_v19, %v7155_v41  ;;  %7196 = vtanh.f32 %v3892_v62  ;;  %3956 = vst [vmem:[#allocation17 + $0x118] sm:$0xff] %v3892_v62  ;;  %v4052_v63 = vpack.c.bf16 %v3892_v62, %v3891_v55 }
 0x7ff   :  { %v7179_v46 = vpop.eup %7178  ;;  %7198 = vrcp.f32 %v3814_v30  ;;  %v3493_v58 = vpop.f32.mrb[84].mxu1  ;;  %v3720_v37 = vadd.f32 1.0, %v7177_v39  ;;  %v1883_v30 = vadd.f32 %v8419_v53, %v8252_v13  ;;  %v6434_v39 = vadd.f32 %v3487_v6, %v8242_v59 }
 0x800   :  { %v7181_v36 = vpop.eup %7180  ;;  %v8709_v14 = vadd.f32 %v3877_v23, %v8628_v57  ;;  %v3878_v56 = vmul.f32 %v7179_v46, %v7161_v33  ;;  %7200 = vtanh.f32 %v8690_v47  ;;  %4179 = vmatprep.subr.bf16.mxu1 %v4052_v63  ;;  %v6298_v16 = vpop.f32.mrb[248].mxu0  ;;  %v5880_v63 = vmul.f32 -1.442695, %v6432_v48 }
 0x801   :  { %v7183_v41 = vpop.eup %7182  ;;  %7202 = vpow2.f32 %v5879_v12  ;;  %v8723_v33 = vadd.f32 %v6298_v16, %v1889_v11  ;;  %v3495_v10 = vpop.f32.mrb[85].mxu1  ;;  %v3816_v43 = vadd.f32 1.0, %v7181_v36  ;;  %v6433_v6 = vadd.f32 %v8701_v24, %v8245_v60 }
 0x802   :  { %v7185_v57 = vpop.eup %7184  ;;  %7204 = vtanh.f32 %v8709_v14  ;;  %3957 = vst [vmem:[#allocation17 + $0x128] sm:$0xff] %v8709_v14  ;;  %v8721_v47 = vadd.f32 %v3878_v56, %v8630_v4  ;;  %v3588_v45 = vpop.f32.mrb[249].mxu0  ;;  %v5895_v4 = vmul.f32 -1.442695, %v6431_v61  ;;  %v6436_v56 = vadd.f32 %v3493_v58, %v8242_v59 }
 0x803   :  { %v7187_v55 = vpop.eup %7186  ;;  %7206 = vrcp.f32 %v3815_v25  ;;  %v3721_v1 = vadd.f32 1.0, %v7185_v57  ;;  %v8725_v2 = vadd.f32 %v3588_v45, %v1879_v22  ;;  %v3497_v50 = vpop.f32.mrb[86].mxu1  ;;  %v5881_v22 = vmul.f32 -1.442695, %v6434_v39 }
 0x804   :  { %v6299_v29 = vpop.f32.mrb[250].mxu0  ;;  %v7189_v44 = vpop.eup %7188  ;;  %7208 = vtanh.f32 %v8721_v47  ;;  %3958 = vst [vmem:[#allocation17 + $0x138] sm:$0xff] %v8721_v47  ;;  %v4054_v11 = vpack.c.bf16 %v8721_v47, %v8709_v14  ;;  %v6435_v14 = vadd.f32 %v8704_v51, %v8245_v60  ;;  %v5882_v45 = vmul.f32 -1.442695, %v6436_v56 }
 0x805   :  { %v8731_v8 = vadd.f32 %v6299_v29, %v1893_v27  ;;  %v8733_v21 = vpop.f32.mrb[87].mxu1  ;;  %v3591_v62 = vpop.f32.mrb[251].mxu0  ;;  %v3923_v12 = vmul.f32 %v7189_v44, %v7171_v15  ;;  %7210 = vrcp.f32 %v3721_v1  ;;  %v5896_v29 = vmul.f32 -1.442695, %v6433_v6 }
 0x806   :  { %v7191_v19 = vpop.eup %7190  ;;  %7212 = vrcp.f32 %v3720_v37  ;;  %v8736_v46 = vadd.f32 %v3591_v62, %v1883_v30  ;;  %v6438_v44 = vadd.f32 %v3497_v50, %v8242_v59 }
 0x807   :  { %v7193_v23 = vpop.eup %7192  ;;  %3939 = vst [vmem:[#allocation17 + $0x100] sm:$0xff] %v3923_v12  ;;  %7214 = vrcp.f32 %v3816_v43  ;;  %v8744_v27 = vpop.f32.mrb[88].mxu1 }
 0x808   :  { %v7195_v53 = vpop.eup %7194  ;;  %7216 = vpow2.f32 %v5895_v4  ;;  %v8751_v57 = vpop.f32.mrb[89].mxu1 }
 0x809   :  { %v7197_v25 = vpop.eup %7196  ;;  %v3879_v36 = vmul.f32 %v7195_v53, %v7193_v23  ;;  %7218 = vtanh.f32 %v8697_v54  ;;  %v6437_v54 = vadd.f32 %v3495_v10, %v8245_v60  ;;  %v8755_v24 = vpop.f32.mrb[90].mxu1  ;;  %v5897_v10 = vmul.f32 -1.442695, %v6435_v14 }
 0x80a   :  { %v7199_v15 = vpop.eup %7198  ;;  %v3924_v61 = vmul.f32 %v7197_v25, %v7183_v41  ;;  %7220 = vpow2.f32 %v5880_v63  ;;  %v3817_v41 = vadd.f32 1.0, %v7191_v19  ;;  %v8759_v51 = vpop.f32.mrb[91].mxu1  ;;  %v1909_v23 = vadd.f32 %v8440_v52, %v8252_v13 }
 0x80b   :  { %v7201_v48 = vpop.eup %7200  ;;  %v8747_v16 = vadd.f32 %v3879_v36, %v8633_v17  ;;  %7222 = vtanh.f32 %v8695_v28  ;;  %v5898_v62 = vmul.f32 -1.442695, %v6437_v54  ;;  %v5883_v36 = vmul.f32 -1.442695, %v6438_v44 }
 0x80c   :  { %v7203_v58 = vpop.eup %7202  ;;  %3940 = vst [vmem:[#allocation17 + $0x110] sm:$0xff] %v3924_v61  ;;  %v4051_v47 = vpack.c.bf16 %v3924_v61, %v3923_v12 }
 0x80d   :  { %v7205_v37 = vpop.eup %7204  ;;  %7224 = vtanh.f32 %v8747_v16  ;;  %3959 = vst [vmem:[#allocation17 + $0x148] sm:$0xff] %v8747_v16  ;;  %v3722_v17 = vadd.f32 1.0, %v7203_v58 }
 0x80e   :  { %v7207_v43 = vpop.eup %7206  ;;  %v3925_v1 = vmul.f32 %v7205_v37, %v7187_v55  ;;  %7226 = vpow2.f32 %v5881_v22  ;;  %4180 = vmatpush1.bf16.msra.mxu1 %v4051_v47  ;;  %v1899_v55 = vadd.f32 %v8432_v32, %v8252_v13  ;;  %v1913_v32 = vadd.f32 %v8443_v5, %v8252_v13 }
 0x80f   :  { %v7209_v28 = vpop.eup %7208  ;;  %7228 = vrcp.f32 %v3722_v17  ;;  %4181 = vmatprep.subr.bf16.mxu1 %v4054_v11  ;;  %v8768_v50 = vpop.f32.mrb[92].mxu1  ;;  %v1903_v5 = vadd.f32 %v8435_v35, %v8252_v13 }
 0x810   :  { %v7211_v30 = vpop.eup %7210  ;;  %3941 = vst [vmem:[#allocation17 + $0x120] sm:$0xff] %v3925_v1  ;;  %v3926_v4 = vmul.f32 %v7209_v28, %v7199_v15  ;;  %7230 = vrcp.f32 %v3817_v41  ;;  %v6302_v63 = vpop.f32.mrb[252].mxu0 }
 0x811   :  { %v7213_v19 = vpop.eup %7212  ;;  %v3881_v12 = vmul.f32 %v7211_v30, %v7201_v48  ;;  %7232 = vpow2.f32 %v5882_v45  ;;  %v8773_v56 = vpop.f32.mrb[93].mxu1  ;;  %v8777_v52 = vadd.f32 %v6302_v63, %v1909_v23  ;;  %v6442_v63 = vadd.f32 %v8755_v24, %v8242_v59 }
 0x812   :  { %v8762_v39 = vpop.eup %7214  ;;  %3942 = vst [vmem:[#allocation17 + $0x130] sm:$0xff] %v3926_v4  ;;  %7234 = vpow2.f32 %v5896_v29  ;;  %v4053_v53 = vpack.c.bf16 %v3926_v4, %v3925_v1  ;;  %v3604_v15 = vpop.f32.mrb[253].mxu0 }
 0x813   :  { %v7217_v11 = vpop.eup %7216  ;;  %v8771_v25 = vadd.f32 %v3881_v12, %v8638_v34  ;;  %7236 = vpow2.f32 %v5897_v10  ;;  %v8779_v6 = vadd.f32 %v3604_v15, %v1899_v55  ;;  %v8781_v22 = vpop.f32.mrb[94].mxu1  ;;  %v5885_v24 = vmul.f32 -1.442695, %v6442_v63 }
 0x814   :  { %v7219_v61 = vpop.eup %7218  ;;  %7238 = vpow2.f32 %v5898_v62  ;;  %v6303_v48 = vpop.f32.mrb[254].mxu0  ;;  %4182 = vmatpush1.bf16.msra.mxu1 %v4053_v53  ;;  %v3818_v28 = vadd.f32 1.0, %v7217_v11 }
 0x815   :  { %v7221_v34 = vpop.eup %7220  ;;  %7240 = vtanh.f32 %v8771_v25  ;;  %3961 = vst [vmem:[#allocation17 + $0x168] sm:$0xff] %v8771_v25  ;;  %v3880_v14 = vmul.f32 %v7219_v61, %v7213_v19  ;;  %v8785_v58 = vpop.f32.mrb[95].mxu1  ;;  %v8790_v37 = vadd.f32 %v6303_v48, %v1913_v32  ;;  %v6444_v61 = vadd.f32 %v8768_v50, %v8242_v59 }
 0x816   :  { %v3607_v41 = vpop.f32.mrb[255].mxu0  ;;  %v7223_v54 = vpop.eup %7222  ;;  %v3723_v47 = vadd.f32 1.0, %v7221_v34  ;;  %7242 = vtanh.f32 %v8725_v2  ;;  %v6439_v2 = vadd.f32 %v8733_v21, %v8245_v60 }
 0x817   :  { %v7225_v17 = vpop.eup %7224  ;;  %v3896_v45 = vadd.f32 %v3880_v14, %v8635_v20  ;;  %7244 = vpow2.f32 %v5883_v36  ;;  %v8795_v10 = vadd.f32 %v3607_v41, %v1903_v5  ;;  %v6441_v14 = vadd.f32 %v8751_v57, %v8245_v60 }
 0x818   :  { %v7227_v1 = vpop.eup %7226  ;;  %v8793_v29 = vmul.f32 %v7225_v17, %v7207_v43  ;;  %7246 = vrcp.f32 %v3723_v47  ;;  %v6440_v43 = vadd.f32 %v8744_v27, %v8242_v59  ;;  %v5899_v21 = vmul.f32 -1.442695, %v6439_v2 }
 0x819   :  { %v7229_v44 = vpop.eup %7228  ;;  %7248 = vtanh.f32 %v3896_v45  ;;  %3960 = vst [vmem:[#allocation17 + $0x158] sm:$0xff] %v3896_v45  ;;  %v3724_v35 = vadd.f32 1.0, %v7227_v1  ;;  %v4056_v30 = vpack.c.bf16 %v3896_v45, %v8747_v16  ;;  %v5886_v47 = vmul.f32 -1.442695, %v6444_v61 }
 0x81a   :  { %v7231_v4 = vpop.eup %7230  ;;  %3943 = vst [vmem:[#allocation17 + $0x140] sm:$0xff] %v8793_v29  ;;  %v3882_v20 = vmul.f32 %v7229_v44, %v7223_v54  ;;  %7250 = vtanh.f32 %v8723_v33  ;;  %v5884_v27 = vmul.f32 -1.442695, %v6440_v43  ;;  %v6445_v54 = vadd.f32 %v8773_v56, %v8245_v60 }
 0x81b   :  { %v7233_v62 = vpop.eup %7232  ;;  %4183 = vmatprep.subr.bf16.mxu1 %v4056_v30  ;;  %7252 = vrcp.f32 %v3818_v28  ;;  %v5900_v1 = vmul.f32 -1.442695, %v6441_v14 }
 0x81c   :  { %v7235_v19 = vpop.eup %7234  ;;  %v3898_v12 = vadd.f32 %v3882_v20, %v8640_v7  ;;  %v3725_v55 = vadd.f32 1.0, %v7233_v62  ;;  %7254 = vrcp.f32 %v3724_v35  ;;  %v5902_v56 = vmul.f32 -1.442695, %v6445_v54 }
 0x81d   :  { %v7237_v23 = vpop.eup %7236  ;;  %v3819_v15 = vadd.f32 1.0, %v7235_v19  ;;  %v6443_v62 = vadd.f32 %v8759_v51, %v8245_v60 }
 0x81e   :  { %v7239_v16 = vpop.eup %7238  ;;  %7256 = vtanh.f32 %v3898_v12  ;;  %3962 = vst [vmem:[#allocation17 + $0x178] sm:$0xff] %v3898_v12  ;;  %v4058_v33 = vpack.c.bf16 %v3898_v12, %v8771_v25  ;;  %v3820_v41 = vadd.f32 1.0, %v7237_v23 }
 0x81f   :  { %v7241_v53 = vpop.eup %7240  ;;  %7258 = vrcp.f32 %v3725_v55  ;;  %v3821_v45 = vadd.f32 1.0, %v7239_v16  ;;  %v5901_v51 = vmul.f32 -1.442695, %v6443_v62 }
 0x820   :  { %v7243_v11 = vpop.eup %7242  ;;  %v3929_v36 = vmul.f32 %v7241_v53, %v7231_v4  ;;  %7260 = vtanh.f32 %v8731_v8 }
 0x821   :  { %v7245_v7 = vpop.eup %7244  ;;  %7262 = vpow2.f32 %v5899_v21 }
 0x822   :  { %v7247_v32 = vpop.eup %7246  ;;  %3945 = vst [vmem:[#allocation17 + $0x160] sm:$0xff] %v3929_v36  ;;  %v3726_v48 = vadd.f32 1.0, %v7245_v7  ;;  %7264 = vtanh.f32 %v8736_v46  ;;  %v6446_v46 = vadd.f32 %v8781_v22, %v8242_v59 }
 0x823   :  { %v7249_v25 = vpop.eup %7248  ;;  %v3883_v34 = vmul.f32 %v7247_v32, %v7243_v11  ;;  %7266 = vpow2.f32 %v5884_v27  ;;  %v6447_v27 = vadd.f32 %v8785_v58, %v8245_v60 }
 0x824   :  { %v3928_v8 = vmul.f32 %v7249_v25, %v8762_v39  ;;  %7268 = vrcp.f32 %v3726_v48  ;;  %v7251_v50 = vpop.eup %7250  ;;  %v5887_v35 = vmul.f32 -1.442695, %v6446_v46 }
 0x825   :  { %7270 = vrcp.f32 %v3819_v15  ;;  %v3899_v5 = vadd.f32 %v3883_v34, %v8643_v49  ;;  %v7253_v17 = vpop.eup %7252  ;;  %v5903_v48 = vmul.f32 -1.442695, %v6447_v27 }
 0x826   :  { %3944 = vst [vmem:[#allocation17 + $0x150] sm:$0xff] %v3928_v8  ;;  %7272 = vpow2.f32 %v5885_v24  ;;  %v4055_v57 = vpack.c.bf16 %v3928_v8, %v8793_v29  ;;  %v7255_v39 = vpop.eup %7254 }
 0x827   :  { %7274 = vtanh.f32 %v3899_v5  ;;  %3963 = vst [vmem:[#allocation17 + $0x188] sm:$0xff] %v3899_v5 }
 0x828   :  { %v7257_v28 = vpop.eup %7256  ;;  %7276 = vrcp.f32 %v3820_v41  ;;  %4184 = vmatpush1.bf16.msra.mxu1 %v4055_v57 }
 0x829   :  { %v7259_v44 = vpop.eup %7258  ;;  %v3930_v49 = vmul.f32 %v7257_v28, %v7253_v17  ;;  %7278 = vpow2.f32 %v5886_v47  ;;  %4185 = vmatprep.subr.bf16.mxu1 %v4058_v33 }
 0x82a   :  { %v7261_v22 = vpop.eup %7260  ;;  %v3885_v2 = vmul.f32 %v7259_v44, %v7251_v50  ;;  %7280 = vrcp.f32 %v3821_v45 }
 0x82b   :  { %v7263_v30 = vpop.eup %7262  ;;  %3946 = vst [vmem:[#allocation17 + $0x170] sm:$0xff] %v3930_v49  ;;  %7282 = vpow2.f32 %v5900_v1  ;;  %v4057_v29 = vpack.c.bf16 %v3930_v49, %v3929_v36 }
 0x82c   :  { %v7265_v4 = vpop.eup %7264  ;;  %v8822_v20 = vadd.f32 %v3885_v2, %v8648_v38  ;;  %7284 = vpow2.f32 %v5902_v56  ;;  %v3822_v55 = vadd.f32 1.0, %v7263_v30 }
 0x82d   :  { %v7267_v43 = vpop.eup %7266  ;;  %v3884_v19 = vmul.f32 %v7265_v4, %v7255_v39  ;;  %7286 = vpow2.f32 %v5887_v35  ;;  %4186 = vmatpush1.bf16.msra.mxu1 %v4057_v29 }
 0x82e   :  { %v7269_v12 = vpop.eup %7268  ;;  %7288 = vtanh.f32 %v8822_v20  ;;  %3965 = vst [vmem:[#allocation17 + $0x1a8] sm:$0xff] %v8822_v20  ;;  %v3727_v23 = vadd.f32 1.0, %v7267_v43 }
 0x82f   :  { %v7271_v21 = vpop.eup %7270  ;;  %v3886_v16 = vmul.f32 %v7269_v12, %v7261_v22  ;;  %v3900_v38 = vadd.f32 %v3884_v19, %v8645_v31  ;;  %7290 = vtanh.f32 %v8779_v6 }
 0x830   :  { %v7273_v63 = vpop.eup %7272  ;;  %7292 = vrcp.f32 %v3727_v23 }
 0x831   :  { %v7275_v33 = vpop.eup %7274  ;;  %v3902_v53 = vadd.f32 %v3886_v16, %v8651_v3  ;;  %7294 = vtanh.f32 %v3900_v38  ;;  %3964 = vst [vmem:[#allocation17 + $0x198] sm:$0xff] %v3900_v38  ;;  %v4060_v11 = vpack.c.bf16 %v3900_v38, %v3899_v5  ;;  %v3728_v31 = vadd.f32 1.0, %v7273_v63 }
 0x832   :  { %v7277_v36 = vpop.eup %7276  ;;  %v3931_v7 = vmul.f32 %v7275_v33, %v7271_v21  ;;  %7296 = vrcp.f32 %v3822_v55 }
 0x833   :  { %v7279_v15 = vpop.eup %7278  ;;  %7298 = vtanh.f32 %v3902_v53  ;;  %3966 = vst [vmem:[#allocation17 + $0x1b8] sm:$0xff] %v3902_v53  ;;  %4187 = vmatprep.subr.bf16.mxu1 %v4060_v11  ;;  %v4062_v6 = vpack.c.bf16 %v3902_v53, %v8822_v20 }
 0x834   :  { %v7281_v61 = vpop.eup %7280  ;;  %3947 = vst [vmem:[#allocation17 + $0x180] sm:$0xff] %v3931_v7  ;;  %7300 = vpow2.f32 %v5901_v51  ;;  %v3729_v3 = vadd.f32 1.0, %v7279_v15  ;;  %v6817_v15 = vld [vmem:[#allocation5 + $0xd8] ss:$12 sps:$4 sm:$0xff]  }
 0x835   :  { %v7283_v32 = vpop.eup %7282  ;;  %7302 = vtanh.f32 %v8777_v52 }
 0x836   :  { %v7285_v58 = vpop.eup %7284  ;;  %7304 = vrcp.f32 %v3729_v3  ;;  %v3823_v54 = vadd.f32 1.0, %v7283_v32  ;;  %v6823_v3 = vld [vmem:[#allocation5 + $0x108] ss:$12 sps:$4 sm:$0xff]   ;;  %v6824_v32 = vld [vmem:[#allocation5 + $0x124] ss:$12 sps:$4 sm:$0xff]  }
 0x837   :  { %v7287_v24 = vpop.eup %7286  ;;  %7306 = vrcp.f32 %v3728_v31  ;;  %v3825_v28 = vadd.f32 1.0, %v7285_v58  ;;  %v6818_v31 = vld [vmem:[#allocation5 + $0xf4] ss:$12 sps:$4 sm:$0xff]   ;;  %v6827_v58 = vld [vmem:[#allocation5 + $0x13c] ss:$12 sps:$4 sm:$0xff]  }
 0x838   :  { %v7289_v25 = vpop.eup %7288  ;;  %v3730_v34 = vadd.f32 1.0, %v7287_v24  ;;  %7308 = vtanh.f32 %v8790_v37  ;;  %v6829_v24 = vld [vmem:[#allocation5 + $0x138] ss:$12 sps:$4 sm:$0xff]  }
 0x839   :  { %v7291_v14 = vpop.eup %7290  ;;  %v3933_v8 = vmul.f32 %v7289_v25, %v7281_v61  ;;  %7310 = vpow2.f32 %v5903_v48  ;;  %v6821_v61 = vld [vmem:[#allocation5 + $0x10c] ss:$12 sps:$4 sm:$0xff]   ;;  %v6830_v25 = vld [vmem:[#allocation5 + $0x154] ss:$12 sps:$4 sm:$0xff]  }
 0x83a   :  { %v7293_v41 = vpop.eup %7292  ;;  %7312 = vrcp.f32 %v3730_v34  ;;  %v6826_v48 = vld [vmem:[#allocation5 + $0x120] ss:$12 sps:$4 sm:$0xff]   ;;  %v6832_v34 = vld [vmem:[#allocation5 + $0x150] ss:$12 sps:$4 sm:$0xff]  }
 0x83b   :  { %v7295_v50 = vpop.eup %7294  ;;  %3949 = vst [vmem:[#allocation17 + $0x1a0] sm:$0xff] %v3933_v8  ;;  %v3887_v5 = vmul.f32 %v7293_v41, %v7291_v14  ;;  %7314 = vtanh.f32 %v8795_v10  ;;  %v6833_v14 = vld [vmem:[#allocation5 + $0x16c] ss:$12 sps:$4 sm:$0xff]  }
 0x83c   :  { %v7297_v52 = vpop.eup %7296  ;;  %v3932_v47 = vmul.f32 %v7295_v50, %v7277_v36  ;;  %7316 = vrcp.f32 %v3823_v54  ;;  %v6812_v36 = vld [vmem:[#allocation5 + $0xc0] ss:$12 sps:$4 sm:$0xff]  }
 0x83d   :  { %v7299_v46 = vpop.eup %7298  ;;  %v3903_v17 = vadd.f32 %v3887_v5, %v8654_v42 }
 0x83e   :  { %v7301_v45 = vpop.eup %7300  ;;  %v3934_v57 = vmul.f32 %v7299_v46, %v7297_v52  ;;  %3948 = vst [vmem:[#allocation17 + $0x190] sm:$0xff] %v3932_v47  ;;  %v4059_v37 = vpack.c.bf16 %v3932_v47, %v3931_v7  ;;  %v6815_v7 = vld [vmem:[#allocation5 + $0xdc] ss:$12 sps:$4 sm:$0xff]  }
 0x83f   :  { %v7303_v39 = vpop.eup %7302  ;;  %7318 = vtanh.f32 %v3903_v17  ;;  %3967 = vst [vmem:[#allocation17 + $0x1c8] sm:$0xff] %v3903_v17  ;;  %v3824_v22 = vadd.f32 1.0, %v7301_v45 }
 0x840   :  { %v7305_v1 = vpop.eup %7304  ;;  %3950 = vst [vmem:[#allocation17 + $0x1b0] sm:$0xff] %v3934_v57  ;;  %4188 = vmatpush1.bf16.msra.mxu1 %v4059_v37  ;;  %v4061_v56 = vpack.c.bf16 %v3934_v57, %v3933_v8  ;;  %7320 = vrcp.f32 %v3825_v28  ;;  %v6835_v8 = vld [vmem:[#allocation5 + $0x168] ss:$12 sps:$4 sm:$0xff]   ;;  %v9191_v37 = vld [vmem:[#allocation28_spill] sm:$0xff] }
 0x841   :  { %v7307_v44 = vpop.eup %7306  ;;  %v3889_v10 = vmul.f32 %v7305_v1, %v7303_v39  ;;  %4189 = vmatprep.subr.bf16.mxu1 %v4062_v6  ;;  %v6820_v6 = vld [vmem:[#allocation5 + $0xf0] ss:$12 sps:$4 sm:$0xff]  }
 0x842   :  { %v7309_v49 = vpop.eup %7308 }
 0x843   :  { %v7311_v35 = vpop.eup %7310  ;;  %v3905_v42 = vadd.f32 %v3889_v10, %v8659_v18 }
 0x844   :  { %v7313_v2 = vpop.eup %7312  ;;  %v3826_v30 = vadd.f32 1.0, %v7311_v35  ;;  %4190 = vmatpush1.bf16.msra.mxu1 %v4061_v56  ;;  %v9192_v56 = vld [vmem:[#allocation31_spill] sm:$0xff] }
 0x845   :  { %v7315_v29 = vpop.eup %7314  ;;  %7322 = vtanh.f32 %v3905_v42  ;;  %3969 = vst [vmem:[#allocation17 + $0x1e8] sm:$0xff] %v3905_v42  ;;  %v3890_v4 = vmul.f32 %v7313_v2, %v7309_v49  ;;  %v9193_v49 = vld [vmem:[#allocation34_spill] sm:$0xff] }
 0x846   :  { %v3888_v20 = vmul.f32 %v7315_v29, %v7307_v44  ;;  %7324 = vrcp.f32 %v3824_v22  ;;  %v7317_v43 = vpop.eup %7316  ;;  %v9195_v29 = vld [vmem:[#allocation40_spill] sm:$0xff] }
 0x847   :  { %v3906_v62 = vadd.f32 %v3890_v4, %v8661_v9  ;;  %7326 = vrcp.f32 %v3826_v30 }
 0x848   :  { %v3904_v19 = vadd.f32 %v3888_v20, %v8656_v0 }
 0x849   :  { %v7319_v12 = vpop.eup %7318  ;;  %7328 = vtanh.f32 %v3906_v62  ;;  %3970 = vst [vmem:[#allocation17 + $0x1f8] sm:$0xff] %v3906_v62  ;;  %v4066_v18 = vpack.c.bf16 %v3906_v62, %v3905_v42  ;;  %v9194_v42 = vld [vmem:[#allocation37_spill] sm:$0xff] }
 0x84a   :  { %v3935_v55 = vmul.f32 %v7319_v12, %v7317_v43  ;;  %7330 = vtanh.f32 %v3904_v19  ;;  %3968 = vst [vmem:[#allocation17 + $0x1d8] sm:$0xff] %v3904_v19  ;;  %v4064_v23 = vpack.c.bf16 %v3904_v19, %v3903_v17  ;;  %v7321_v21 = vpop.eup %7320  ;;  %v9196_v43 = vld [vmem:[#allocation43_spill] sm:$0xff] }
 0x84c   :  { %3951 = vst [vmem:[#allocation17 + $0x1c0] sm:$0xff] %v3935_v55  ;;  %4191 = vmatprep.subr.bf16.mxu1 %v4064_v23 }
 0x84f   :  { %v7323_v16 = vpop.eup %7322 }
 0x850   :  { %v3937_v38 = vmul.f32 %v7323_v16, %v7321_v21  ;;  %v7325_v63 = vpop.eup %7324 }
 0x851   :  { %v7327_v51 = vpop.eup %7326 }
 0x852   :  { %3953 = vst [vmem:[#allocation17 + $0x1e0] sm:$0xff] %v3937_v38 }
 0x853   :  { %v7329_v9 = vpop.eup %7328 }
 0x854   :  { %v7331_v33 = vpop.eup %7330  ;;  %v3938_v53 = vmul.f32 %v7329_v9, %v7327_v51 }
 0x855   :  { %v3936_v0 = vmul.f32 %v7331_v33, %v7325_v63 }
 0x856   :  { %3954 = vst [vmem:[#allocation17 + $0x1f0] sm:$0xff] %v3938_v53  ;;  %v4065_v27 = vpack.c.bf16 %v3938_v53, %v3937_v38 }
 0x857   :  { %3952 = vst [vmem:[#allocation17 + $0x1d0] sm:$0xff] %v3936_v0  ;;  %v4063_v11 = vpack.c.bf16 %v3936_v0, %v3935_v55 }
 0x859   :  { %4192 = vmatpush1.bf16.msra.mxu1 %v4063_v11 }
 0x85a   :  { %4193 = vmatprep.subr.bf16.mxu1 %v4066_v18  ;;  %v9197_v18 = vld [vmem:[#allocation46_spill] sm:$0xff] }
 0x85d   :  { %4194 = vmatpush1.bf16.msra.mxu1 %v4065_v27 }
 0x860   :  { %4196 = vmatmul.mubr.bf16.vlgmr.msra.gmra.mrb[176].mxu1 %v6812_v36  ;;  %v6836_v36 = vld [vmem:[#allocation7 + $0xc8] ss:$12 sps:$4 sm:$0xff]  }
 0x861   :  { %4205 = vmatprep.mubr.bf16.mxu1 %v6815_v7 }
 0x868   :  { %4206 = vmatmul.mubr.bf16.gmra.mrb[180].mxu1 %v6817_v15 }
 0x869   :  { %4215 = vmatprep.mubr.bf16.mxu1 %v6818_v31  ;;  %v6837_v31 = vld [vmem:[#allocation7 + $0xe0] ss:$12 sps:$4 sm:$0xff]  }
 0x870   :  { %4216 = vmatmul.mubr.bf16.gmra.mrb[184].mxu1 %v6820_v6  ;;  %v6838_v6 = vld [vmem:[#allocation7 + $0xf8] ss:$12 sps:$4 sm:$0xff]  }
 0x871   :  { %4225 = vmatprep.mubr.bf16.mxu1 %v6821_v61  ;;  %v6839_v61 = vld [vmem:[#allocation7 + $0x110] ss:$12 sps:$4 sm:$0xff]  }
 0x878   :  { %4226 = vmatmul.mubr.bf16.gmra.mrb[188].mxu1 %v6823_v3  ;;  %v6840_v3 = vld [vmem:[#allocation7 + $0x128] ss:$12 sps:$4 sm:$0xff]  }
 0x879   :  { %4235 = vmatprep.mubr.bf16.mxu1 %v6824_v32  ;;  %v6841_v32 = vld [vmem:[#allocation7 + $0x140] ss:$12 sps:$4 sm:$0xff]  }
 0x880   :  { %4236 = vmatmul.mubr.bf16.gmra.mrb[192].mxu1 %v6826_v48  ;;  %v6842_v48 = vld [vmem:[#allocation7 + $0x158] ss:$12 sps:$4 sm:$0xff]  }
 0x881   :  { %4245 = vmatprep.mubr.bf16.mxu1 %v6827_v58  ;;  %v6843_v58 = vld [vmem:[#allocation7 + $0x170] ss:$12 sps:$4 sm:$0xff]  }
 0x888   :  { %4246 = vmatmul.mubr.bf16.gmra.mrb[196].mxu1 %v6829_v24  ;;  %v6861_v24 = vld [vmem:[#allocation14 + $0x8] ss:$12 sps:$4 sm:$0xff]  }
 0x889   :  { %4255 = vmatprep.mubr.bf16.mxu1 %v6830_v25  ;;  %v6865_v25 = vld [vmem:[#allocation14 + $0x20] ss:$12 sps:$4 sm:$0xff]  }
 0x890   :  { %4256 = vmatmul.mubr.bf16.gmra.mrb[200].mxu1 %v6832_v34 }
 0x891   :  { %4265 = vmatprep.mubr.bf16.mxu1 %v6833_v14 }
 0x898   :  { %4266 = vmatmul.mubr.bf16.gmra.mrb[204].mxu1 %v6835_v8 }
 0x899   :  { %4830 = vmatprep.mubr.bf16.mxu1 %v9190_v40 }
 0x933   :  { %v4197_v41 = vpop.f32.mrb[176].mxu1 }
 0x934   :  { %v8842_v54 = vpop.f32.mrb[177].mxu1 }
 0x935   :  { %v4201_v50 = vpop.f32.mrb[178].mxu1 }
 0x936   :  { %v8844_v5 = vpack.c.bf16 %v4201_v50, %v4197_v41  ;;  %v8846_v52 = vpop.f32.mrb[179].mxu1  ;;  %v6869_v41 = vld [vmem:[#allocation14 + $0x38] ss:$12 sps:$4 sm:$0xff]  }
 0x938   :  { %6320 = vmatprep.mubr.bf16.mxu0 %v8844_v5 }
 0x93b   :  { %v4207_v47 = vpop.f32.mrb[180].mxu1 }
 0x93c   :  { %v8849_v46 = vpop.f32.mrb[181].mxu1 }
 0x93d   :  { %v4211_v17 = vpop.f32.mrb[182].mxu1 }
 0x93e   :  { %v8851_v45 = vpack.c.bf16 %v4211_v17, %v4207_v47  ;;  %v8853_v57 = vpop.f32.mrb[183].mxu1 }
 0x940   :  { %6321 = vmatmul.mubr.bf16.vlgmr.msra.gmra.mrb[0].mxu0 %v8851_v45 }
 0x941   :  { %6337 = vmatpush3.bf16.msra.mxu0 %v8455_v26 }
 0x942   :  { %6338 = vmatprep.subr.bf16.mxu0 %v9191_v37 }
 0x943   :  { %v4217_v39 = vpop.f32.mrb[184].mxu1 }
 0x944   :  { %v8858_v1 = vpop.f32.mrb[185].mxu1 }
 0x945   :  { %6339 = vmatpush3.bf16.msra.mxu0 %v9191_v37  ;;  %v4221_v28 = vpop.f32.mrb[186].mxu1 }
 0x946   :  { %6340 = vmatprep.subr.bf16.mxu0 %v9192_v56  ;;  %v8862_v44 = vpack.c.bf16 %v4221_v28, %v4217_v39  ;;  %v8864_v10 = vpop.f32.mrb[187].mxu1  ;;  %v6873_v28 = vld [vmem:[#allocation14 + $0x50] ss:$12 sps:$4 sm:$0xff]  }
 0x948   :  { %6324 = vmatprep.mubr.bf16.mxu0 %v8862_v44 }
 0x949   :  { %6341 = vmatpush3.bf16.msra.mxu0 %v9192_v56 }
 0x94a   :  { %6342 = vmatprep.subr.bf16.mxu0 %v9193_v49 }
 0x94b   :  { %v4227_v26 = vpop.f32.mrb[188].mxu1 }
 0x94c   :  { %v8869_v35 = vpop.f32.mrb[189].mxu1 }
 0x94d   :  { %6343 = vmatpush3.bf16.msra.mxu0 %v9193_v49  ;;  %v4231_v22 = vpop.f32.mrb[190].mxu1 }
 0x94e   :  { %6344 = vmatprep.subr.bf16.mxu0 %v9194_v42  ;;  %v8873_v2 = vpack.c.bf16 %v4231_v22, %v4227_v26  ;;  %v8875_v30 = vpop.f32.mrb[191].mxu1  ;;  %v6877_v22 = vld [vmem:[#allocation14 + $0x68] ss:$12 sps:$4 sm:$0xff]  }
 0x950   :  { %6325 = vmatmul.mubr.bf16.gmra.mrb[4].mxu0 %v8873_v2 }
 0x951   :  { %6345 = vmatpush3.bf16.msra.mxu0 %v9194_v42 }
 0x952   :  { %6346 = vmatprep.subr.bf16.mxu0 %v9195_v29 }
 0x953   :  { %v4237_v4 = vpop.f32.mrb[192].mxu1 }
 0x954   :  { %v8880_v20 = vpop.f32.mrb[193].mxu1 }
 0x955   :  { %6347 = vmatpush3.bf16.msra.mxu0 %v9195_v29  ;;  %v4241_v62 = vpop.f32.mrb[194].mxu1 }
 0x956   :  { %6348 = vmatprep.subr.bf16.mxu0 %v9196_v43  ;;  %v8884_v19 = vpack.c.bf16 %v4241_v62, %v4237_v4  ;;  %v8886_v12 = vpop.f32.mrb[195].mxu1 }
 0x958   :  { %6328 = vmatprep.mubr.bf16.mxu0 %v8884_v19 }
 0x959   :  { %6349 = vmatpush3.bf16.msra.mxu0 %v9196_v43 }
 0x95a   :  { %6350 = vmatprep.subr.bf16.mxu0 %v9197_v18 }
 0x95b   :  { %v4247_v55 = vpop.f32.mrb[196].mxu1 }
 0x95c   :  { %v8891_v23 = vpop.f32.mrb[197].mxu1 }
 0x95d   :  { %6351 = vmatpush3.bf16.msra.mxu0 %v9197_v18  ;;  %v4251_v21 = vpop.f32.mrb[198].mxu1 }
 0x95e   :  { %v8894_v16 = vpack.c.bf16 %v4251_v21, %v4247_v55  ;;  %v8896_v38 = vpop.f32.mrb[199].mxu1  ;;  %6368 = vmatprep.subr.bf16.mxu0 %v6861_v24 }
 0x960   :  { %6329 = vmatmul.mubr.bf16.gmra.mrb[8].mxu0 %v8894_v16 }
 0x963   :  { %v4257_v63 = vpop.f32.mrb[200].mxu1 }
 0x964   :  { %v8899_v51 = vpop.f32.mrb[201].mxu1 }
 0x965   :  { %v4261_v9 = vpop.f32.mrb[202].mxu1 }
 0x966   :  { %v8901_v33 = vpack.c.bf16 %v4261_v9, %v4257_v63  ;;  %v8903_v53 = vpop.f32.mrb[203].mxu1 }
 0x968   :  { %6332 = vmatprep.mubr.bf16.mxu0 %v8901_v33 }
 0x96b   :  { %v4267_v0 = vpop.f32.mrb[204].mxu1 }
 0x96c   :  { %v8906_v27 = vpop.f32.mrb[205].mxu1 }
 0x96d   :  { %v4271_v11 = vpop.f32.mrb[206].mxu1 }
 0x96e   :  { %v8908_v7 = vpack.c.bf16 %v4271_v11, %v4267_v0  ;;  %v8910_v15 = vpop.f32.mrb[207].mxu1 }
 0x970   :  { %6333 = vmatmul.mubr.bf16.gmra.mrb[12].mxu0 %v8908_v7 }
 0x971   :  { %6352 = vmatprep.mubr.bf16.mxu0 %v6836_v36 }
 0x978   :  { %6353 = vmatmul.mubr.bf16.vlgmr.msra.gmra.mrb[0].mxu0 %v6837_v31 }
 0x979   :  { %6356 = vmatprep.mubr.bf16.mxu0 %v6838_v6  ;;  %6369 = vmatpush3.bf16.msra.mxu0 %v6861_v24 }
 0x97a   :  { %6370 = vmatprep.subr.bf16.mxu0 %v6865_v25 }
 0x97d   :  { %6371 = vmatpush3.bf16.msra.mxu0 %v6865_v25 }
 0x97e   :  { %6372 = vmatprep.subr.bf16.mxu0 %v6869_v41 }
 0x980   :  { %6357 = vmatmul.mubr.bf16.gmra.mrb[4].mxu0 %v6839_v61 }
 0x981   :  { %6360 = vmatprep.mubr.bf16.mxu0 %v6840_v3  ;;  %6373 = vmatpush3.bf16.msra.mxu0 %v6869_v41 }
 0x982   :  { %6374 = vmatprep.subr.bf16.mxu0 %v6873_v28 }
 0x985   :  { %6375 = vmatpush3.bf16.msra.mxu0 %v6873_v28 }
 0x986   :  { %6376 = vmatprep.subr.bf16.mxu0 %v6877_v22 }
 0x988   :  { %6361 = vmatmul.mubr.bf16.gmra.mrb[8].mxu0 %v6841_v32 }
 0x989   :  { %6364 = vmatprep.mubr.bf16.mxu0 %v6842_v48  ;;  %6377 = vmatpush3.bf16.msra.mxu0 %v6877_v22 }
 0x990   :  { %6365 = vmatmul.mubr.bf16.gmra.mrb[12].mxu0 %v6843_v58 }
 0xa4b   :  { %v6354_v34 = vpop.f32.mrb[0].mxu0 }
 0xa4c   :  { %v5938_v14 = vmul.f32 -1.442695, %v6354_v34  ;;  %v4551_v8 = vpop.f32.mrb[1].mxu0 }
 0xa4d   :  { %v5936_v50 = vmul.f32 -1.442695, %v4551_v8  ;;  %v6355_v47 = vpop.f32.mrb[2].mxu0 }
 0xa4e   :  { %7332 = vpow2.f32 %v5938_v14  ;;  %v5939_v17 = vmul.f32 -1.442695, %v6355_v47  ;;  %v4554_v37 = vpop.f32.mrb[3].mxu0 }
 0xa4f   :  { %7334 = vpow2.f32 %v5936_v50  ;;  %v5937_v39 = vmul.f32 -1.442695, %v4554_v37 }
 0xa50   :  { %7336 = vpow2.f32 %v5939_v17 }
 0xa51   :  { %7338 = vpow2.f32 %v5937_v39 }
 0xa53   :  { %v6358_v56 = vpop.f32.mrb[4].mxu0 }
 0xa54   :  { %v5942_v49 = vmul.f32 -1.442695, %v6358_v56  ;;  %v4567_v26 = vpop.f32.mrb[5].mxu0 }
 0xa55   :  { %v5940_v42 = vmul.f32 -1.442695, %v4567_v26  ;;  %v6359_v29 = vpop.f32.mrb[6].mxu0 }
 0xa56   :  { %7340 = vpow2.f32 %v5942_v49  ;;  %v5943_v4 = vmul.f32 -1.442695, %v6359_v29  ;;  %v4570_v62 = vpop.f32.mrb[7].mxu0 }
 0xa57   :  { %7342 = vpow2.f32 %v5940_v42  ;;  %v5941_v43 = vmul.f32 -1.442695, %v4570_v62 }
 0xa58   :  { %v7333_v18 = vpop.eup %7332  ;;  %7344 = vpow2.f32 %v5943_v4 }
 0xa59   :  { %v7335_v55 = vpop.eup %7334  ;;  %v4664_v21 = vadd.f32 1.0, %v7333_v18  ;;  %7346 = vpow2.f32 %v5941_v43 }
 0xa5a   :  { %v7337_v63 = vpop.eup %7336  ;;  %v4662_v9 = vadd.f32 1.0, %v7335_v55 }
 0xa5b   :  { %v7339_v0 = vpop.eup %7338  ;;  %7348 = vrcp.f32 %v4664_v21  ;;  %v4665_v11 = vadd.f32 1.0, %v7337_v63  ;;  %v6362_v36 = vpop.f32.mrb[8].mxu0 }
 0xa5c   :  { %7350 = vrcp.f32 %v4662_v9  ;;  %v4663_v31 = vadd.f32 1.0, %v7339_v0  ;;  %v5946_v6 = vmul.f32 -1.442695, %v6362_v36  ;;  %v4583_v61 = vpop.f32.mrb[9].mxu0 }
 0xa5d   :  { %7352 = vrcp.f32 %v4665_v11  ;;  %v5944_v3 = vmul.f32 -1.442695, %v4583_v61  ;;  %v6363_v32 = vpop.f32.mrb[10].mxu0 }
 0xa5e   :  { %7354 = vrcp.f32 %v4663_v31  ;;  %v5947_v48 = vmul.f32 -1.442695, %v6363_v32  ;;  %v4586_v58 = vpop.f32.mrb[11].mxu0 }
 0xa5f   :  { %7356 = vpow2.f32 %v5946_v6  ;;  %v5945_v24 = vmul.f32 -1.442695, %v4586_v58 }
 0xa60   :  { %v7341_v25 = vpop.eup %7340  ;;  %7358 = vpow2.f32 %v5944_v3 }
 0xa61   :  { %v7343_v34 = vpop.eup %7342  ;;  %v4668_v14 = vadd.f32 1.0, %v7341_v25  ;;  %7360 = vpow2.f32 %v5947_v48 }
 0xa62   :  { %v7345_v8 = vpop.eup %7344  ;;  %v4666_v41 = vadd.f32 1.0, %v7343_v34  ;;  %7362 = vpow2.f32 %v5945_v24 }
 0xa63   :  { %v7347_v50 = vpop.eup %7346  ;;  %7364 = vrcp.f32 %v4668_v14  ;;  %v4669_v47 = vadd.f32 1.0, %v7345_v8  ;;  %v6366_v17 = vpop.f32.mrb[12].mxu0 }
 0xa64   :  { %7366 = vrcp.f32 %v4666_v41  ;;  %v4667_v37 = vadd.f32 1.0, %v7347_v50  ;;  %v5950_v39 = vmul.f32 -1.442695, %v6366_v17  ;;  %v4599_v28 = vpop.f32.mrb[13].mxu0 }
 0xa65   :  { %v7349_v56 = vpop.eup %7348  ;;  %7368 = vrcp.f32 %v4669_v47  ;;  %v5948_v49 = vmul.f32 -1.442695, %v4599_v28  ;;  %v6367_v26 = vpop.f32.mrb[14].mxu0 }
 0xa66   :  { %v7351_v22 = vpop.eup %7350  ;;  %7370 = vrcp.f32 %v4667_v37  ;;  %v5951_v42 = vmul.f32 -1.442695, %v6367_v26  ;;  %v4602_v29 = vpop.f32.mrb[15].mxu0  ;;  %v4728_v4 = vmul.f32 %v7349_v56, %v8849_v46 }
 0xa67   :  { %v7353_v62 = vpop.eup %7352  ;;  %7372 = vpow2.f32 %v5950_v39  ;;  %v5949_v43 = vmul.f32 -1.442695, %v4602_v29  ;;  %v4726_v18 = vmul.f32 %v7351_v22, %v8842_v54 }
 0xa68   :  { %v7355_v55 = vpop.eup %7354  ;;  %7374 = vpow2.f32 %v5948_v49  ;;  %v4729_v21 = vmul.f32 %v7353_v62, %v8853_v57 }
 0xa69   :  { %v7357_v63 = vpop.eup %7356  ;;  %7376 = vpow2.f32 %v5951_v42  ;;  %v4727_v9 = vmul.f32 %v7355_v55, %v8846_v52  ;;  %v6858_v55 = vld [vmem:[#allocation14 + $0x30] ss:$12 sps:$4 sm:$0xff]  }
 0xa6a   :  { %v7359_v0 = vpop.eup %7358  ;;  %v4672_v11 = vadd.f32 1.0, %v7357_v63  ;;  %7378 = vpow2.f32 %v5949_v43  ;;  %v4743_v36 = vpack.c.bf16 %v4729_v21, %v4728_v4  ;;  %v6868_v21 = vld [vmem:[#allocation14 + $0x64] ss:$12 sps:$4 sm:$0xff]  }
 0xa6b   :  { %v7361_v31 = vpop.eup %7360  ;;  %v4670_v6 = vadd.f32 1.0, %v7359_v0  ;;  %v4742_v46 = vpack.c.bf16 %v4727_v9, %v4726_v18  ;;  %v6844_v18 = vld [vmem:[#allocation8 + $0x104] ss:$8 sps:$4 sm:$0xff]   ;;  %v6872_v0 = vld [vmem:[#allocation14 + $0x7c] ss:$12 sps:$4 sm:$0xff]  }
 0xa6c   :  { %v7363_v61 = vpop.eup %7362  ;;  %7380 = vrcp.f32 %v4672_v11  ;;  %v4673_v3 = vadd.f32 1.0, %v7361_v31  ;;  %v6846_v63 = vld [vmem:[#allocation8 + $0x124] ss:$8 sps:$4 sm:$0xff]   ;;  %v6847_v31 = vld [vmem:[#allocation8 + $0x134] ss:$8 sps:$4 sm:$0xff]  }
 0xa6d   :  { %v7365_v32 = vpop.eup %7364  ;;  %7382 = vrcp.f32 %v4670_v6  ;;  %v4671_v54 = vadd.f32 1.0, %v7363_v61  ;;  %4798 = vmatprep.subr.bf16.mxu1 %v4742_v46  ;;  %v6866_v9 = vld [vmem:[#allocation14 + $0x60] ss:$12 sps:$4 sm:$0xff]   ;;  %v6870_v11 = vld [vmem:[#allocation14 + $0x78] ss:$12 sps:$4 sm:$0xff]  }
 0xa6e   :  { %v7367_v48 = vpop.eup %7366  ;;  %7384 = vrcp.f32 %v4673_v3  ;;  %4799 = vmatpush1.bf16.msra.mxu1 %v8844_v5  ;;  %v4732_v52 = vmul.f32 %v7365_v32, %v8869_v35  ;;  %v6874_v6 = vld [vmem:[#allocation14 + $0x90] ss:$12 sps:$4 sm:$0xff]   ;;  %v6848_v46 = vld [vmem:[#allocation8 + $0x144] ss:$8 sps:$4 sm:$0xff]  }
 0xa6f   :  { %v7369_v57 = vpop.eup %7368  ;;  %7386 = vrcp.f32 %v4671_v54  ;;  %4800 = vmatprep.subr.bf16.mxu1 %v4743_v36  ;;  %v4730_v58 = vmul.f32 %v7367_v48, %v8858_v1  ;;  %v6876_v36 = vld [vmem:[#allocation14 + $0x94] ss:$12 sps:$4 sm:$0xff]   ;;  %v6850_v3 = vld [vmem:[#allocation8 + $0x164] ss:$8 sps:$4 sm:$0xff]  }
 0xa70   :  { %v7371_v24 = vpop.eup %7370  ;;  %v4733_v25 = vmul.f32 %v7369_v57, %v8875_v30  ;;  %v6849_v61 = vld [vmem:[#allocation8 + $0x154] ss:$8 sps:$4 sm:$0xff]   ;;  %v6880_v48 = vld [vmem:[#allocation14 + $0xac] ss:$12 sps:$4 sm:$0xff]  }
 0xa71   :  { %v7373_v34 = vpop.eup %7372  ;;  %v4731_v14 = vmul.f32 %v7371_v24, %v8864_v10  ;;  %v6851_v32 = vld [vmem:[#allocation8 + $0x174] ss:$8 sps:$4 sm:$0xff]   ;;  %v6882_v57 = vld [vmem:[#allocation14 + $0x98] ss:$12 sps:$4 sm:$0xff]  }
 0xa72   :  { %v7375_v8 = vpop.eup %7374  ;;  %v4676_v41 = vadd.f32 1.0, %v7373_v34  ;;  %4801 = vmatpush1.bf16.msra.mxu1 %v8851_v45  ;;  %v4745_v50 = vpack.c.bf16 %v4733_v25, %v4732_v52  ;;  %v6878_v54 = vld [vmem:[#allocation14 + $0xa8] ss:$12 sps:$4 sm:$0xff]   ;;  %v6881_v52 = vld [vmem:[#allocation14 + $0x80] ss:$12 sps:$4 sm:$0xff]  }
 0xa73   :  { %v7377_v47 = vpop.eup %7376  ;;  %v4674_v5 = vadd.f32 1.0, %v7375_v8  ;;  %v4744_v17 = vpack.c.bf16 %v4731_v14, %v4730_v58  ;;  %6378 = vmatprep.subr.bf16.mxu0 %v6881_v52  ;;  %v6883_v58 = vld [vmem:[#allocation14 + $0xb0] ss:$12 sps:$4 sm:$0xff]  }
 0xa74   :  { %v7379_v35 = vpop.eup %7378  ;;  %7388 = vrcp.f32 %v4676_v41  ;;  %v4677_v37 = vadd.f32 1.0, %v7377_v47  ;;  %6379 = vmatpush3.bf16.msra.mxu0 %v6881_v52  ;;  %v9200_v52 = vld [vmem:[#allocation27_spill] sm:$0xff] }
 0xa75   :  { %7390 = vrcp.f32 %v4674_v5  ;;  %v4675_v39 = vadd.f32 1.0, %v7379_v35  ;;  %4802 = vmatprep.subr.bf16.mxu1 %v4744_v17  ;;  %6380 = vmatprep.subr.bf16.mxu0 %v6882_v57 }
 0xa76   :  { %v7381_v1 = vpop.eup %7380  ;;  %7392 = vrcp.f32 %v4677_v37  ;;  %4803 = vmatpush1.bf16.msra.mxu1 %v8862_v44 }
 0xa77   :  { %v7383_v30 = vpop.eup %7382  ;;  %7394 = vrcp.f32 %v4675_v39  ;;  %4804 = vmatprep.subr.bf16.mxu1 %v4745_v50  ;;  %v4736_v10 = vmul.f32 %v7381_v1, %v8891_v23 }
 0xa78   :  { %v7385_v45 = vpop.eup %7384  ;;  %v4734_v28 = vmul.f32 %v7383_v30, %v8880_v20  ;;  %6381 = vmatpush3.bf16.msra.mxu0 %v6882_v57  ;;  %v1933_v57 = vadd.f32 %v9200_v52, %v8252_v13 }
 0xa79   :  { %v7387_v56 = vpop.eup %7386  ;;  %v4737_v49 = vmul.f32 %v7385_v45, %v8896_v38  ;;  %6382 = vmatprep.subr.bf16.mxu0 %v6883_v58 }
 0xa7a   :  { %4805 = vmatpush1.bf16.msra.mxu1 %v8873_v2  ;;  %v4735_v26 = vmul.f32 %v7387_v56, %v8886_v12 }
 0xa7b   :  { %v4747_v22 = vpack.c.bf16 %v4737_v49, %v4736_v10 }
 0xa7c   :  { %v4746_v42 = vpack.c.bf16 %v4735_v26, %v4734_v28  ;;  %6383 = vmatpush3.bf16.msra.mxu0 %v6883_v58 }
 0xa7e   :  { %v7389_v29 = vpop.eup %7388  ;;  %4806 = vmatprep.subr.bf16.mxu1 %v4746_v42 }
 0xa7f   :  { %v7391_v44 = vpop.eup %7390  ;;  %4807 = vmatpush1.bf16.msra.mxu1 %v8884_v19  ;;  %v4740_v4 = vmul.f32 %v7389_v29, %v8906_v27  ;;  %v6854_v19 = vld [vmem:[#allocation14 + $0x4] ss:$12 sps:$4 sm:$0xff]   ;;  %v6852_v27 = vld [vmem:[#allocation14] ss:$12 sps:$4 sm:$0xff]  }
 0xa80   :  { %v7393_v23 = vpop.eup %7392  ;;  %4808 = vmatprep.subr.bf16.mxu1 %v4747_v22  ;;  %v4738_v20 = vmul.f32 %v7391_v44, %v8899_v51  ;;  %v6857_v51 = vld [vmem:[#allocation14 + $0x1c] ss:$12 sps:$4 sm:$0xff]  }
 0xa81   :  { %v7395_v62 = vpop.eup %7394  ;;  %v4741_v38 = vmul.f32 %v7393_v23, %v8910_v15  ;;  %v6845_v15 = vld [vmem:[#allocation8 + $0x114] ss:$8 sps:$4 sm:$0xff]  }
 0xa82   :  { %v4739_v2 = vmul.f32 %v7395_v62, %v8903_v53  ;;  %v6855_v53 = vld [vmem:[#allocation14 + $0x18] ss:$12 sps:$4 sm:$0xff]  }
 0xa83   :  { %4809 = vmatpush1.bf16.msra.mxu1 %v8894_v16  ;;  %v4749_v12 = vpack.c.bf16 %v4741_v38, %v4740_v4  ;;  %v6860_v16 = vld [vmem:[#allocation14 + $0x34] ss:$12 sps:$4 sm:$0xff]  }
 0xa84   :  { %v4748_v43 = vpack.c.bf16 %v4739_v2, %v4738_v20 }
 0xa86   :  { %4810 = vmatprep.subr.bf16.mxu1 %v4748_v43 }
 0xa87   :  { %4811 = vmatpush1.bf16.msra.mxu1 %v8901_v33  ;;  %v6864_v33 = vld [vmem:[#allocation14 + $0x4c] ss:$12 sps:$4 sm:$0xff]  }
 0xa88   :  { %4812 = vmatprep.subr.bf16.mxu1 %v4749_v12 }
 0xa8b   :  { %4813 = vmatpush1.bf16.msra.mxu1 %v8908_v7  ;;  %v6862_v7 = vld [vmem:[#allocation14 + $0x48] ss:$12 sps:$4 sm:$0xff]  }
 0xa8c   :  { %5079 = vmatprep.subr.bf16.mxu1 %v6854_v19 }
 0xa8e   :  { %4831 = vmatmul.mubr.bf16.vlgmr.msra.gmra.mrb[208].mxu1 %v6844_v18 }
 0xa8f   :  { %4840 = vmatprep.mubr.bf16.mxu1 %v9190_v40  ;;  %5080 = vmatpush1.bf16.msra.mxu1 %v6852_v27 }
 0xa90   :  { %5081 = vmatprep.subr.bf16.mxu1 %v6857_v51 }
 0xa93   :  { %5082 = vmatpush1.bf16.msra.mxu1 %v6855_v53 }
 0xa94   :  { %5083 = vmatprep.subr.bf16.mxu1 %v6860_v16 }
 0xa96   :  { %4841 = vmatmul.mubr.bf16.gmra.mrb[212].mxu1 %v6845_v15 }
 0xa97   :  { %4850 = vmatprep.mubr.bf16.mxu1 %v9190_v40  ;;  %5084 = vmatpush1.bf16.msra.mxu1 %v6858_v55 }
 0xa98   :  { %5085 = vmatprep.subr.bf16.mxu1 %v6864_v33 }
 0xa9b   :  { %5086 = vmatpush1.bf16.msra.mxu1 %v6862_v7 }
 0xa9c   :  { %5087 = vmatprep.subr.bf16.mxu1 %v6868_v21 }
 0xa9e   :  { %4851 = vmatmul.mubr.bf16.gmra.mrb[216].mxu1 %v6846_v63 }
 0xa9f   :  { %4860 = vmatprep.mubr.bf16.mxu1 %v9190_v40  ;;  %5088 = vmatpush1.bf16.msra.mxu1 %v6866_v9 }
 0xaa0   :  { %5089 = vmatprep.subr.bf16.mxu1 %v6872_v0 }
 0xaa3   :  { %5090 = vmatpush1.bf16.msra.mxu1 %v6870_v11 }
 0xaa4   :  { %5091 = vmatprep.subr.bf16.mxu1 %v6876_v36 }
 0xaa6   :  { %4861 = vmatmul.mubr.bf16.gmra.mrb[220].mxu1 %v6847_v31 }
 0xaa7   :  { %4870 = vmatprep.mubr.bf16.mxu1 %v9190_v40  ;;  %5092 = vmatpush1.bf16.msra.mxu1 %v6874_v6  ;;  %v9198_v6 = vld [vmem:[#allocation26_spill] sm:$0xff] }
 0xaa8   :  { %5093 = vmatprep.subr.bf16.mxu1 %v6880_v48 }
 0xaab   :  { %5094 = vmatpush1.bf16.msra.mxu1 %v6878_v54 }
 0xaae   :  { %4871 = vmatmul.mubr.bf16.gmra.mrb[224].mxu1 %v6848_v46  ;;  %v1929_v46 = vadd.f32 %v9198_v6, %v8252_v13 }
 0xaaf   :  { %4880 = vmatprep.mubr.bf16.mxu1 %v9190_v40 }
 0xab6   :  { %4881 = vmatmul.mubr.bf16.gmra.mrb[228].mxu1 %v6849_v61 }
 0xab7   :  { %4890 = vmatprep.mubr.bf16.mxu1 %v9190_v40 }
 0xabe   :  { %4891 = vmatmul.mubr.bf16.gmra.mrb[232].mxu1 %v6850_v3  ;;  %v9199_v3 = vld [vmem:[#allocation24_spill] sm:$0xff] }
 0xabf   :  { %4900 = vmatprep.mubr.bf16.mxu1 %v9190_v40 }
 0xac6   :  { %4901 = vmatmul.mubr.bf16.gmra.mrb[236].mxu1 %v6851_v32  ;;  %v1919_v32 = vadd.f32 %v9199_v3, %v8252_v13 }
 0xac7   :  { %5111 = vmatprep.mubr.bf16.mxu1 %v9190_v40 }
 0xb61   :  { %v4832_v24 = vpop.f32.mrb[208].mxu1 }
 0xb62   :  { %v8945_v25 = vpop.f32.mrb[209].mxu1 }
 0xb63   :  { %v4836_v34 = vpop.f32.mrb[210].mxu1 }
 0xb64   :  { %v4911_v14 = vpack.c.bf16 %v4836_v34, %v4832_v24  ;;  %v8947_v8 = vpop.f32.mrb[211].mxu1 }
 0xb66   :  { %5112 = vmatmul.mubr.bf16.vlgmr.msra.gmra.mrb[96].mxu1 %v4911_v14  ;;  %6384 = vmatprep.mubr.bf16.mxu0 %v4911_v14 }
 0xb67   :  { %5121 = vmatprep.mubr.bf16.mxu1 %v9190_v40 }
 0xb69   :  { %v4842_v41 = vpop.f32.mrb[212].mxu1 }
 0xb6a   :  { %v8950_v50 = vpop.f32.mrb[213].mxu1 }
 0xb6b   :  { %v4846_v47 = vpop.f32.mrb[214].mxu1 }
 0xb6c   :  { %v4912_v5 = vpack.c.bf16 %v4846_v47, %v4842_v41  ;;  %v8952_v17 = vpop.f32.mrb[215].mxu1  ;;  %v9201_v41 = vld [vmem:[#allocation25_spill] sm:$0xff] }
 0xb6d   :  { %v1923_v47 = vadd.f32 %v9201_v41, %v8252_v13 }
 0xb6e   :  { %5122 = vmatmul.mubr.bf16.gmra.mrb[100].mxu1 %v4912_v5  ;;  %6385 = vmatmul.mubr.bf16.vlgmr.msra.gmra.mrb[16].mxu0 %v4912_v5 }
 0xb6f   :  { %5131 = vmatprep.mubr.bf16.mxu1 %v9190_v40 }
 0xb71   :  { %v4852_v35 = vpop.f32.mrb[216].mxu1 }
 0xb72   :  { %v8955_v37 = vpop.f32.mrb[217].mxu1 }
 0xb73   :  { %v4856_v39 = vpop.f32.mrb[218].mxu1 }
 0xb74   :  { %v4913_v1 = vpack.c.bf16 %v4856_v39, %v4852_v35  ;;  %v8957_v30 = vpop.f32.mrb[219].mxu1 }
 0xb76   :  { %5132 = vmatmul.mubr.bf16.gmra.mrb[104].mxu1 %v4913_v1  ;;  %6388 = vmatprep.mubr.bf16.mxu0 %v4913_v1 }
 0xb77   :  { %5141 = vmatprep.mubr.bf16.mxu1 %v9190_v40 }
 0xb79   :  { %v4862_v10 = vpop.f32.mrb[220].mxu1 }
 0xb7a   :  { %v8960_v45 = vpop.f32.mrb[221].mxu1 }
 0xb7b   :  { %v4866_v28 = vpop.f32.mrb[222].mxu1 }
 0xb7c   :  { %v4914_v56 = vpack.c.bf16 %v4866_v28, %v4862_v10  ;;  %v8962_v49 = vpop.f32.mrb[223].mxu1 }
 0xb7e   :  { %5142 = vmatmul.mubr.bf16.gmra.mrb[108].mxu1 %v4914_v56  ;;  %6389 = vmatmul.mubr.bf16.gmra.mrb[20].mxu0 %v4914_v56 }
 0xb7f   :  { %5151 = vmatprep.mubr.bf16.mxu1 %v9190_v40 }
 0xb81   :  { %v4872_v26 = vpop.f32.mrb[224].mxu1 }
 0xb82   :  { %v8965_v22 = vpop.f32.mrb[225].mxu1 }
 0xb83   :  { %v4876_v42 = vpop.f32.mrb[226].mxu1 }
 0xb84   :  { %v4915_v29 = vpack.c.bf16 %v4876_v42, %v4872_v26  ;;  %v8967_v44 = vpop.f32.mrb[227].mxu1 }
 0xb86   :  { %5152 = vmatmul.mubr.bf16.gmra.mrb[112].mxu1 %v4915_v29  ;;  %6392 = vmatprep.mubr.bf16.mxu0 %v4915_v29 }
 0xb87   :  { %5161 = vmatprep.mubr.bf16.mxu1 %v9190_v40 }
 0xb89   :  { %v4882_v4 = vpop.f32.mrb[228].mxu1 }
 0xb8a   :  { %v8970_v23 = vpop.f32.mrb[229].mxu1 }
 0xb8b   :  { %v4886_v20 = vpop.f32.mrb[230].mxu1 }
 0xb8c   :  { %v4916_v62 = vpack.c.bf16 %v4886_v20, %v4882_v4  ;;  %v8972_v38 = vpop.f32.mrb[231].mxu1 }
 0xb8e   :  { %5162 = vmatmul.mubr.bf16.gmra.mrb[116].mxu1 %v4916_v62  ;;  %6393 = vmatmul.mubr.bf16.gmra.mrb[24].mxu0 %v4916_v62 }
 0xb8f   :  { %5171 = vmatprep.mubr.bf16.mxu1 %v9190_v40 }
 0xb91   :  { %v4892_v2 = vpop.f32.mrb[232].mxu1 }
 0xb92   :  { %v8975_v12 = vpop.f32.mrb[233].mxu1 }
 0xb93   :  { %v4896_v43 = vpop.f32.mrb[234].mxu1 }
 0xb94   :  { %v4917_v19 = vpack.c.bf16 %v4896_v43, %v4892_v2  ;;  %v8977_v18 = vpop.f32.mrb[235].mxu1 }
 0xb96   :  { %5172 = vmatmul.mubr.bf16.gmra.mrb[120].mxu1 %v4917_v19  ;;  %6396 = vmatprep.mubr.bf16.mxu0 %v4917_v19 }
 0xb97   :  { %5181 = vmatprep.mubr.bf16.mxu1 %v9190_v40 }
 0xb99   :  { %v4902_v27 = vpop.f32.mrb[236].mxu1 }
 0xb9a   :  { %v8980_v51 = vpop.f32.mrb[237].mxu1 }
 0xb9b   :  { %v4906_v53 = vpop.f32.mrb[238].mxu1 }
 0xb9c   :  { %v4918_v16 = vpack.c.bf16 %v4906_v53, %v4902_v27  ;;  %v8982_v15 = vpop.f32.mrb[239].mxu1 }
 0xb9e   :  { %5182 = vmatmul.mubr.bf16.gmra.mrb[124].mxu1 %v4918_v16  ;;  %6397 = vmatmul.mubr.bf16.gmra.mrb[28].mxu0 %v4918_v16 }
 0xc39   :  { %v5113_v55 = vpop.f32.mrb[96].mxu1 }
 0xc3a   :  { %v6448_v33 = vadd.f32 %v5113_v55, %v8242_v59  ;;  %v5115_v7 = vpop.f32.mrb[97].mxu1 }
 0xc3b   :  { %v6449_v21 = vadd.f32 %v5115_v7, %v8245_v60  ;;  %v5117_v63 = vpop.f32.mrb[98].mxu1 }
 0xc3c   :  { %v5984_v9 = vmul.f32 -1.442695, %v6448_v33  ;;  %v6450_v0 = vadd.f32 %v5117_v63, %v8242_v59  ;;  %v5119_v40 = vpop.f32.mrb[99].mxu1 }
 0xc3d   :  { %v6000_v11 = vmul.f32 -1.442695, %v6449_v21  ;;  %v6451_v36 = vadd.f32 %v5119_v40, %v8245_v60 }
 0xc3e   :  { %7396 = vpow2.f32 %v5984_v9  ;;  %v5985_v31 = vmul.f32 -1.442695, %v6450_v0 }
 0xc3f   :  { %7398 = vpow2.f32 %v6000_v11  ;;  %v6001_v61 = vmul.f32 -1.442695, %v6451_v36 }
 0xc40   :  { %7400 = vpow2.f32 %v5985_v31 }
 0xc41   :  { %v5123_v54 = vpop.f32.mrb[100].mxu1  ;;  %v6386_v48 = vpop.f32.mrb[16].mxu0  ;;  %7402 = vpow2.f32 %v6001_v61  ;;  %v9202_v61 = vld [vmem:[#allocation29_spill] sm:$0xff] }
 0xc42   :  { %v6452_v58 = vadd.f32 %v5123_v54, %v8242_v59  ;;  %v5297_v24 = vadd.f32 %v6386_v48, %v1929_v46  ;;  %v5125_v34 = vpop.f32.mrb[101].mxu1  ;;  %v5226_v14 = vpop.f32.mrb[17].mxu0  ;;  %v1939_v3 = vadd.f32 %v9202_v61, %v8252_v13 }
 0xc43   :  { %v6453_v5 = vadd.f32 %v5125_v34, %v8245_v60  ;;  %v5291_v35 = vadd.f32 %v5226_v14, %v1919_v32  ;;  %v5127_v39 = vpop.f32.mrb[102].mxu1  ;;  %v6387_v1 = vpop.f32.mrb[18].mxu0  ;;  %v9203_v32 = vld [vmem:[#allocation32_spill] sm:$0xff] }
 0xc44   :  { %v5986_v10 = vmul.f32 -1.442695, %v6452_v58  ;;  %v6454_v28 = vadd.f32 %v5127_v39, %v8242_v59  ;;  %v5300_v56 = vadd.f32 %v6387_v1, %v1933_v57  ;;  %v5129_v26 = vpop.f32.mrb[103].mxu1  ;;  %v5229_v42 = vpop.f32.mrb[19].mxu0  ;;  %v1949_v54 = vadd.f32 %v9203_v32, %v8252_v13  ;;  %v9204_v57 = vld [vmem:[#allocation33_spill] sm:$0xff] }
 0xc45   :  { %v6002_v29 = vmul.f32 -1.442695, %v6453_v5  ;;  %v5294_v4 = vadd.f32 %v5229_v42, %v1923_v47  ;;  %v6455_v62 = vadd.f32 %v5129_v26, %v8245_v60  ;;  %v1953_v58 = vadd.f32 %v9204_v57, %v8252_v13 }
 0xc46   :  { %7404 = vpow2.f32 %v5986_v10  ;;  %v5987_v20 = vmul.f32 -1.442695, %v6454_v28 }
 0xc47   :  { %7406 = vpow2.f32 %v6002_v29  ;;  %v6003_v16 = vmul.f32 -1.442695, %v6455_v62  ;;  %v9205_v62 = vld [vmem:[#allocation30_spill] sm:$0xff] }
 0xc48   :  { %v7397_v2 = vpop.eup %7396  ;;  %7408 = vpow2.f32 %v5987_v20 }
 0xc49   :  { %v7399_v43 = vpop.eup %7398  ;;  %v5385_v19 = vadd.f32 1.0, %v7397_v2  ;;  %7410 = vtanh.f32 %v5297_v24  ;;  %v5133_v27 = vpop.f32.mrb[104].mxu1  ;;  %v1943_v2 = vadd.f32 %v9205_v62, %v8252_v13 }
 0xc4a   :  { %v7401_v53 = vpop.eup %7400  ;;  %7412 = vtanh.f32 %v5291_v35  ;;  %v6456_v55 = vadd.f32 %v5133_v27, %v8242_v59  ;;  %v5135_v33 = vpop.f32.mrb[105].mxu1  ;;  %v5481_v11 = vadd.f32 1.0, %v7399_v43 }
 0xc4b   :  { %7414 = vrcp.f32 %v5385_v19  ;;  %v5386_v7 = vadd.f32 1.0, %v7401_v53  ;;  %v6457_v21 = vadd.f32 %v5135_v33, %v8245_v60  ;;  %v5137_v63 = vpop.f32.mrb[106].mxu1  ;;  %v7403_v36 = vpop.eup %7402 }
 0xc4c   :  { %7416 = vtanh.f32 %v5300_v56  ;;  %v5988_v9 = vmul.f32 -1.442695, %v6456_v55  ;;  %v6458_v0 = vadd.f32 %v5137_v63, %v8242_v59  ;;  %v5139_v40 = vpop.f32.mrb[107].mxu1  ;;  %v5482_v24 = vadd.f32 1.0, %v7403_v36 }
 0xc4d   :  { %7418 = vrcp.f32 %v5386_v7  ;;  %v6004_v31 = vmul.f32 -1.442695, %v6457_v21  ;;  %v6459_v6 = vadd.f32 %v5139_v40, %v8245_v60 }
 0xc4e   :  { %7420 = vpow2.f32 %v6003_v16  ;;  %v5989_v48 = vmul.f32 -1.442695, %v6458_v0 }
 0xc4f   :  { %7422 = vtanh.f32 %v5294_v4  ;;  %v6005_v5 = vmul.f32 -1.442695, %v6459_v6 }
 0xc50   :  { %v7405_v46 = vpop.eup %7404  ;;  %7424 = vpow2.f32 %v5988_v9 }
 0xc51   :  { %v7407_v52 = vpop.eup %7406  ;;  %7426 = vrcp.f32 %v5481_v11  ;;  %v5387_v34 = vadd.f32 1.0, %v7405_v46  ;;  %v5143_v14 = vpop.f32.mrb[108].mxu1 }
 0xc52   :  { %v6390_v41 = vpop.f32.mrb[20].mxu0  ;;  %v7409_v47 = vpop.eup %7408  ;;  %7428 = vpow2.f32 %v6004_v31  ;;  %v6460_v35 = vadd.f32 %v5143_v14, %v8242_v59  ;;  %v5483_v55 = vadd.f32 1.0, %v7407_v52 }
 0xc53   :  { %v5309_v39 = vadd.f32 %v6390_v41, %v1949_v54  ;;  %v5145_v1 = vpop.f32.mrb[109].mxu1  ;;  %v5242_v10 = vpop.f32.mrb[21].mxu0  ;;  %7430 = vrcp.f32 %v5387_v34  ;;  %v5388_v56 = vadd.f32 1.0, %v7409_v47  ;;  %v9206_v47 = vld [vmem:[#allocation38_spill] sm:$0xff] }
 0xc54   :  { %v7411_v28 = vpop.eup %7410  ;;  %v6461_v26 = vadd.f32 %v5145_v1, %v8245_v60  ;;  %v5303_v42 = vadd.f32 %v5242_v10, %v1939_v3  ;;  %v5147_v29 = vpop.f32.mrb[110].mxu1  ;;  %7432 = vpow2.f32 %v5989_v48  ;;  %v5990_v43 = vmul.f32 -1.442695, %v6460_v35 }
 0xc55   :  { %v6391_v4 = vpop.f32.mrb[22].mxu0  ;;  %v7413_v20 = vpop.eup %7412  ;;  %7434 = vrcp.f32 %v5388_v56  ;;  %v6462_v36 = vadd.f32 %v5147_v29, %v8242_v59 }
 0xc56   :  { %v9014_v19 = vadd.f32 %v6391_v4, %v1953_v58  ;;  %v5149_v27 = vpop.f32.mrb[111].mxu1  ;;  %v5245_v53 = vpop.f32.mrb[23].mxu0  ;;  %7436 = vpow2.f32 %v6005_v5  ;;  %v6006_v9 = vmul.f32 -1.442695, %v6461_v26  ;;  %v1969_v5 = vadd.f32 %v9206_v47, %v8252_v13 }
 0xc57   :  { %v7415_v16 = vpop.eup %7414  ;;  %v9016_v21 = vadd.f32 %v5245_v53, %v1943_v2  ;;  %7438 = vrcp.f32 %v5482_v24  ;;  %v5991_v24 = vmul.f32 -1.442695, %v6462_v36  ;;  %v6463_v56 = vadd.f32 %v5149_v27, %v8245_v60 }
 0xc58   :  { %v7417_v33 = vpop.eup %7416  ;;  %v5545_v7 = vmul.f32 %v7415_v16, %v7413_v20  ;;  %7440 = vpow2.f32 %v5990_v43 }
 0xc59   :  { %v7419_v63 = vpop.eup %7418  ;;  %7442 = vrcp.f32 %v5483_v55  ;;  %v5153_v31 = vpop.f32.mrb[112].mxu1 }
 0xc5a   :  { %v7421_v0 = vpop.eup %7420  ;;  %v5561_v40 = vadd.f32 %v5545_v7, %v8945_v25  ;;  %v9020_v61 = vpop.f32.mrb[113].mxu1  ;;  %v6464_v20 = vadd.f32 %v5153_v31, %v8242_v59 }
 0xc5b   :  { %v7423_v11 = vpop.eup %7422  ;;  %v5484_v32 = vadd.f32 1.0, %v7421_v0  ;;  %v5157_v48 = vpop.f32.mrb[114].mxu1 }
 0xc5c   :  { %v7425_v6 = vpop.eup %7424  ;;  %7444 = vtanh.f32 %v5561_v40  ;;  %5625 = vst [vmem:[#allocation17 + $0x208] sm:$0xff] %v5561_v40  ;;  %v5546_v46 = vmul.f32 %v7423_v11, %v7419_v63  ;;  %v9023_v57 = vpop.f32.mrb[115].mxu1  ;;  %v9209_v11 = vld [vmem:[#allocation36_spill] sm:$0xff] }
 0xc5d   :  { %v7427_v3 = vpop.eup %7426  ;;  %v5389_v54 = vadd.f32 1.0, %v7425_v6  ;;  %7446 = vpow2.f32 %v6006_v9  ;;  %v1963_v36 = vadd.f32 %v9209_v11, %v8252_v13  ;;  %v9211_v11 = vld [vmem:[#allocation44_spill] sm:$0xff] }
 0xc5e   :  { %v7429_v52 = vpop.eup %7428  ;;  %v5562_v25 = vadd.f32 %v5546_v46, %v8947_v8  ;;  %7448 = vtanh.f32 %v5303_v42  ;;  %v9207_v42 = vld [vmem:[#allocation35_spill] sm:$0xff] }
 0xc5f   :  { %v7431_v58 = vpop.eup %7430  ;;  %7450 = vrcp.f32 %v5389_v54  ;;  %v5485_v35 = vadd.f32 1.0, %v7429_v52  ;;  %v1959_v29 = vadd.f32 %v9207_v42, %v8252_v13  ;;  %v6466_v52 = vadd.f32 %v5157_v48, %v8242_v59 }
 0xc60   :  { %v7433_v34 = vpop.eup %7432  ;;  %v5547_v14 = vmul.f32 %v7431_v58, %v7411_v28  ;;  %7452 = vtanh.f32 %v5562_v25  ;;  %5626 = vst [vmem:[#allocation17 + $0x218] sm:$0xff] %v5562_v25  ;;  %v9208_v28 = vld [vmem:[#allocation39_spill] sm:$0xff]  ;;  %v5992_v58 = vmul.f32 -1.442695, %v6464_v20 }
 0xc61   :  { %v7435_v41 = vpop.eup %7434  ;;  %7454 = vrcp.f32 %v5484_v32  ;;  %v1973_v4 = vadd.f32 %v9208_v28, %v8252_v13  ;;  %v5163_v62 = vpop.f32.mrb[116].mxu1  ;;  %v5993_v48 = vmul.f32 -1.442695, %v6466_v52 }
 0xc62   :  { %v7437_v1 = vpop.eup %7436  ;;  %v5563_v10 = vadd.f32 %v5547_v14, %v8950_v50  ;;  %v5548_v8 = vmul.f32 %v7435_v41, %v7417_v33  ;;  %7456 = vtanh.f32 %v5309_v39  ;;  %v6394_v2 = vpop.f32.mrb[24].mxu0  ;;  %v5390_v39 = vadd.f32 1.0, %v7433_v34 }
 0xc63   :  { %v7439_v26 = vpop.eup %7438  ;;  %7458 = vpow2.f32 %v5991_v24  ;;  %v9035_v53 = vadd.f32 %v6394_v2, %v1969_v5  ;;  %v5165_v27 = vpop.f32.mrb[117].mxu1  ;;  %v5486_v33 = vadd.f32 1.0, %v7437_v1  ;;  %v6468_v47 = vadd.f32 %v5163_v62, %v8242_v59 }
 0xc64   :  { %v7441_v43 = vpop.eup %7440  ;;  %7460 = vtanh.f32 %v5563_v10  ;;  %5627 = vst [vmem:[#allocation17 + $0x228] sm:$0xff] %v5563_v10  ;;  %v5564_v50 = vadd.f32 %v5548_v8, %v8952_v17  ;;  %v5258_v16 = vpop.f32.mrb[25].mxu0  ;;  %v6007_v17 = vmul.f32 -1.442695, %v6463_v56  ;;  %v6467_v56 = vadd.f32 %v9023_v57, %v8245_v60 }
 0xc65   :  { %v7443_v55 = vpop.eup %7442  ;;  %7462 = vrcp.f32 %v5485_v35  ;;  %v5391_v7 = vadd.f32 1.0, %v7441_v43  ;;  %v9037_v63 = vadd.f32 %v5258_v16, %v1959_v29  ;;  %v5167_v9 = vpop.f32.mrb[118].mxu1 }
 0xc66   :  { %v6395_v0 = vpop.f32.mrb[26].mxu0  ;;  %v7445_v40 = vpop.eup %7444  ;;  %7464 = vtanh.f32 %v5564_v50  ;;  %5628 = vst [vmem:[#allocation17 + $0x238] sm:$0xff] %v5564_v50  ;;  %v6009_v50 = vmul.f32 -1.442695, %v6467_v56  ;;  %v9213_v56 = vld [vmem:[#allocation42_spill] sm:$0xff] }
 0xc67   :  { %v9041_v31 = vadd.f32 %v6395_v0, %v1973_v4  ;;  %v9043_v6 = vpop.f32.mrb[119].mxu1  ;;  %v5261_v46 = vpop.f32.mrb[27].mxu0  ;;  %v5593_v54 = vmul.f32 %v7445_v40, %v7427_v3  ;;  %7466 = vrcp.f32 %v5391_v7  ;;  %v6465_v3 = vadd.f32 %v9020_v61, %v8245_v60  ;;  %v9210_v40 = vld [vmem:[#allocation41_spill] sm:$0xff] }
 0xc68   :  { %v7447_v32 = vpop.eup %7446  ;;  %7468 = vrcp.f32 %v5390_v39  ;;  %v9046_v24 = vadd.f32 %v5261_v46, %v1963_v36  ;;  %v1989_v36 = vadd.f32 %v9211_v11, %v8252_v13 }
 0xc69   :  { %v7449_v25 = vpop.eup %7448  ;;  %5609 = vst [vmem:[#allocation17 + $0x200] sm:$0xff] %v5593_v54  ;;  %7470 = vrcp.f32 %v5486_v33  ;;  %v9052_v1 = vpop.f32.mrb[120].mxu1  ;;  %v6008_v2 = vmul.f32 -1.442695, %v6465_v3 }
 0xc6a   :  { %v7451_v34 = vpop.eup %7450  ;;  %7472 = vpow2.f32 %v6007_v17  ;;  %v9057_v42 = vpop.f32.mrb[121].mxu1 }
 0xc6b   :  { %v7453_v14 = vpop.eup %7452  ;;  %v5549_v41 = vmul.f32 %v7451_v34, %v7449_v25  ;;  %7474 = vtanh.f32 %v9016_v21  ;;  %v6469_v21 = vadd.f32 %v5165_v27, %v8245_v60  ;;  %v9061_v61 = vpop.f32.mrb[122].mxu1  ;;  %v9212_v34 = vld [vmem:[#allocation45_spill] sm:$0xff] }
 0xc6c   :  { %v7455_v5 = vpop.eup %7454  ;;  %v5594_v35 = vmul.f32 %v7453_v14, %v7439_v26  ;;  %7476 = vpow2.f32 %v5992_v58  ;;  %v5487_v26 = vadd.f32 1.0, %v7447_v32  ;;  %v9063_v20 = vpop.f32.mrb[123].mxu1  ;;  %v1993_v14 = vadd.f32 %v9212_v34, %v8252_v13 }
 0xc6d   :  { %v7457_v10 = vpop.eup %7456  ;;  %v5565_v8 = vadd.f32 %v5549_v41, %v8955_v37  ;;  %7478 = vtanh.f32 %v9014_v19  ;;  %v5994_v37 = vmul.f32 -1.442695, %v6468_v47  ;;  %v6470_v19 = vadd.f32 %v5167_v9, %v8242_v59 }
 0xc6e   :  { %v7459_v29 = vpop.eup %7458  ;;  %5610 = vst [vmem:[#allocation17 + $0x210] sm:$0xff] %v5594_v35  ;;  %v6010_v16 = vmul.f32 -1.442695, %v6469_v21  ;;  %v6473_v34 = vadd.f32 %v9057_v42, %v8245_v60 }
 0xc6f   :  { %v7461_v28 = vpop.eup %7460  ;;  %7480 = vtanh.f32 %v5565_v8  ;;  %5629 = vst [vmem:[#allocation17 + $0x248] sm:$0xff] %v5565_v8  ;;  %v5392_v4 = vadd.f32 1.0, %v7459_v29  ;;  %v5995_v54 = vmul.f32 -1.442695, %v6470_v19  ;;  %v1983_v29 = vadd.f32 %v9213_v56, %v8252_v13 }
 0xc70   :  { %v7463_v62 = vpop.eup %7462  ;;  %v5595_v57 = vmul.f32 %v7461_v28, %v7443_v55  ;;  %7482 = vpow2.f32 %v5993_v48  ;;  %v1979_v55 = vadd.f32 %v9210_v40, %v8252_v13  ;;  %v6471_v13 = vadd.f32 %v9043_v6, %v8245_v60 }
 0xc71   :  { %v7465_v43 = vpop.eup %7464  ;;  %7484 = vrcp.f32 %v5392_v4  ;;  %v9072_v17 = vpop.f32.mrb[124].mxu1  ;;  %v6474_v6 = vadd.f32 %v9061_v61, %v8242_v59 }
 0xc72   :  { %v7467_v39 = vpop.eup %7466  ;;  %5611 = vst [vmem:[#allocation17 + $0x220] sm:$0xff] %v5595_v57  ;;  %v5596_v27 = vmul.f32 %v7465_v43, %v7455_v5  ;;  %7486 = vrcp.f32 %v5487_v26  ;;  %v6398_v9 = vpop.f32.mrb[28].mxu0  ;;  %v6011_v40 = vmul.f32 -1.442695, %v6471_v13 }
 0xc73   :  { %v7469_v33 = vpop.eup %7468  ;;  %v5551_v7 = vmul.f32 %v7467_v39, %v7457_v10  ;;  %7488 = vpow2.f32 %v5994_v37  ;;  %v9075_v52 = vpop.f32.mrb[125].mxu1  ;;  %v9079_v41 = vadd.f32 %v6398_v9, %v1989_v36 }
 0xc74   :  { %v9066_v0 = vpop.eup %7470  ;;  %5612 = vst [vmem:[#allocation17 + $0x230] sm:$0xff] %v5596_v27  ;;  %7490 = vpow2.f32 %v6008_v2  ;;  %v5274_v25 = vpop.f32.mrb[29].mxu0 }
 0xc75   :  { %v7473_v46 = vpop.eup %7472  ;;  %v5567_v32 = vadd.f32 %v5551_v7, %v8960_v45  ;;  %7492 = vpow2.f32 %v6009_v50  ;;  %v9081_v47 = vadd.f32 %v5274_v25, %v1979_v55  ;;  %v9083_v5 = vpop.f32.mrb[126].mxu1  ;;  %v5997_v25 = vmul.f32 -1.442695, %v6474_v6 }
 0xc76   :  { %v7475_v58 = vpop.eup %7474  ;;  %7494 = vpow2.f32 %v6010_v16  ;;  %v6399_v35 = vpop.f32.mrb[30].mxu0  ;;  %v5488_v2 = vadd.f32 1.0, %v7473_v46  ;;  %v6476_v46 = vadd.f32 %v9072_v17, %v8242_v59 }
 0xc77   :  { %v7477_v3 = vpop.eup %7476  ;;  %7496 = vtanh.f32 %v5567_v32  ;;  %5631 = vst [vmem:[#allocation17 + $0x268] sm:$0xff] %v5567_v32  ;;  %v5550_v45 = vmul.f32 %v7475_v58, %v7469_v33  ;;  %v9085_v48 = vpop.f32.mrb[127].mxu1  ;;  %v9090_v21 = vadd.f32 %v6399_v35, %v1993_v14  ;;  %v6477_v35 = vadd.f32 %v9075_v52, %v8245_v60 }
 0xc78   :  { %v5277_v10 = vpop.f32.mrb[31].mxu0  ;;  %v7479_v8 = vpop.eup %7478  ;;  %v5393_v26 = vadd.f32 1.0, %v7477_v3  ;;  %7498 = vtanh.f32 %v9037_v63 }
 0xc79   :  { %v7481_v28 = vpop.eup %7480  ;;  %v5566_v4 = vadd.f32 %v5550_v45, %v8957_v30  ;;  %7500 = vpow2.f32 %v5995_v54  ;;  %v9093_v43 = vadd.f32 %v5277_v10, %v1983_v29  ;;  %v6472_v30 = vadd.f32 %v9052_v1, %v8242_v59 }
 0xc7a   :  { %v7483_v37 = vpop.eup %7482  ;;  %v5597_v57 = vmul.f32 %v7481_v28, %v7463_v62  ;;  %7502 = vrcp.f32 %v5393_v26  ;;  %v5998_v45 = vmul.f32 -1.442695, %v6476_v46  ;;  %v6014_v29 = vmul.f32 -1.442695, %v6477_v35 }
 0xc7b   :  { %v7485_v50 = vpop.eup %7484  ;;  %7504 = vtanh.f32 %v5566_v4  ;;  %5630 = vst [vmem:[#allocation17 + $0x258] sm:$0xff] %v5566_v4  ;;  %v5394_v19 = vadd.f32 1.0, %v7483_v37 }
 0xc7c   :  { %v7487_v63 = vpop.eup %7486  ;;  %5613 = vst [vmem:[#allocation17 + $0x240] sm:$0xff] %v5597_v57  ;;  %v5552_v39 = vmul.f32 %v7485_v50, %v7479_v8  ;;  %7506 = vtanh.f32 %v9035_v53  ;;  %v5996_v53 = vmul.f32 -1.442695, %v6472_v30  ;;  %v6475_v57 = vadd.f32 %v9063_v20, %v8245_v60 }
 0xc7d   :  { %v7489_v27 = vpop.eup %7488  ;;  %7508 = vrcp.f32 %v5488_v2 }
 0xc7e   :  { %v7491_v62 = vpop.eup %7490  ;;  %v5568_v16 = vadd.f32 %v5552_v39, %v8962_v49  ;;  %v5395_v33 = vadd.f32 1.0, %v7489_v27  ;;  %7510 = vrcp.f32 %v5394_v19 }
 0xc7f   :  { %v7493_v7 = vpop.eup %7492  ;;  %v5489_v49 = vadd.f32 1.0, %v7491_v62 }
 0xc80   :  { %v7495_v55 = vpop.eup %7494  ;;  %7512 = vtanh.f32 %v5568_v16  ;;  %5632 = vst [vmem:[#allocation17 + $0x278] sm:$0xff] %v5568_v16  ;;  %v5490_v14 = vadd.f32 1.0, %v7493_v7 }
 0xc81   :  { %v7497_v11 = vpop.eup %7496  ;;  %7514 = vrcp.f32 %v5395_v33  ;;  %v5491_v8 = vadd.f32 1.0, %v7495_v55  ;;  %v6479_v33 = vadd.f32 %v9085_v48, %v8245_v60 }
 0xc82   :  { %v7499_v36 = vpop.eup %7498  ;;  %v5599_v9 = vmul.f32 %v7497_v11, %v7487_v63  ;;  %7516 = vtanh.f32 %v9041_v31 }
 0xc83   :  { %v7501_v1 = vpop.eup %7500  ;;  %7518 = vpow2.f32 %v6011_v40 }
 0xc84   :  { %v7503_v32 = vpop.eup %7502  ;;  %5615 = vst [vmem:[#allocation17 + $0x260] sm:$0xff] %v5599_v9  ;;  %v5396_v54 = vadd.f32 1.0, %v7501_v1  ;;  %7520 = vtanh.f32 %v9046_v24  ;;  %v6478_v24 = vadd.f32 %v9083_v5, %v8242_v59 }
 0xc85   :  { %v7505_v61 = vpop.eup %7504  ;;  %v5553_v58 = vmul.f32 %v7503_v32, %v7499_v36  ;;  %7522 = vpow2.f32 %v5996_v53 }
 0xc86   :  { %v5598_v31 = vmul.f32 %v7505_v61, %v9066_v0  ;;  %7524 = vrcp.f32 %v5396_v54  ;;  %v7507_v17 = vpop.eup %7506  ;;  %v6012_v0 = vmul.f32 -1.442695, %v6473_v34  ;;  %v5999_v28 = vmul.f32 -1.442695, %v6478_v24 }
 0xc87   :  { %7526 = vrcp.f32 %v5489_v49  ;;  %v5569_v3 = vadd.f32 %v5553_v58, %v8965_v22  ;;  %v7509_v10 = vpop.eup %7508 }
 0xc88   :  { %5614 = vst [vmem:[#allocation17 + $0x250] sm:$0xff] %v5598_v31  ;;  %7528 = vpow2.f32 %v5997_v25  ;;  %v7511_v42 = vpop.eup %7510 }
 0xc89   :  { %7530 = vtanh.f32 %v5569_v3  ;;  %5633 = vst [vmem:[#allocation17 + $0x288] sm:$0xff] %v5569_v3 }
 0xc8a   :  { %v7513_v56 = vpop.eup %7512  ;;  %7532 = vrcp.f32 %v5490_v14 }
 0xc8b   :  { %v7515_v52 = vpop.eup %7514  ;;  %v5600_v26 = vmul.f32 %v7513_v56, %v7509_v10  ;;  %7534 = vpow2.f32 %v5998_v45 }
 0xc8c   :  { %v7517_v22 = vpop.eup %7516  ;;  %v5555_v4 = vmul.f32 %v7515_v52, %v7507_v17  ;;  %7536 = vrcp.f32 %v5491_v8 }
 0xc8d   :  { %v7519_v37 = vpop.eup %7518  ;;  %5616 = vst [vmem:[#allocation17 + $0x270] sm:$0xff] %v5600_v26  ;;  %7538 = vpow2.f32 %v6012_v0 }
 0xc8e   :  { %v7521_v59 = vpop.eup %7520  ;;  %v5571_v5 = vadd.f32 %v5555_v4, %v8970_v23  ;;  %7540 = vpow2.f32 %v6014_v29  ;;  %v5492_v13 = vadd.f32 1.0, %v7519_v37  ;;  %v6013_v23 = vmul.f32 -1.442695, %v6475_v57 }
 0xc8f   :  { %v7523_v2 = vpop.eup %7522  ;;  %v5554_v50 = vmul.f32 %v7521_v59, %v7511_v42  ;;  %7542 = vpow2.f32 %v5999_v28 }
 0xc90   :  { %v7525_v19 = vpop.eup %7524  ;;  %7544 = vtanh.f32 %v5571_v5  ;;  %5635 = vst [vmem:[#allocation17 + $0x2a8] sm:$0xff] %v5571_v5  ;;  %v5397_v63 = vadd.f32 1.0, %v7523_v2 }
 0xc91   :  { %v7527_v39 = vpop.eup %7526  ;;  %v5556_v27 = vmul.f32 %v7525_v19, %v7517_v22  ;;  %v5570_v30 = vadd.f32 %v5554_v50, %v8967_v44  ;;  %7546 = vtanh.f32 %v9081_v47 }
 0xc92   :  { %v7529_v62 = vpop.eup %7528  ;;  %7548 = vrcp.f32 %v5397_v63 }
 0xc93   :  { %v7531_v16 = vpop.eup %7530  ;;  %v5572_v20 = vadd.f32 %v5556_v27, %v8972_v38  ;;  %7550 = vtanh.f32 %v5570_v30  ;;  %5634 = vst [vmem:[#allocation17 + $0x298] sm:$0xff] %v5570_v30  ;;  %v5398_v44 = vadd.f32 1.0, %v7529_v62  ;;  %v6015_v38 = vmul.f32 -1.442695, %v6479_v33 }
 0xc94   :  { %v7533_v7 = vpop.eup %7532  ;;  %v5601_v40 = vmul.f32 %v7531_v16, %v7527_v39  ;;  %7552 = vrcp.f32 %v5492_v13 }
 0xc95   :  { %v7535_v55 = vpop.eup %7534  ;;  %7554 = vtanh.f32 %v5572_v20  ;;  %5636 = vst [vmem:[#allocation17 + $0x2b8] sm:$0xff] %v5572_v20 }
 0xc96   :  { %v7537_v6 = vpop.eup %7536  ;;  %5617 = vst [vmem:[#allocation17 + $0x280] sm:$0xff] %v5601_v40  ;;  %7556 = vpow2.f32 %v6013_v23  ;;  %v5399_v47 = vadd.f32 1.0, %v7535_v55 }
 0xc97   :  { %v7539_v11 = vpop.eup %7538  ;;  %7558 = vtanh.f32 %v9079_v41 }
 0xc98   :  { %v7541_v53 = vpop.eup %7540  ;;  %7560 = vrcp.f32 %v5399_v47  ;;  %v5493_v46 = vadd.f32 1.0, %v7539_v11 }
 0xc99   :  { %v7543_v36 = vpop.eup %7542  ;;  %7562 = vrcp.f32 %v5398_v44  ;;  %v5495_v35 = vadd.f32 1.0, %v7541_v53 }
 0xc9a   :  { %v7545_v60 = vpop.eup %7544  ;;  %v5400_v48 = vadd.f32 1.0, %v7543_v36  ;;  %7564 = vtanh.f32 %v9090_v21 }
 0xc9b   :  { %v7547_v9 = vpop.eup %7546  ;;  %v5603_v1 = vmul.f32 %v7545_v60, %v7537_v6  ;;  %7566 = vpow2.f32 %v6015_v38 }
 0xc9c   :  { %v7549_v49 = vpop.eup %7548  ;;  %7568 = vrcp.f32 %v5400_v48 }
 0xc9d   :  { %v7551_v32 = vpop.eup %7550  ;;  %5619 = vst [vmem:[#allocation17 + $0x2a0] sm:$0xff] %v5603_v1  ;;  %v5557_v54 = vmul.f32 %v7549_v49, %v7547_v9  ;;  %7570 = vtanh.f32 %v9093_v43 }
 0xc9e   :  { %v7553_v41 = vpop.eup %7552  ;;  %v5602_v25 = vmul.f32 %v7551_v32, %v7533_v7  ;;  %7572 = vrcp.f32 %v5493_v46 }
 0xc9f   :  { %v7555_v61 = vpop.eup %7554  ;;  %v5573_v58 = vadd.f32 %v5557_v54, %v8975_v12 }
 0xca0   :  { %v7557_v34 = vpop.eup %7556  ;;  %v5604_v31 = vmul.f32 %v7555_v61, %v7553_v41  ;;  %5618 = vst [vmem:[#allocation17 + $0x290] sm:$0xff] %v5602_v25 }
 0xca1   :  { %v7559_v21 = vpop.eup %7558  ;;  %7574 = vtanh.f32 %v5573_v58  ;;  %5637 = vst [vmem:[#allocation17 + $0x2c8] sm:$0xff] %v5573_v58  ;;  %v5494_v43 = vadd.f32 1.0, %v7557_v34 }
 0xca2   :  { %v7561_v14 = vpop.eup %7560  ;;  %5620 = vst [vmem:[#allocation17 + $0x2b0] sm:$0xff] %v5604_v31  ;;  %7576 = vrcp.f32 %v5495_v35 }
 0xca3   :  { %v7563_v17 = vpop.eup %7562  ;;  %v5559_v3 = vmul.f32 %v7561_v14, %v7559_v21 }
 0xca4   :  { %v7565_v45 = vpop.eup %7564 }
 0xca5   :  { %v7567_v24 = vpop.eup %7566  ;;  %v5575_v10 = vadd.f32 %v5559_v3, %v8980_v51 }
 0xca6   :  { %v7569_v8 = vpop.eup %7568  ;;  %v5496_v12 = vadd.f32 1.0, %v7567_v24 }
 0xca7   :  { %v7571_v42 = vpop.eup %7570  ;;  %7578 = vtanh.f32 %v5575_v10  ;;  %5639 = vst [vmem:[#allocation17 + $0x2e8] sm:$0xff] %v5575_v10  ;;  %v5560_v0 = vmul.f32 %v7569_v8, %v7565_v45 }
 0xca8   :  { %v5558_v56 = vmul.f32 %v7571_v42, %v7563_v17  ;;  %7580 = vrcp.f32 %v5494_v43  ;;  %v7573_v52 = vpop.eup %7572 }
 0xca9   :  { %v5576_v29 = vadd.f32 %v5560_v0, %v8982_v15  ;;  %7582 = vrcp.f32 %v5496_v12 }
 0xcaa   :  { %v5574_v26 = vadd.f32 %v5558_v56, %v8977_v18 }
 0xcab   :  { %v7575_v28 = vpop.eup %7574  ;;  %7584 = vtanh.f32 %v5576_v29  ;;  %5640 = vst [vmem:[#allocation17 + $0x2f8] sm:$0xff] %v5576_v29 }
 0xcac   :  { %v5605_v22 = vmul.f32 %v7575_v28, %v7573_v52  ;;  %7586 = vtanh.f32 %v5574_v26  ;;  %5638 = vst [vmem:[#allocation17 + $0x2d8] sm:$0xff] %v5574_v26  ;;  %v7577_v51 = vpop.eup %7576 }
 0xcae   :  { %5621 = vst [vmem:[#allocation17 + $0x2c0] sm:$0xff] %v5605_v22 }
 0xcb1   :  { %v7579_v4 = vpop.eup %7578 }
 0xcb2   :  { %v5607_v37 = vmul.f32 %v7579_v4, %v7577_v51  ;;  %v7581_v59 = vpop.eup %7580 }
 0xcb3   :  { %v7583_v5 = vpop.eup %7582 }
 0xcb4   :  { %5623 = vst [vmem:[#allocation17 + $0x2e0] sm:$0xff] %v5607_v37 }
 0xcb5   :  { %v7585_v15 = vpop.eup %7584 }
 0xcb6   :  { %v7587_v57 = vpop.eup %7586  ;;  %v5608_v2 = vmul.f32 %v7585_v15, %v7583_v5 }
 0xcb7   :  { %v5606_v50 = vmul.f32 %v7587_v57, %v7581_v59 }
 0xcb8   :  { %5624 = vst [vmem:[#allocation17 + $0x2f0] sm:$0xff] %v5608_v2 }
 0xcb9   :  { %5622 = vst [vmem:[#allocation17 + $0x2d0] sm:$0xff] %v5606_v50 }
 0xcba   :  { %7797 = shalt.err (!%p7794_p6)
}
 0xcbb   :  { %s7798_s20 = scalar_lea.hbm %s9157_s12, 12288 }
 0xcbc   :  { %p7799_p7 = scmp.ne.s32.totalorder %s9157_s12, %s7798_s20  ;;  %p7802_p8 = scmp.lt.u32.totalorder %s7798_s20, %s9157_s12 }
 0xcbe   :  { %p7804_p9 = pnand %p7802_p8, %p7799_p7 }
 0xcc0   :  { %7807 = shalt.err (!%p7804_p9)
}
 0xcc1   :  { %5652 = dma.vmem_to_hbm [thread:$0]  %s5647_s28, 12288, %s9157_s12, [#allocation4], %s7834_s4, %s7834_s4, %s7835_s22  }
 0xcc2   :  { %7818 = dma.done.wait [#allocation4], 12288  }
 0xcc3   :  { %7819 = vsyncadd [#allocation4], 4294955008 }
 0xcc4   :  { %5656 = vsyncpa [#allocation3], 1 }
 0xcc5   :  { %5657 = vsyncpa [#allocation6], 1 }
 0xcc6   :  { %5658 = vsyncpa [#allocation9], 1 }
 0xcc7   :  { %5659 = vsyncpa [#allocation12], 1 }
 0xcc8   :  { %5660 = vsyncpa [#allocation15], 1 }
 0xcc9   :  { %5661 = vsyncpa [#allocation4], 1 }

</bundles_post_ra>
